<compile_context>
chip_gen: v6e
topology: v6e:2x2x1
jax: 0.10.0
libtpu: 0.0.40
codegen_flags: <defaults>
</compile_context>

<pallas_src>
import functools

import jax
import jax.numpy as jnp
from jax import lax
from jax.experimental import pallas as pl
from jax.experimental.pallas import tpu as pltpu

_LRELU_SLOPE = 0.2
_BN_EPS = 1e-5


# --------------------------------------------------------------------------- utils
@functools.lru_cache(maxsize=None)
def _compiler_params(dims):
    """Generation-aware VMEM limit: ~85% of physical, capped at 112 MiB.

    v7x (64 MiB/TC) -> ~54 MiB; v5e/v6e (128 MiB) -> ~108 MiB.  Leaves headroom
    for the pipeline's double buffers instead of a flat 128 MiB request.
    """
    try:
        cap = pltpu.get_tpu_info().vmem_capacity_bytes
        limit = min(int(cap * 0.85), 112 * 1024 * 1024)
    except Exception:  # pragma: no cover - conservative fallback (fits v7x too)
        limit = 48 * 1024 * 1024
    return pltpu.CompilerParams(dimension_semantics=dims, vmem_limit_bytes=limit)


def _pick_tile(dim, target, multiple=16):
    """Largest tile <= target that divides `dim` and keeps sublane/lane alignment."""
    if dim <= target:
        return dim
    for t in range(target, multiple - 1, -1):
        if dim % t == 0 and t % multiple == 0:
            return t
    return dim  # fall back to one full block (always a legal BlockSpec)


# ------------------------------------------------------------------------- kernels
def _conv1_kernel(p_ref, w_ref, b_ref, o_ref):
    """conv1 as matmul (bf16 MXU) + bias + LeakyReLU; N padded to 128 lanes."""
    y = jnp.dot(p_ref[...], w_ref[...], preferred_element_type=jnp.float32)
    y = y + b_ref[...]
    y = jnp.where(y > 0, y, _LRELU_SLOPE * y)
    o_ref[...] = y.astype(o_ref.dtype)


def _conv2_mm_stats_kernel(p_ref, w_ref, b_ref, h_ref, sum_ref, sq_ref, acc_ref):
    """conv2 matmul + bias (K-accumulated) + per-channel sum / sumsq accumulation.

    sum/sq outputs are resident across the whole grid (index map is constant), so
    the exact BatchNorm2d batch statistics come out of this single pass.
    """
    m = pl.program_id(0)
    k = pl.program_id(1)

    @pl.when(k == 0)
    def _():
        acc_ref[...] = jnp.zeros_like(acc_ref)

    @pl.when((m == 0) & (k == 0))
    def _():
        sum_ref[...] = jnp.zeros_like(sum_ref)
        sq_ref[...] = jnp.zeros_like(sq_ref)

    acc_ref[...] += jnp.dot(p_ref[...], w_ref[...],
                            preferred_element_type=jnp.float32)

    @pl.when(k == pl.num_programs(1) - 1)
    def _():
        h = acc_ref[...] + b_ref[...]
        h_ref[...] = h
        sum_ref[...] += jnp.sum(h, axis=0, keepdims=True)
        sq_ref[...] += jnp.sum(h * h, axis=0, keepdims=True)


def _scale_shift_lrelu_kernel(h_ref, scale_ref, shift_ref, o_ref):
    """Apply folded BatchNorm (x*scale + shift) + LeakyReLU, tiled over rows."""
    y = h_ref[...] * scale_ref[...] + shift_ref[...]
    y = jnp.where(y > 0, y, _LRELU_SLOPE * y)
    o_ref[...] = y.astype(o_ref.dtype)


def _psi_head_kernel(flat_ref, wpsi_ref, bpsi_ref, gamma_ref, beta_ref,
                     wphi_ref, bphi_ref, y_ref, o_ref, acc_ref):
    """Fused psi Linear (K-tiled) + BatchNorm1d + LeakyReLU + phi + label head."""
    k = pl.program_id(0)

    @pl.when(k == 0)
    def _():
        acc_ref[...] = jnp.zeros_like(acc_ref)

    acc_ref[...] += jnp.dot(flat_ref[...], wpsi_ref[...],
                            preferred_element_type=jnp.float32)

    @pl.when(k == pl.num_programs(0) - 1)
    def _():
        h = acc_ref[...] + bpsi_ref[...]
        # BatchNorm1d, training mode: biased variance over the batch rows.
        mean = jnp.mean(h, axis=0, keepdims=True)
        var = jnp.mean((h - mean) * (h - mean), axis=0, keepdims=True)
        x = (h - mean) * lax.rsqrt(var + _BN_EPS) * gamma_ref[...] + beta_ref[...]
        x = jnp.where(x > 0, x, _LRELU_SLOPE * x)
        # Embedding(max_norm=1): renormalize looked-up rows whose L2 norm > 1 (EUP rsqrt).
        y = y_ref[...].astype(jnp.float32)
        ss = jnp.sum(y * y, axis=1, keepdims=True)
        y = y * jnp.where(ss > 1.0, lax.rsqrt(ss), 1.0)
        # phi(x) + sum(y_proj * x, dim=1, keepdim=True)
        proj = jnp.dot(x, wphi_ref[...], preferred_element_type=jnp.float32)
        proj = proj + bphi_ref[...]
        inner = jnp.sum(y * x, axis=1, keepdims=True)
        o_ref[...] = (proj + inner).astype(o_ref.dtype)


# ------------------------------------------------------------------ pallas_call wrappers
def conv1_matmul(patches, w, b):
    M, K = patches.shape
    N = w.shape[1]                       # 128 (padded, lane-dense)
    tm = _pick_tile(M, 512, multiple=16)
    return pl.pallas_call(
        _conv1_kernel,
        out_shape=jax.ShapeDtypeStruct((M, N), jnp.bfloat16),
        grid=(M // tm,),
        in_specs=[
            pl.BlockSpec((tm, K), lambda i: (i, 0)),
            pl.BlockSpec((K, N), lambda i: (0, 0)),
            pl.BlockSpec((1, N), lambda i: (0, 0)),
        ],
        out_specs=pl.BlockSpec((tm, N), lambda i: (i, 0)),
        compiler_params=_compiler_params(("parallel",)),
    )(patches, w, b)


def conv2_matmul_stats(patches, w, b):
    M, K = patches.shape
    N = w.shape[1]                       # 128
    tm = _pick_tile(M, 512, multiple=16)
    tk = _pick_tile(K, 512, multiple=128)
    out_shape = (
        jax.ShapeDtypeStruct((M, N), jnp.float32),   # pre-BN conv2 output
        jax.ShapeDtypeStruct((1, N), jnp.float32),   # per-channel sum
        jax.ShapeDtypeStruct((1, N), jnp.float32),   # per-channel sum of squares
    )
    return pl.pallas_call(
        _conv2_mm_stats_kernel,
        out_shape=out_shape,
        grid=(M // tm, K // tk),
        in_specs=[
            pl.BlockSpec((tm, tk), lambda m, k: (m, k)),
            pl.BlockSpec((tk, N), lambda m, k: (k, 0)),
            pl.BlockSpec((1, N), lambda m, k: (0, 0)),
        ],
        out_specs=(
            pl.BlockSpec((tm, N), lambda m, k: (m, 0)),
            pl.BlockSpec((1, N), lambda m, k: (0, 0)),
            pl.BlockSpec((1, N), lambda m, k: (0, 0)),
        ),
        scratch_shapes=[pltpu.VMEM((tm, N), jnp.float32)],
        # The stats outputs are accumulated across the M axis too, so both grid
        # axes must be "arbitrary" (they are revisited outputs).
        compiler_params=_compiler_params(("arbitrary", "arbitrary")),
    )(patches, w, b)


def scale_shift_lrelu(h, scale, shift):
    M, N = h.shape
    tm = _pick_tile(M, 1024, multiple=16)
    return pl.pallas_call(
        _scale_shift_lrelu_kernel,
        out_shape=jax.ShapeDtypeStruct((M, N), jnp.bfloat16),
        grid=(M // tm,),
        in_specs=[
            pl.BlockSpec((tm, N), lambda i: (i, 0)),
            pl.BlockSpec((1, N), lambda i: (0, 0)),
            pl.BlockSpec((1, N), lambda i: (0, 0)),
        ],
        out_specs=pl.BlockSpec((tm, N), lambda i: (i, 0)),
        compiler_params=_compiler_params(("parallel",)),
    )(h, scale, shift)


def psi_bn_head(flat, w_psi, b_psi, gamma, beta, w_phi, b_phi, y_raw):
    B, K = flat.shape
    H = w_psi.shape[1]                   # 1024
    O = w_phi.shape[1]                   # output_dim
    tk = _pick_tile(K, 512, multiple=128)
    return pl.pallas_call(
        _psi_head_kernel,
        out_shape=jax.ShapeDtypeStruct((B, O), jnp.float32),
        grid=(K // tk,),
        in_specs=[
            pl.BlockSpec((B, tk), lambda k: (0, k)),
            pl.BlockSpec((tk, H), lambda k: (k, 0)),
            pl.BlockSpec((1, H), lambda k: (0, 0)),
            pl.BlockSpec((1, H), lambda k: (0, 0)),
            pl.BlockSpec((1, H), lambda k: (0, 0)),
            pl.BlockSpec((H, O), lambda k: (0, 0)),
            pl.BlockSpec((1, O), lambda k: (0, 0)),
            pl.BlockSpec((B, H), lambda k: (0, 0)),
        ],
        out_specs=pl.BlockSpec((B, O), lambda k: (0, 0)),
        scratch_shapes=[pltpu.VMEM((B, H), jnp.float32)],
        compiler_params=_compiler_params(("arbitrary",)),
    )(flat, w_psi, b_psi, gamma, beta, w_phi, b_phi, y_raw)


# ---------------------------------------------------------------------- XLA glue
def im2col(x_nhwc, k, stride, pad):
    """Extract kxk patches; column order (C, kh, kw) matches PyTorch conv weights."""
    B, H, W, C = x_nhwc.shape
    xp = jnp.pad(x_nhwc, ((0, 0), (pad, pad), (pad, pad), (0, 0)))
    Ho = (H + 2 * pad - k) // stride + 1
    Wo = (W + 2 * pad - k) // stride + 1
    cols = []
    for kh in range(k):
        for kw in range(k):
            cols.append(xp[:, kh:kh + stride * Ho:stride, kw:kw + stride * Wo:stride, :])
    patches = jnp.stack(cols, axis=3).reshape(B, Ho, Wo, k, k, C)
    patches = jnp.transpose(patches, (0, 1, 2, 5, 3, 4)).reshape(B * Ho * Wo, C * k * k)
    return patches, Ho, Wo


# -------------------------------------------------------------------- parameters
def init_params(key, input_dim, output_dim, input_size, class_num):
    ks = jax.random.split(key, 8)
    feat = 128 * (input_size // 4) * (input_size // 4)
    return {
        # Embedding(class_num, 1024, max_norm=1)
        "embed_w": jax.random.normal(ks[0], (class_num, 1024), jnp.float32),
        # Conv2d(input_dim, 64, 4, 2, 1)
        "conv1_w": 0.02 * jax.random.normal(ks[1], (64, input_dim, 4, 4), jnp.float32),
        "conv1_b": jnp.zeros((64,), jnp.float32),
        # Conv2d(64, 128, 4, 2, 1)
        "conv2_w": 0.02 * jax.random.normal(ks[2], (128, 64, 4, 4), jnp.float32),
        "conv2_b": jnp.zeros((128,), jnp.float32),
        # BatchNorm2d(128)
        "bn2_gamma": 1.0 + 0.02 * jax.random.normal(ks[3], (128,), jnp.float32),
        "bn2_beta": jnp.zeros((128,), jnp.float32),
        # Linear(feat, 1024)
        "psi_w": 0.02 * jax.random.normal(ks[4], (1024, feat), jnp.float32),
        "psi_b": jnp.zeros((1024,), jnp.float32),
        # BatchNorm1d(1024)
        "bn1d_gamma": 1.0 + 0.02 * jax.random.normal(ks[5], (1024,), jnp.float32),
        "bn1d_beta": jnp.zeros((1024,), jnp.float32),
        # Linear(1024, output_dim)
        "phi_w": 0.02 * jax.random.normal(ks[6], (output_dim, 1024), jnp.float32),
        "phi_b": jnp.zeros((output_dim,), jnp.float32),
    }


def prepare_params(p, input_dim, input_size):
    """One-time conversion from PyTorch layouts to kernel-ready layouts."""
    H2 = W2 = input_size // 4
    feat = 128 * H2 * W2
    # conv1 weight -> (in*16, 64), padded to 128 output lanes (zeros).
    w1 = p["conv1_w"].reshape(64, input_dim * 16).T
    w1 = jnp.pad(w1, ((0, 0), (0, 64)))
    b1 = jnp.pad(p["conv1_b"], (0, 64))
    # conv2 weight -> (64*16, 128)
    w2 = p["conv2_w"].reshape(128, 64 * 16).T
    # psi_w consumes the NHWC-flattened conv2 activation directly: permute its
    # input columns once here (PyTorch flatten order is (C, H, W); ours is (H, W, C)).
    wpsi = p["psi_w"].reshape(1024, 128, H2, W2)
    wpsi = jnp.transpose(wpsi, (0, 2, 3, 1)).reshape(1024, feat)
    return {
        "conv1_w": w1.astype(jnp.bfloat16),
        "conv1_b": b1.reshape(1, 128).astype(jnp.float32),
        "conv2_w": w2.astype(jnp.bfloat16),
        "conv2_b": p["conv2_b"].reshape(1, 128).astype(jnp.float32),
        "bn2_gamma": p["bn2_gamma"].astype(jnp.float32),
        "bn2_beta": p["bn2_beta"].astype(jnp.float32),
        "psi_w": wpsi.T.astype(jnp.bfloat16),                 # (feat, 1024)
        "psi_b": p["psi_b"].reshape(1, 1024).astype(jnp.float32),
        "bn1d_gamma": p["bn1d_gamma"].reshape(1, 1024).astype(jnp.float32),
        "bn1d_beta": p["bn1d_beta"].reshape(1, 1024).astype(jnp.float32),
        "phi_w": p["phi_w"].T.astype(jnp.float32),            # (1024, output_dim)
        "phi_b": p["phi_b"].reshape(1, -1).astype(jnp.float32),
        "embed_w": p["embed_w"].astype(jnp.float32),
    }


# ----------------------------------------------------------------------- forward
def discriminator_forward(kp, x_nchw, label):
    B = x_nchw.shape[0]
    # NCHW (PyTorch) -> NHWC, bf16 for the MXU / halved HBM traffic.
    x = jnp.transpose(x_nchw, (0, 2, 3, 1)).astype(jnp.bfloat16)

    # conv1: Conv2d(in, 64, 4, 2, 1) + LeakyReLU(0.2); output padded to 128 channels.
    patches1, H1, W1 = im2col(x, k=4, stride=2, pad=1)
    h1 = conv1_matmul(patches1, kp["conv1_w"], kp["conv1_b"])        # (B*H1*W1, 128) bf16
    h1 = h1.reshape(B, H1, W1, 128)[..., :64]                        # drop zero padding

    # conv2: Conv2d(64, 128, 4, 2, 1) + BatchNorm2d(128) + LeakyReLU(0.2)
    # TODO(synk): replace the materialized im2col with an implicit-GEMM kernel
    # (k*k grid axis over a space-to-depth h1 layout) to avoid the 16x expansion.
    patches2, H2, W2 = im2col(h1, k=4, stride=2, pad=1)              # bf16, K = 1024
    h2_raw, csum, csq = conv2_matmul_stats(patches2, kp["conv2_w"], kp["conv2_b"])
    M2 = B * H2 * W2
    # Finalize BN2d train-mode stats (tiny 128-length vector math) and fold into
    # a single scale/shift applied by the tiled pass-2 kernel.
    mean = csum[0] / M2
    var = jnp.maximum(csq[0] / M2 - mean * mean, 0.0)                # biased variance
    inv = kp["bn2_gamma"] * lax.rsqrt(var + _BN_EPS)
    scale = inv.reshape(1, 128)
    shift = (kp["bn2_beta"] - mean * inv).reshape(1, 128)
    h2 = scale_shift_lrelu(h2_raw, scale, shift)                     # (M2, 128) bf16

    # Flatten: rows of h2 are already in (b, h, w) order with channels last, and
    # psi_w's columns were permuted at prepare_params() time -> no runtime transpose.
    flat = h2.reshape(B, H2 * W2 * 128)

    # Embedding lookup stays XLA glue; max_norm renorm + projection are in-kernel.
    y_raw = jnp.take(kp["embed_w"], label, axis=0)                   # (B, 1024) f32

    # Fused psi (Linear + BatchNorm1d + LeakyReLU) + phi + label-projection head.
    return psi_bn_head(flat, kp["psi_w"], kp["psi_b"], kp["bn1d_gamma"],
                       kp["bn1d_beta"], kp["phi_w"], kp["phi_b"], y_raw)


# -------------------------------------------------------------------------- main
if __name__ == "__main__":
    B, input_dim, output_dim, input_size, class_num = 4, 1, 1, 16, 10

    key = jax.random.PRNGKey(0)
    k_params, k_x, k_label = jax.random.split(key, 3)

    params = init_params(k_params, input_dim, output_dim, input_size, class_num)
    kparams = prepare_params(params, input_dim, input_size)

    x = jax.random.normal(k_x, (B, input_dim, input_size, input_size), jnp.float32)
    label = jax.random.randint(k_label, (B,), 0, class_num)

    fwd = jax.jit(discriminator_forward)
    out = jax.block_until_ready(fwd(kparams, x, label))
    assert out.shape == (B, output_dim)
    print("KERNEL_OK")
</pallas_src>

<mosaic_0001>
module attributes {stable_mosaic.version = 11 : i64} {
  func.func @_conv1_kernel(%arg0: i32, %arg1: memref<256x16xbf16, #tpu.memory_space<vmem>>, %arg2: memref<16x128xbf16, #tpu.memory_space<vmem>>, %arg3: memref<1x128xf32, #tpu.memory_space<vmem>>, %arg4: memref<256x128xbf16, #tpu.memory_space<vmem>>) attributes {dimension_semantics = [#tpu.dimension_semantics<parallel>], iteration_bounds = array<i64: 1>, scalar_prefetch = 0 : i64, scratch_operands = 0 : i64, tpu.core_type = #tpu.core_type<tc>, window_params = [{transform_indices = @transform_0, window_bounds = array<i64: 256, 16>}, {pipeline_mode = #tpu.pipeline_mode<synchronous>, transform_indices = @transform_1, window_bounds = array<i64: 16, 128>}, {pipeline_mode = #tpu.pipeline_mode<synchronous>, transform_indices = @transform_2, window_bounds = array<i64: 1, 128>}, {transform_indices = @transform_3, window_bounds = array<i64: 256, 128>}]} {
    %c0 = arith.constant 0 : index
    %c0_0 = arith.constant 0 : index
    %0 = vector.load %arg1[%c0, %c0_0] : memref<256x16xbf16, #tpu.memory_space<vmem>>, vector<256x16xbf16>
    %c0_1 = arith.constant 0 : index
    %c0_2 = arith.constant 0 : index
    %1 = vector.load %arg2[%c0_1, %c0_2] : memref<16x128xbf16, #tpu.memory_space<vmem>>, vector<16x128xbf16>
    %cst = arith.constant dense<0.000000e+00> : vector<256x128xf32>
    %2 = tpu.matmul %0, %1, %cst {dimension_numbers = #tpu.dot_dimension_numbers<[1], [0], [0], [1], [0, 0, 1, 1], [], []>} : vector<256x16xbf16>, vector<16x128xbf16>, vector<256x128xf32> -> vector<256x128xf32>
    %c0_3 = arith.constant 0 : index
    %c0_4 = arith.constant 0 : index
    %3 = vector.load %arg3[%c0_3, %c0_4] : memref<1x128xf32, #tpu.memory_space<vmem>>, vector<1x128xf32>
    %4 = vector.broadcast %3 : vector<1x128xf32> to vector<256x128xf32>
    %5 = arith.addf %2, %4 : vector<256x128xf32>
    %cst_5 = arith.constant 0.000000e+00 : f32
    %6 = vector.broadcast %cst_5 : f32 to vector<256x128xf32>
    %7 = arith.cmpf ogt, %5, %6 : vector<256x128xf32>
    %cst_6 = arith.constant 2.000000e-01 : f32
    %8 = vector.broadcast %cst_6 : f32 to vector<256x128xf32>
    %9 = arith.mulf %8, %5 : vector<256x128xf32>
    %10 = arith.select %7, %5, %9 : vector<256x128xi1>, vector<256x128xf32>
    %11 = arith.truncf %10 : vector<256x128xf32> to vector<256x128xbf16>
    %c0_7 = arith.constant 0 : index
    %c0_8 = arith.constant 0 : index
    %12 = vector.load %arg4[%c0_7, %c0_8] : memref<256x128xbf16, #tpu.memory_space<vmem>>, vector<256x128xbf16>
    tpu.vector_store %arg4[%c0_7, %c0_8], %11 {strides = array<i32>} : memref<256x128xbf16, #tpu.memory_space<vmem>>, vector<256x128xbf16>,
    return
  }
  func.func @transform_0(%arg0: i32) -> (i32, i32) {
    %c0_i32 = arith.constant 0 : i32
    %c0_i32_0 = arith.constant 0 : i32
    return %arg0, %c0_i32 : i32, i32
  }
  func.func @transform_1(%arg0: i32) -> (i32, i32) {
    %c0_i32 = arith.constant 0 : i32
    %c0_i32_0 = arith.constant 0 : i32
    %c0_i32_1 = arith.constant 0 : i32
    return %c0_i32, %c0_i32_0 : i32, i32
  }
  func.func @transform_2(%arg0: i32) -> (i32, i32) {
    %c0_i32 = arith.constant 0 : i32
    %c0_i32_0 = arith.constant 0 : i32
    %c0_i32_1 = arith.constant 0 : i32
    return %c0_i32, %c0_i32_0 : i32, i32
  }
  func.func @transform_3(%arg0: i32) -> (i32, i32) {
    %c0_i32 = arith.constant 0 : i32
    %c0_i32_0 = arith.constant 0 : i32
    return %arg0, %c0_i32 : i32, i32
  }
}

module attributes {stable_mosaic.version = 11 : i64} {
  func.func @_conv2_mm_stats_kernel(%arg0: i32, %arg1: i32, %arg2: memref<64x512xbf16, #tpu.memory_space<vmem>>, %arg3: memref<512x128xbf16, #tpu.memory_space<vmem>>, %arg4: memref<1x128xf32, #tpu.memory_space<vmem>>, %arg5: memref<64x128xf32, #tpu.memory_space<vmem>>, %arg6: memref<1x128xf32, #tpu.memory_space<vmem>>, %arg7: memref<1x128xf32, #tpu.memory_space<vmem>>, %arg8: memref<64x128xf32, #tpu.memory_space<vmem>>) attributes {dimension_semantics = [#tpu.dimension_semantics<arbitrary>, #tpu.dimension_semantics<arbitrary>], iteration_bounds = array<i64: 1, 2>, scalar_prefetch = 0 : i64, scratch_operands = 1 : i64, tpu.core_type = #tpu.core_type<tc>, window_params = [{transform_indices = @transform_0, window_bounds = array<i64: 64, 512>}, {transform_indices = @transform_1, window_bounds = array<i64: 512, 128>}, {pipeline_mode = #tpu.pipeline_mode<synchronous>, transform_indices = @transform_2, window_bounds = array<i64: 1, 128>}, {transform_indices = @transform_3, window_bounds = array<i64: 64, 128>}, {pipeline_mode = #tpu.pipeline_mode<synchronous>, transform_indices = @transform_4, window_bounds = array<i64: 1, 128>}, {pipeline_mode = #tpu.pipeline_mode<synchronous>, transform_indices = @transform_5, window_bounds = array<i64: 1, 128>}]} {
    %c0_i32 = arith.constant 0 : i32
    %0 = arith.cmpi eq, %arg1, %c0_i32 : i32
    %1 = arith.extui %0 : i1 to i32
    %c0_i32_0 = arith.constant 0 : i32
    %2 = arith.cmpi ne, %1, %c0_i32_0 : i32
    scf.if %2 {
      %cst_12 = arith.constant 0.000000e+00 : f32
      %17 = vector.broadcast %cst_12 : f32 to vector<64x128xf32>
      %c0_13 = arith.constant 0 : index
      %c0_14 = arith.constant 0 : index
      %18 = vector.load %arg8[%c0_13, %c0_14] : memref<64x128xf32, #tpu.memory_space<vmem>>, vector<64x128xf32>
      tpu.vector_store %arg8[%c0_13, %c0_14], %17 {strides = array<i32>} : memref<64x128xf32, #tpu.memory_space<vmem>>, vector<64x128xf32>,
    } else {
    }
    %c0_i32_1 = arith.constant 0 : i32
    %3 = arith.cmpi eq, %arg0, %c0_i32_1 : i32
    %c0_i32_2 = arith.constant 0 : i32
    %4 = arith.cmpi eq, %arg1, %c0_i32_2 : i32
    %5 = arith.andi %3, %4 : i1
    %6 = arith.extui %5 : i1 to i32
    %c0_i32_3 = arith.constant 0 : i32
    %7 = arith.cmpi ne, %6, %c0_i32_3 : i32
    scf.if %7 {
      %cst_12 = arith.constant 0.000000e+00 : f32
      %17 = vector.broadcast %cst_12 : f32 to vector<1x128xf32>
      %c0_13 = arith.constant 0 : index
      %c0_14 = arith.constant 0 : index
      %18 = vector.load %arg6[%c0_13, %c0_14] : memref<1x128xf32, #tpu.memory_space<vmem>>, vector<1x128xf32>
      tpu.vector_store %arg6[%c0_13, %c0_14], %17 {strides = array<i32>} : memref<1x128xf32, #tpu.memory_space<vmem>>, vector<1x128xf32>,
      %cst_15 = arith.constant 0.000000e+00 : f32
      %19 = vector.broadcast %cst_15 : f32 to vector<1x128xf32>
      %c0_16 = arith.constant 0 : index
      %c0_17 = arith.constant 0 : index
      %20 = vector.load %arg7[%c0_16, %c0_17] : memref<1x128xf32, #tpu.memory_space<vmem>>, vector<1x128xf32>
      tpu.vector_store %arg7[%c0_16, %c0_17], %19 {strides = array<i32>} : memref<1x128xf32, #tpu.memory_space<vmem>>, vector<1x128xf32>,
    } else {
    }
    %c0 = arith.constant 0 : index
    %c0_4 = arith.constant 0 : index
    %8 = vector.load %arg8[%c0, %c0_4] : memref<64x128xf32, #tpu.memory_space<vmem>>, vector<64x128xf32>
    %c0_5 = arith.constant 0 : index
    %c0_6 = arith.constant 0 : index
    %9 = vector.load %arg2[%c0_5, %c0_6] : memref<64x512xbf16, #tpu.memory_space<vmem>>, vector<64x512xbf16>
    %c0_7 = arith.constant 0 : index
    %c0_8 = arith.constant 0 : index
    %10 = vector.load %arg3[%c0_7, %c0_8] : memref<512x128xbf16, #tpu.memory_space<vmem>>, vector<512x128xbf16>
    %cst = arith.constant dense<0.000000e+00> : vector<64x128xf32>
    %11 = tpu.matmul %9, %10, %cst {dimension_numbers = #tpu.dot_dimension_numbers<[1], [0], [0], [1], [0, 0, 1, 1], [], []>} : vector<64x512xbf16>, vector<512x128xbf16>, vector<64x128xf32> -> vector<64x128xf32>
    %12 = arith.addf %8, %11 : vector<64x128xf32>
    %c0_9 = arith.constant 0 : index
    %c0_10 = arith.constant 0 : index
    %13 = vector.load %arg8[%c0_9, %c0_10] : memref<64x128xf32, #tpu.memory_space<vmem>>, vector<64x128xf32>
    tpu.vector_store %arg8[%c0_9, %c0_10], %12 {strides = array<i32>} : memref<64x128xf32, #tpu.memory_space<vmem>>, vector<64x128xf32>,
    %c1_i32 = arith.constant 1 : i32
    %14 = arith.cmpi eq, %arg1, %c1_i32 : i32
    %15 = arith.extui %14 : i1 to i32
    %c0_i32_11 = arith.constant 0 : i32
    %16 = arith.cmpi ne, %15, %c0_i32_11 : i32
    scf.if %16 {
      %c0_12 = arith.constant 0 : index
      %c0_13 = arith.constant 0 : index
      %17 = vector.load %arg8[%c0_12, %c0_13] : memref<64x128xf32, #tpu.memory_space<vmem>>, vector<64x128xf32>
      %c0_14 = arith.constant 0 : index
      %c0_15 = arith.constant 0 : index
      %18 = vector.load %arg4[%c0_14, %c0_15] : memref<1x128xf32, #tpu.memory_space<vmem>>, vector<1x128xf32>
      %19 = vector.broadcast %18 : vector<1x128xf32> to vector<64x128xf32>
      %20 = arith.addf %17, %19 : vector<64x128xf32>
      %c0_16 = arith.constant 0 : index
      %c0_17 = arith.constant 0 : index
      %21 = vector.load %arg5[%c0_16, %c0_17] : memref<64x128xf32, #tpu.memory_space<vmem>>, vector<64x128xf32>
      tpu.vector_store %arg5[%c0_16, %c0_17], %20 {strides = array<i32>} : memref<64x128xf32, #tpu.memory_space<vmem>>, vector<64x128xf32>,
      %c0_18 = arith.constant 0 : index
      %c0_19 = arith.constant 0 : index
      %22 = vector.load %arg6[%c0_18, %c0_19] : memref<1x128xf32, #tpu.memory_space<vmem>>, vector<1x128xf32>
      %cst_20 = arith.constant dense<0.000000e+00> : vector<128xf32>
      %23 = vector.multi_reduction <add>, %20, %cst_20 [0] : vector<64x128xf32> to vector<128xf32>
      %24 = vector.shape_cast %23 : vector<128xf32> to vector<1x128xf32>
      %25 = arith.addf %22, %24 : vector<1x128xf32>
      %c0_21 = arith.constant 0 : index
      %c0_22 = arith.constant 0 : index
      %26 = vector.load %arg6[%c0_21, %c0_22] : memref<1x128xf32, #tpu.memory_space<vmem>>, vector<1x128xf32>
      tpu.vector_store %arg6[%c0_21, %c0_22], %25 {strides = array<i32>} : memref<1x128xf32, #tpu.memory_space<vmem>>, vector<1x128xf32>,
      %c0_23 = arith.constant 0 : index
      %c0_24 = arith.constant 0 : index
      %27 = vector.load %arg7[%c0_23, %c0_24] : memref<1x128xf32, #tpu.memory_space<vmem>>, vector<1x128xf32>
      %28 = arith.mulf %20, %20 : vector<64x128xf32>
      %cst_25 = arith.constant dense<0.000000e+00> : vector<128xf32>
      %29 = vector.multi_reduction <add>, %28, %cst_25 [0] : vector<64x128xf32> to vector<128xf32>
      %30 = vector.shape_cast %29 : vector<128xf32> to vector<1x128xf32>
      %31 = arith.addf %27, %30 : vector<1x128xf32>
      %c0_26 = arith.constant 0 : index
      %c0_27 = arith.constant 0 : index
      %32 = vector.load %arg7[%c0_26, %c0_27] : memref<1x128xf32, #tpu.memory_space<vmem>>, vector<1x128xf32>
      tpu.vector_store %arg7[%c0_26, %c0_27], %31 {strides = array<i32>} : memref<1x128xf32, #tpu.memory_space<vmem>>, vector<1x128xf32>,
    } else {
    }
    return
  }
  func.func @transform_0(%arg0: i32, %arg1: i32) -> (i32, i32) {
    %c0_i32 = arith.constant 0 : i32
    return %arg0, %arg1 : i32, i32
  }
  func.func @transform_1(%arg0: i32, %arg1: i32) -> (i32, i32) {
    %c0_i32 = arith.constant 0 : i32
    %c0_i32_0 = arith.constant 0 : i32
    return %arg1, %c0_i32 : i32, i32
  }
  func.func @transform_2(%arg0: i32, %arg1: i32) -> (i32, i32) {
    %c0_i32 = arith.constant 0 : i32
    %c0_i32_0 = arith.constant 0 : i32
    %c0_i32_1 = arith.constant 0 : i32
    return %c0_i32, %c0_i32_0 : i32, i32
  }
  func.func @transform_3(%arg0: i32, %arg1: i32) -> (i32, i32) {
    %c0_i32 = arith.constant 0 : i32
    %c0_i32_0 = arith.constant 0 : i32
    return %arg0, %c0_i32 : i32, i32
  }
  func.func @transform_4(%arg0: i32, %arg1: i32) -> (i32, i32) {
    %c0_i32 = arith.constant 0 : i32
    %c0_i32_0 = arith.constant 0 : i32
    %c0_i32_1 = arith.constant 0 : i32
    return %c0_i32, %c0_i32_0 : i32, i32
  }
  func.func @transform_5(%arg0: i32, %arg1: i32) -> (i32, i32) {
    %c0_i32 = arith.constant 0 : i32
    %c0_i32_0 = arith.constant 0 : i32
    %c0_i32_1 = arith.constant 0 : i32
    return %c0_i32, %c0_i32_0 : i32, i32
  }
}

module attributes {stable_mosaic.version = 11 : i64} {
  func.func @_scale_shift_lrelu_kernel(%arg0: i32, %arg1: memref<64x128xf32, #tpu.memory_space<vmem>>, %arg2: memref<1x128xf32, #tpu.memory_space<vmem>>, %arg3: memref<1x128xf32, #tpu.memory_space<vmem>>, %arg4: memref<64x128xbf16, #tpu.memory_space<vmem>>) attributes {dimension_semantics = [#tpu.dimension_semantics<parallel>], iteration_bounds = array<i64: 1>, scalar_prefetch = 0 : i64, scratch_operands = 0 : i64, tpu.core_type = #tpu.core_type<tc>, window_params = [{transform_indices = @transform_0, window_bounds = array<i64: 64, 128>}, {pipeline_mode = #tpu.pipeline_mode<synchronous>, transform_indices = @transform_1, window_bounds = array<i64: 1, 128>}, {pipeline_mode = #tpu.pipeline_mode<synchronous>, transform_indices = @transform_2, window_bounds = array<i64: 1, 128>}, {transform_indices = @transform_3, window_bounds = array<i64: 64, 128>}]} {
    %c0 = arith.constant 0 : index
    %c0_0 = arith.constant 0 : index
    %0 = vector.load %arg1[%c0, %c0_0] : memref<64x128xf32, #tpu.memory_space<vmem>>, vector<64x128xf32>
    %c0_1 = arith.constant 0 : index
    %c0_2 = arith.constant 0 : index
    %1 = vector.load %arg2[%c0_1, %c0_2] : memref<1x128xf32, #tpu.memory_space<vmem>>, vector<1x128xf32>
    %2 = vector.broadcast %1 : vector<1x128xf32> to vector<64x128xf32>
    %3 = arith.mulf %0, %2 : vector<64x128xf32>
    %c0_3 = arith.constant 0 : index
    %c0_4 = arith.constant 0 : index
    %4 = vector.load %arg3[%c0_3, %c0_4] : memref<1x128xf32, #tpu.memory_space<vmem>>, vector<1x128xf32>
    %5 = vector.broadcast %4 : vector<1x128xf32> to vector<64x128xf32>
    %6 = arith.addf %3, %5 : vector<64x128xf32>
    %cst = arith.constant 0.000000e+00 : f32
    %7 = vector.broadcast %cst : f32 to vector<64x128xf32>
    %8 = arith.cmpf ogt, %6, %7 : vector<64x128xf32>
    %cst_5 = arith.constant 2.000000e-01 : f32
    %9 = vector.broadcast %cst_5 : f32 to vector<64x128xf32>
    %10 = arith.mulf %9, %6 : vector<64x128xf32>
    %11 = arith.select %8, %6, %10 : vector<64x128xi1>, vector<64x128xf32>
    %12 = arith.truncf %11 : vector<64x128xf32> to vector<64x128xbf16>
    %c0_6 = arith.constant 0 : index
    %c0_7 = arith.constant 0 : index
    %13 = vector.load %arg4[%c0_6, %c0_7] : memref<64x128xbf16, #tpu.memory_space<vmem>>, vector<64x128xbf16>
    tpu.vector_store %arg4[%c0_6, %c0_7], %12 {strides = array<i32>} : memref<64x128xbf16, #tpu.memory_space<vmem>>, vector<64x128xbf16>,
    return
  }
  func.func @transform_0(%arg0: i32) -> (i32, i32) {
    %c0_i32 = arith.constant 0 : i32
    %c0_i32_0 = arith.constant 0 : i32
    return %arg0, %c0_i32 : i32, i32
  }
  func.func @transform_1(%arg0: i32) -> (i32, i32) {
    %c0_i32 = arith.constant 0 : i32
    %c0_i32_0 = arith.constant 0 : i32
    %c0_i32_1 = arith.constant 0 : i32
    return %c0_i32, %c0_i32_0 : i32, i32
  }
  func.func @transform_2(%arg0: i32) -> (i32, i32) {
    %c0_i32 = arith.constant 0 : i32
    %c0_i32_0 = arith.constant 0 : i32
    %c0_i32_1 = arith.constant 0 : i32
    return %c0_i32, %c0_i32_0 : i32, i32
  }
  func.func @transform_3(%arg0: i32) -> (i32, i32) {
    %c0_i32 = arith.constant 0 : i32
    %c0_i32_0 = arith.constant 0 : i32
    return %arg0, %c0_i32 : i32, i32
  }
}

module attributes {stable_mosaic.version = 11 : i64} {
  func.func @_psi_head_kernel(%arg0: i32, %arg1: memref<4x512xbf16, #tpu.memory_space<vmem>>, %arg2: memref<512x1024xbf16, #tpu.memory_space<vmem>>, %arg3: memref<1x1024xf32, #tpu.memory_space<vmem>>, %arg4: memref<1x1024xf32, #tpu.memory_space<vmem>>, %arg5: memref<1x1024xf32, #tpu.memory_space<vmem>>, %arg6: memref<1024x1xf32, #tpu.memory_space<vmem>>, %arg7: memref<1x1xf32, #tpu.memory_space<vmem>>, %arg8: memref<4x1024xf32, #tpu.memory_space<vmem>>, %arg9: memref<4x1xf32, #tpu.memory_space<vmem>>, %arg10: memref<4x1024xf32, #tpu.memory_space<vmem>>) attributes {dimension_semantics = [#tpu.dimension_semantics<arbitrary>], iteration_bounds = array<i64: 4>, scalar_prefetch = 0 : i64, scratch_operands = 1 : i64, tpu.core_type = #tpu.core_type<tc>, window_params = [{transform_indices = @transform_0, window_bounds = array<i64: 4, 512>}, {transform_indices = @transform_1, window_bounds = array<i64: 512, 1024>}, {pipeline_mode = #tpu.pipeline_mode<synchronous>, transform_indices = @transform_2, window_bounds = array<i64: 1, 1024>}, {pipeline_mode = #tpu.pipeline_mode<synchronous>, transform_indices = @transform_3, window_bounds = array<i64: 1, 1024>}, {pipeline_mode = #tpu.pipeline_mode<synchronous>, transform_indices = @transform_4, window_bounds = array<i64: 1, 1024>}, {pipeline_mode = #tpu.pipeline_mode<synchronous>, transform_indices = @transform_5, window_bounds = array<i64: 1024, 1>}, {pipeline_mode = #tpu.pipeline_mode<synchronous>, transform_indices = @transform_6, window_bounds = array<i64: 1, 1>}, {pipeline_mode = #tpu.pipeline_mode<synchronous>, transform_indices = @transform_7, window_bounds = array<i64: 4, 1024>}, {pipeline_mode = #tpu.pipeline_mode<synchronous>, transform_indices = @transform_8, window_bounds = array<i64: 4, 1>}]} {
    %c0_i32 = arith.constant 0 : i32
    %0 = arith.cmpi eq, %arg0, %c0_i32 : i32
    %1 = arith.extui %0 : i1 to i32
    %c0_i32_0 = arith.constant 0 : i32
    %2 = arith.cmpi ne, %1, %c0_i32_0 : i32
    scf.if %2 {
      %cst_9 = arith.constant 0.000000e+00 : f32
      %12 = vector.broadcast %cst_9 : f32 to vector<4x1024xf32>
      %c0_10 = arith.constant 0 : index
      %c0_11 = arith.constant 0 : index
      %13 = vector.load %arg10[%c0_10, %c0_11] : memref<4x1024xf32, #tpu.memory_space<vmem>>, vector<4x1024xf32>
      tpu.vector_store %arg10[%c0_10, %c0_11], %12 {strides = array<i32>} : memref<4x1024xf32, #tpu.memory_space<vmem>>, vector<4x1024xf32>,
    } else {
    }
    %c0 = arith.constant 0 : index
    %c0_1 = arith.constant 0 : index
    %3 = vector.load %arg10[%c0, %c0_1] : memref<4x1024xf32, #tpu.memory_space<vmem>>, vector<4x1024xf32>
    %c0_2 = arith.constant 0 : index
    %c0_3 = arith.constant 0 : index
    %4 = vector.load %arg1[%c0_2, %c0_3] : memref<4x512xbf16, #tpu.memory_space<vmem>>, vector<4x512xbf16>
    %c0_4 = arith.constant 0 : index
    %c0_5 = arith.constant 0 : index
    %5 = vector.load %arg2[%c0_4, %c0_5] : memref<512x1024xbf16, #tpu.memory_space<vmem>>, vector<512x1024xbf16>
    %cst = arith.constant dense<0.000000e+00> : vector<4x1024xf32>
    %6 = tpu.matmul %4, %5, %cst {dimension_numbers = #tpu.dot_dimension_numbers<[1], [0], [0], [1], [0, 0, 1, 1], [], []>} : vector<4x512xbf16>, vector<512x1024xbf16>, vector<4x1024xf32> -> vector<4x1024xf32>
    %7 = arith.addf %3, %6 : vector<4x1024xf32>
    %c0_6 = arith.constant 0 : index
    %c0_7 = arith.constant 0 : index
    %8 = vector.load %arg10[%c0_6, %c0_7] : memref<4x1024xf32, #tpu.memory_space<vmem>>, vector<4x1024xf32>
    tpu.vector_store %arg10[%c0_6, %c0_7], %7 {strides = array<i32>} : memref<4x1024xf32, #tpu.memory_space<vmem>>, vector<4x1024xf32>,
    %c3_i32 = arith.constant 3 : i32
    %9 = arith.cmpi eq, %arg0, %c3_i32 : i32
    %10 = arith.extui %9 : i1 to i32
    %c0_i32_8 = arith.constant 0 : i32
    %11 = arith.cmpi ne, %10, %c0_i32_8 : i32
    scf.if %11 {
      %c0_9 = arith.constant 0 : index
      %c0_10 = arith.constant 0 : index
      %12 = vector.load %arg10[%c0_9, %c0_10] : memref<4x1024xf32, #tpu.memory_space<vmem>>, vector<4x1024xf32>
      %c0_11 = arith.constant 0 : index
      %c0_12 = arith.constant 0 : index
      %13 = vector.load %arg3[%c0_11, %c0_12] : memref<1x1024xf32, #tpu.memory_space<vmem>>, vector<1x1024xf32>
      %14 = vector.broadcast %13 : vector<1x1024xf32> to vector<4x1024xf32>
      %15 = arith.addf %12, %14 : vector<4x1024xf32>
      %cst_13 = arith.constant dense<0.000000e+00> : vector<1024xf32>
      %16 = vector.multi_reduction <add>, %15, %cst_13 [0] : vector<4x1024xf32> to vector<1024xf32>
      %17 = vector.shape_cast %16 : vector<1024xf32> to vector<1x1024xf32>
      %cst_14 = arith.constant 4.000000e+00 : f32
      %18 = vector.broadcast %cst_14 : f32 to vector<1x1024xf32>
      %19 = arith.divf %17, %18 : vector<1x1024xf32>
      %20 = vector.broadcast %19 : vector<1x1024xf32> to vector<4x1024xf32>
      %21 = arith.subf %15, %20 : vector<4x1024xf32>
      %22 = vector.broadcast %19 : vector<1x1024xf32> to vector<4x1024xf32>
      %23 = arith.subf %15, %22 : vector<4x1024xf32>
      %24 = arith.mulf %21, %23 : vector<4x1024xf32>
      %cst_15 = arith.constant dense<0.000000e+00> : vector<1024xf32>
      %25 = vector.multi_reduction <add>, %24, %cst_15 [0] : vector<4x1024xf32> to vector<1024xf32>
      %26 = vector.shape_cast %25 : vector<1024xf32> to vector<1x1024xf32>
      %cst_16 = arith.constant 4.000000e+00 : f32
      %27 = vector.broadcast %cst_16 : f32 to vector<1x1024xf32>
      %28 = arith.divf %26, %27 : vector<1x1024xf32>
      %29 = vector.broadcast %19 : vector<1x1024xf32> to vector<4x1024xf32>
      %30 = arith.subf %15, %29 : vector<4x1024xf32>
      %cst_17 = arith.constant 9.99999974E-6 : f32
      %31 = vector.broadcast %cst_17 : f32 to vector<1x1024xf32>
      %32 = arith.addf %28, %31 : vector<1x1024xf32>
      %33 = math.rsqrt %32 : vector<1x1024xf32>
      %34 = vector.broadcast %33 : vector<1x1024xf32> to vector<4x1024xf32>
      %35 = arith.mulf %30, %34 : vector<4x1024xf32>
      %c0_18 = arith.constant 0 : index
      %c0_19 = arith.constant 0 : index
      %36 = vector.load %arg4[%c0_18, %c0_19] : memref<1x1024xf32, #tpu.memory_space<vmem>>, vector<1x1024xf32>
      %37 = vector.broadcast %36 : vector<1x1024xf32> to vector<4x1024xf32>
      %38 = arith.mulf %35, %37 : vector<4x1024xf32>
      %c0_20 = arith.constant 0 : index
      %c0_21 = arith.constant 0 : index
      %39 = vector.load %arg5[%c0_20, %c0_21] : memref<1x1024xf32, #tpu.memory_space<vmem>>, vector<1x1024xf32>
      %40 = vector.broadcast %39 : vector<1x1024xf32> to vector<4x1024xf32>
      %41 = arith.addf %38, %40 : vector<4x1024xf32>
      %cst_22 = arith.constant 0.000000e+00 : f32
      %42 = vector.broadcast %cst_22 : f32 to vector<4x1024xf32>
      %43 = arith.cmpf ogt, %41, %42 : vector<4x1024xf32>
      %cst_23 = arith.constant 2.000000e-01 : f32
      %44 = vector.broadcast %cst_23 : f32 to vector<4x1024xf32>
      %45 = arith.mulf %44, %41 : vector<4x1024xf32>
      %46 = arith.select %43, %41, %45 : vector<4x1024xi1>, vector<4x1024xf32>
      %c0_24 = arith.constant 0 : index
      %c0_25 = arith.constant 0 : index
      %47 = vector.load %arg8[%c0_24, %c0_25] : memref<4x1024xf32, #tpu.memory_space<vmem>>, vector<4x1024xf32>
      %48 = arith.mulf %47, %47 : vector<4x1024xf32>
      %cst_26 = arith.constant dense<0.000000e+00> : vector<4xf32>
      %49 = vector.multi_reduction <add>, %48, %cst_26 [1] : vector<4x1024xf32> to vector<4xf32>
      %50 = vector.shape_cast %49 : vector<4xf32> to vector<4x1xf32>
      %cst_27 = arith.constant 1.000000e+00 : f32
      %51 = vector.broadcast %cst_27 : f32 to vector<4x1xf32>
      %52 = arith.cmpf ogt, %50, %51 : vector<4x1xf32>
      %53 = math.rsqrt %50 : vector<4x1xf32>
      %cst_28 = arith.constant 1.000000e+00 : f32
      %54 = vector.broadcast %cst_28 : f32 to vector<4x1xf32>
      %55 = arith.select %52, %53, %54 : vector<4x1xi1>, vector<4x1xf32>
      %56 = vector.broadcast %55 : vector<4x1xf32> to vector<4x1024xf32>
      %57 = arith.mulf %47, %56 : vector<4x1024xf32>
      %c0_29 = arith.constant 0 : index
      %c0_30 = arith.constant 0 : index
      %58 = vector.load %arg6[%c0_29, %c0_30] : memref<1024x1xf32, #tpu.memory_space<vmem>>, vector<1024x1xf32>
      %cst_31 = arith.constant dense<0.000000e+00> : vector<4x1xf32>
      %59 = tpu.matmul %46, %58, %cst_31 {dimension_numbers = #tpu.dot_dimension_numbers<[1], [0], [0], [1], [0, 0, 1, 1], [], []>} : vector<4x1024xf32>, vector<1024x1xf32>, vector<4x1xf32> -> vector<4x1xf32>
      %c0_32 = arith.constant 0 : index
      %c0_33 = arith.constant 0 : index
      %60 = vector.load %arg7[%c0_32, %c0_33] : memref<1x1xf32, #tpu.memory_space<vmem>>, vector<1x1xf32>
      %61 = vector.broadcast %60 : vector<1x1xf32> to vector<4x1xf32>
      %62 = arith.addf %59, %61 : vector<4x1xf32>
      %63 = arith.mulf %57, %46 : vector<4x1024xf32>
      %cst_34 = arith.constant dense<0.000000e+00> : vector<4xf32>
      %64 = vector.multi_reduction <add>, %63, %cst_34 [1] : vector<4x1024xf32> to vector<4xf32>
      %65 = vector.shape_cast %64 : vector<4xf32> to vector<4x1xf32>
      %66 = arith.addf %62, %65 : vector<4x1xf32>
      %c0_35 = arith.constant 0 : index
      %c0_36 = arith.constant 0 : index
      %67 = vector.load %arg9[%c0_35, %c0_36] : memref<4x1xf32, #tpu.memory_space<vmem>>, vector<4x1xf32>
      tpu.vector_store %arg9[%c0_35, %c0_36], %66 {strides = array<i32>} : memref<4x1xf32, #tpu.memory_space<vmem>>, vector<4x1xf32>,
    } else {
    }
    return
  }
  func.func @transform_0(%arg0: i32) -> (i32, i32) {
    %c0_i32 = arith.constant 0 : i32
    %c0_i32_0 = arith.constant 0 : i32
    return %c0_i32, %arg0 : i32, i32
  }
  func.func @transform_1(%arg0: i32) -> (i32, i32) {
    %c0_i32 = arith.constant 0 : i32
    %c0_i32_0 = arith.constant 0 : i32
    return %arg0, %c0_i32 : i32, i32
  }
  func.func @transform_2(%arg0: i32) -> (i32, i32) {
    %c0_i32 = arith.constant 0 : i32
    %c0_i32_0 = arith.constant 0 : i32
    %c0_i32_1 = arith.constant 0 : i32
    return %c0_i32, %c0_i32_0 : i32, i32
  }
  func.func @transform_3(%arg0: i32) -> (i32, i32) {
    %c0_i32 = arith.constant 0 : i32
    %c0_i32_0 = arith.constant 0 : i32
    %c0_i32_1 = arith.constant 0 : i32
    return %c0_i32, %c0_i32_0 : i32, i32
  }
  func.func @transform_4(%arg0: i32) -> (i32, i32) {
    %c0_i32 = arith.constant 0 : i32
    %c0_i32_0 = arith.constant 0 : i32
    %c0_i32_1 = arith.constant 0 : i32
    return %c0_i32, %c0_i32_0 : i32, i32
  }
  func.func @transform_5(%arg0: i32) -> (i32, i32) {
    %c0_i32 = arith.constant 0 : i32
    %c0_i32_0 = arith.constant 0 : i32
    %c0_i32_1 = arith.constant 0 : i32
    return %c0_i32, %c0_i32_0 : i32, i32
  }
  func.func @transform_6(%arg0: i32) -> (i32, i32) {
    %c0_i32 = arith.constant 0 : i32
    %c0_i32_0 = arith.constant 0 : i32
    %c0_i32_1 = arith.constant 0 : i32
    return %c0_i32, %c0_i32_0 : i32, i32
  }
  func.func @transform_7(%arg0: i32) -> (i32, i32) {
    %c0_i32 = arith.constant 0 : i32
    %c0_i32_0 = arith.constant 0 : i32
    %c0_i32_1 = arith.constant 0 : i32
    return %c0_i32, %c0_i32_0 : i32, i32
  }
  func.func @transform_8(%arg0: i32) -> (i32, i32) {
    %c0_i32 = arith.constant 0 : i32
    %c0_i32_0 = arith.constant 0 : i32
    %c0_i32_1 = arith.constant 0 : i32
    return %c0_i32, %c0_i32_0 : i32, i32
  }
}

</mosaic_0001>

<bundles_post_ra>
// kernel: discriminator_forward.4
= control target key start
LH: loop header
LB: loop body
LE: loop exit
PB: predicated region body
PF: predicated region fallthrough
CT: control target
= control target key end

     0   :  { %8 = vsyncpa [#allocation3], 0  ;;  %s1131_s0 = inlined_call_operand.vmem [shape: bf16[256,16], index: 0, kind: input, shape index: {}]   ;;  %s1132_s1 = inlined_call_operand.hbm [shape: bf16[16,128], index: 1, kind: input, shape index: {}]   ;;  %s1133_s2 = inlined_call_operand.hbm [shape: f32[1,128], index: 2, kind: input, shape index: {}]   ;;  %s1134_s3 = inlined_call_operand.vmem [shape: bf16[256,128], index: 3, kind: output, shape index: {}]  }
   0x1   :  { %9 = vsyncpa [#allocation5], 0  ;;  %s951_s12 = smov [#allocation2]  }
   0x2   :  { %s17_s13 = sshll.u32 %s951_s12, 4  ;;  %s18_s13 = int_to_ptr.vmem [resolvable:$true] %s17_s13 }
   0x3   :  { %s915_s14 = scalar_lea.vmem %s18_s13, 128  ;;  %p920_p1 = scmp.lt.s32.totalorder %s18_s13, %s18_s13 }
   0x4   :  { %p916_p0 = scmp.ne.s32.totalorder %s18_s13, %s915_s14  ;;  %p921_p2 = scmp.lt.s32.totalorder %s915_s14, %s915_s14 }
   0x6   :  { %p922_p3 = por %p921_p2, %p920_p1 }
   0x8   :  { %p923_p4 = pnand %p922_p3, %p916_p0 }
   0xa   :  { %926 = shalt.err (!%p923_p4)
}
   0xb   :  { %s952_s15 = smov 64   ;;  %s953_s16 = smov 4  }
   0xc   :  { %23 = dma.hbm_to_vmem [thread:$0]  %s1132_s1, 128, %s18_s13, [#allocation3], %s952_s15, %s952_s15, %s953_s16  }
   0xd   :  { %s954_s19 = smov [#allocation4]  }
   0xe   :  { %s30_s20 = sshll.u32 %s954_s19, 4  ;;  %s31_s20 = int_to_ptr.vmem [resolvable:$true] %s30_s20 }
   0xf   :  { %s935_s21 = scalar_lea.vmem %s31_s20, 16  ;;  %s939_s22 = scalar_lea.vmem %s31_s20, 32 }
  0x10   :  { %p936_p5 = scmp.ne.s32.totalorder %s31_s20, %s935_s21  ;;  %p940_p6 = scmp.lt.s32.totalorder %s31_s20, %s31_s20 }
  0x11   :  { %p941_p7 = scmp.lt.s32.totalorder %s939_s22, %s935_s21 }
  0x13   :  { %p942_p8 = por %p941_p7, %p940_p6 }
  0x15   :  { %p943_p9 = pnand %p942_p8, %p936_p5 }
  0x17   :  { %946 = shalt.err (!%p943_p9)
}
  0x18   :  { %33 = dma.hbm_to_vmem [thread:$0]  %s1133_s2, 16, %s31_s20, [#allocation5]  }
  0x19   :  { %947 = dma.done.wait [#allocation3], 128  }
  0x1a   :  { %948 = vsyncadd [#allocation3], 4294967168 }
  0x1b   :  { %949 = dma.done.wait [#allocation5], 16  }
  0x1c   :  { %950 = vsyncadd [#allocation5], 4294967280  ;;  %v890_v0 = vld [vmem:[#allocation2] sm:$0xff]   ;;  %vm168_vm0 = vcmask 130048   ;;  %v893_v3 = vld [vmem:[%s1131_s0 + $0x8] sm:$0xff]  }
  0x1d   :  { %v891_v1 = vld [vmem:[%s1131_s0] sm:$0xff]   ;;  %850 = vmatprep.subr.bf16.mxu0 %v890_v0  ;;  %884 = vmatprep.subr.bf16.mxu1 %v890_v0  ;;  %v894_v4 = vld [vmem:[%s1131_s0 + $0x48] sm:$0xff]   ;;  %v895_v5 = vld [vmem:[%s1131_s0 + $0x10] sm:$0xff]  }
  0x1e   :  { %v892_v2 = vld [vmem:[%s1131_s0 + $0x40] sm:$0xff]   ;;  %851 = vmatpush3.bf16.msra.mxu0 %v890_v0  ;;  %885 = vmatpush3.bf16.msra.mxu1 %v890_v0  ;;  %v896_v6 = vld [vmem:[%s1131_s0 + $0x50] sm:$0xff]   ;;  %v897_v7 = vld [vmem:[%s1131_s0 + $0x18] sm:$0xff]  }
  0x1f   :  { %852 = vmatprep.mubr.msk.bf16.mxu0 %vm168_vm0, %v891_v1  ;;  %868 = vmatprep.mubr.msk.bf16.mxu1 %vm168_vm0, %v892_v2  ;;  %v898_v8 = vld [vmem:[%s1131_s0 + $0x58] sm:$0xff]   ;;  %v899_v9 = vld [vmem:[%s1131_s0 + $0x20] sm:$0xff]   ;;  %v901_v11 = vld [vmem:[%s1131_s0 + $0x28] sm:$0xff]  }
  0x20   :  { %v900_v10 = vld [vmem:[%s1131_s0 + $0x60] sm:$0xff]   ;;  %v902_v12 = vld [vmem:[%s1131_s0 + $0x68] sm:$0xff]   ;;  %v903_v13 = vld [vmem:[%s1131_s0 + $0x30] sm:$0xff]  }
  0x21   :  { %853 = vmatmul.mubr.msk.bf16.vlgmr.msra.gmra.mxu0 %vm168_vm0, %v893_v3  ;;  %869 = vmatmul.mubr.msk.bf16.vlgmr.msra.gmra.mxu1 %vm168_vm0, %v894_v4  ;;  %v904_v14 = vld [vmem:[%s1131_s0 + $0x70] sm:$0xff]   ;;  %v905_v15 = vld [vmem:[%s1131_s0 + $0x38] sm:$0xff]   ;;  %v1045_v17 = vld [vmem:[#allocation4] ss:$0 sm:$0xff] }
  0x22   :  { %856 = vmatprep.mubr.msk.bf16.mxu0 %vm168_vm0, %v895_v5  ;;  %872 = vmatprep.mubr.msk.bf16.mxu1 %vm168_vm0, %v896_v6  ;;  %v906_v16 = vld [vmem:[%s1131_s0 + $0x78] sm:$0xff]  }
  0x29   :  { %857 = vmatmul.mubr.msk.bf16.gmra.mxu0 %vm168_vm0, %v897_v7  ;;  %873 = vmatmul.mubr.msk.bf16.gmra.mxu1 %vm168_vm0, %v898_v8 }
  0x2a   :  { %860 = vmatprep.mubr.msk.bf16.mxu0 %vm168_vm0, %v899_v9  ;;  %876 = vmatprep.mubr.msk.bf16.mxu1 %vm168_vm0, %v900_v10 }
  0x31   :  { %861 = vmatmul.mubr.msk.bf16.gmra.mxu0 %vm168_vm0, %v901_v11  ;;  %877 = vmatmul.mubr.msk.bf16.gmra.mxu1 %vm168_vm0, %v902_v12 }
  0x32   :  { %864 = vmatprep.mubr.msk.bf16.mxu0 %vm168_vm0, %v903_v13  ;;  %880 = vmatprep.mubr.msk.bf16.mxu1 %vm168_vm0, %v904_v14 }
  0x39   :  { %865 = vmatmul.mubr.msk.bf16.gmra.mxu0 %vm168_vm0, %v905_v15  ;;  %881 = vmatmul.mubr.msk.bf16.gmra.mxu1 %vm168_vm0, %v906_v16 }
  0xe1   :  { %v854_v18 = vpop.f32.mrf.mxu0  ;;  %v870_v19 = vpop.f32.mrf.mxu1 }
  0xe2   :  { %v260_v20 = vadd.f32 %v854_v18, %v1045_v17  ;;  %v324_v21 = vadd.f32 %v870_v19, %v1045_v17 }
  0xe3   :  { %v251_v22 = vpop.f32.mrf.mxu0  ;;  %v315_v23 = vpop.f32.mrf.mxu1 }
  0xe4   :  { %vm380_vm1 = vcmp.gt.f32.partialorder %v260_v20, 0.0  ;;  %v412_v24 = vmul.f32 0.2, %v260_v20  ;;  %vm396_vm2 = vcmp.gt.f32.partialorder %v324_v21, 0.0  ;;  %v428_v25 = vmul.f32 0.2, %v324_v21 }
  0xe5   :  { %v252_v26 = vadd.f32 %v1045_v17, %v251_v22  ;;  %v316_v27 = vadd.f32 %v1045_v17, %v315_v23  ;;  %v855_v28 = vpop.f32.mrf.mxu0  ;;  %v871_v29 = vpop.f32.mrf.mxu1 }
  0xe6   :  { %v444_v30 = vsel %vm380_vm1, %v260_v20, %v412_v24  ;;  %v263_v31 = vadd.f32 %v855_v28, %v1045_v17  ;;  %v327_v32 = vadd.f32 %v871_v29, %v1045_v17  ;;  %v460_v33 = vsel %vm396_vm2, %v324_v21, %v428_v25 }
  0xe7   :  { %vm378_vm3 = vcmp.gt.f32.partialorder %v252_v26, 0.0  ;;  %v410_v34 = vmul.f32 0.2, %v252_v26  ;;  %vm394_vm4 = vcmp.gt.f32.partialorder %v316_v27, 0.0  ;;  %v254_v35 = vpop.f32.mrf.mxu0  ;;  %v318_v36 = vpop.f32.mrf.mxu1  ;;  %v426_v40 = vmul.f32 0.2, %v316_v27 }
  0xe8   :  { %vm381_vm5 = vcmp.gt.f32.partialorder %v263_v31, 0.0  ;;  %v413_v37 = vmul.f32 0.2, %v263_v31  ;;  %vm397_vm6 = vcmp.gt.f32.partialorder %v327_v32, 0.0  ;;  %v429_v38 = vmul.f32 0.2, %v327_v32 }
  0xe9   :  { %v442_v39 = vsel %vm378_vm3, %v252_v26, %v410_v34  ;;  %v255_v41 = vadd.f32 %v1045_v17, %v254_v35  ;;  %v319_v42 = vadd.f32 %v1045_v17, %v318_v36  ;;  %v858_v43 = vpop.f32.mrf.mxu0  ;;  %v874_v44 = vpop.f32.mrf.mxu1  ;;  %v458_v56 = vsel %vm394_vm4, %v316_v27, %v426_v40 }
  0xea   :  { %v445_v45 = vsel %vm381_vm5, %v263_v31, %v413_v37  ;;  %v461_v46 = vsel %vm397_vm6, %v327_v32, %v429_v38  ;;  %v276_v47 = vadd.f32 %v858_v43, %v1045_v17  ;;  %v340_v48 = vadd.f32 %v874_v44, %v1045_v17 }
  0xeb   :  { %v746_v49 = vpack.c.bf16 %v445_v45, %v444_v30  ;;  %v786_v50 = vpack.c.bf16 %v461_v46, %v460_v33  ;;  %vm379_vm7 = vcmp.gt.f32.partialorder %v255_v41, 0.0  ;;  %v411_v51 = vmul.f32 0.2, %v255_v41  ;;  %v267_v52 = vpop.f32.mrf.mxu0  ;;  %v331_v53 = vpop.f32.mrf.mxu1 }
  0xec   :  { %vm395_vm8 = vcmp.gt.f32.partialorder %v319_v42, 0.0  ;;  %v427_v54 = vmul.f32 0.2, %v319_v42  ;;  %vm384_vm9 = vcmp.gt.f32.partialorder %v276_v47, 0.0  ;;  %v416_v55 = vmul.f32 0.2, %v276_v47 }
  0xed   :  { %818 = vst [vmem:[%s1134_s3 + $0x8] sm:$0xff] %v746_v49   ;;  %826 = vst [vmem:[%s1134_s3 + $0x48] sm:$0xff] %v786_v50   ;;  %v443_v57 = vsel %vm379_vm7, %v255_v41, %v411_v51  ;;  %v432_v58 = vmul.f32 0.2, %v340_v48  ;;  %v268_v59 = vadd.f32 %v1045_v17, %v267_v52  ;;  %v859_v60 = vpop.f32.mrf.mxu0  ;;  %v875_v61 = vpop.f32.mrf.mxu1  ;;  %vm400_vm10 = vcmp.gt.f32.partialorder %v340_v48, 0.0 }
  0xee   :  { %v741_v62 = vpack.c.bf16 %v443_v57, %v442_v39  ;;  %v459_v63 = vsel %vm395_vm8, %v319_v42, %v427_v54  ;;  %v332_v0 = vadd.f32 %v1045_v17, %v331_v53  ;;  %v448_v2 = vsel %vm384_vm9, %v276_v47, %v416_v55 }
  0xef   :  { %v781_v1 = vpack.c.bf16 %v459_v63, %v458_v56  ;;  %vm382_vm11 = vcmp.gt.f32.partialorder %v268_v59, 0.0  ;;  %v414_v3 = vmul.f32 0.2, %v268_v59  ;;  %v270_v4 = vpop.f32.mrf.mxu0  ;;  %v334_v5 = vpop.f32.mrf.mxu1  ;;  %v279_v7 = vadd.f32 %v859_v60, %v1045_v17 }
  0xf0   :  { %742 = vst [vmem:[%s1134_s3] sm:$0xff] %v741_v62   ;;  %vm398_vm12 = vcmp.gt.f32.partialorder %v332_v0, 0.0  ;;  %v430_v6 = vmul.f32 0.2, %v332_v0  ;;  %v343_v8 = vadd.f32 %v875_v61, %v1045_v17  ;;  %v464_v9 = vsel %vm400_vm10, %v340_v48, %v432_v58 }
  0xf1   :  { %825 = vst [vmem:[%s1134_s3 + $0x40] sm:$0xff] %v781_v1   ;;  %v446_v10 = vsel %vm382_vm11, %v268_v59, %v414_v3  ;;  %v271_v11 = vadd.f32 %v1045_v17, %v270_v4  ;;  %v335_v12 = vadd.f32 %v1045_v17, %v334_v5  ;;  %v862_v13 = vpop.f32.mrf.mxu0  ;;  %v878_v14 = vpop.f32.mrf.mxu1  ;;  %vm385_vm13 = vcmp.gt.f32.partialorder %v279_v7, 0.0 }
  0xf2   :  { %v462_v15 = vsel %vm398_vm12, %v332_v0, %v430_v6  ;;  %v417_v16 = vmul.f32 0.2, %v279_v7  ;;  %vm401_vm14 = vcmp.gt.f32.partialorder %v343_v8, 0.0  ;;  %v433_v18 = vmul.f32 0.2, %v343_v8 }
  0xf3   :  { %vm383_vm15 = vcmp.gt.f32.partialorder %v271_v11, 0.0  ;;  %v415_v19 = vmul.f32 0.2, %v271_v11  ;;  %vm399_vm0 = vcmp.gt.f32.partialorder %v335_v12, 0.0  ;;  %v283_v20 = vpop.f32.mrf.mxu0  ;;  %v347_v21 = vpop.f32.mrf.mxu1  ;;  %v431_v23 = vmul.f32 0.2, %v335_v12 }
  0xf4   :  { %v449_v22 = vsel %vm385_vm13, %v279_v7, %v417_v16  ;;  %v292_v24 = vadd.f32 %v862_v13, %v1045_v17  ;;  %v356_v25 = vadd.f32 %v878_v14, %v1045_v17  ;;  %v465_v27 = vsel %vm401_vm14, %v343_v8, %v433_v18 }
  0xf5   :  { %v756_v26 = vpack.c.bf16 %v449_v22, %v448_v2  ;;  %v447_v28 = vsel %vm383_vm15, %v271_v11, %v415_v19  ;;  %v284_v29 = vadd.f32 %v1045_v17, %v283_v20  ;;  %v863_v30 = vpop.f32.mrf.mxu0  ;;  %v879_v31 = vpop.f32.mrf.mxu1  ;;  %v796_v32 = vpack.c.bf16 %v465_v27, %v464_v9 }
  0xf6   :  { %v751_v33 = vpack.c.bf16 %v447_v28, %v446_v10  ;;  %v463_v34 = vsel %vm399_vm0, %v335_v12, %v431_v23  ;;  %vm388_vm1 = vcmp.gt.f32.partialorder %v292_v24, 0.0  ;;  %v420_v36 = vmul.f32 0.2, %v292_v24 }
  0xf7   :  { %820 = vst [vmem:[%s1134_s3 + $0x18] sm:$0xff] %v756_v26   ;;  %v791_v35 = vpack.c.bf16 %v463_v34, %v462_v15  ;;  %vm404_vm2 = vcmp.gt.f32.partialorder %v356_v25, 0.0  ;;  %v436_v37 = vmul.f32 0.2, %v356_v25  ;;  %v286_v38 = vpop.f32.mrf.mxu0  ;;  %v350_v39 = vpop.f32.mrf.mxu1  ;;  %828 = vst [vmem:[%s1134_s3 + $0x58] sm:$0xff] %v796_v32   ;;  %vm386_vm3 = vcmp.gt.f32.partialorder %v284_v29, 0.0 }
  0xf8   :  { %819 = vst [vmem:[%s1134_s3 + $0x10] sm:$0xff] %v751_v33   ;;  %v418_v40 = vmul.f32 0.2, %v284_v29  ;;  %v348_v41 = vadd.f32 %v1045_v17, %v347_v21  ;;  %v295_v42 = vadd.f32 %v863_v30, %v1045_v17  ;;  %v452_v43 = vsel %vm388_vm1, %v292_v24, %v420_v36 }
  0xf9   :  { %827 = vst [vmem:[%s1134_s3 + $0x50] sm:$0xff] %v791_v35   ;;  %v359_v44 = vadd.f32 %v879_v31, %v1045_v17  ;;  %v287_v45 = vadd.f32 %v1045_v17, %v286_v38  ;;  %v866_v46 = vpop.f32.mrf.mxu0  ;;  %v882_v47 = vpop.f32.mrf.mxu1  ;;  %v468_v48 = vsel %vm404_vm2, %v356_v25, %v436_v37  ;;  %v351_v56 = vadd.f32 %v1045_v17, %v350_v39 }
  0xfa   :  { %v450_v49 = vsel %vm386_vm3, %v284_v29, %v418_v40  ;;  %vm402_vm4 = vcmp.gt.f32.partialorder %v348_v41, 0.0  ;;  %vm389_vm5 = vcmp.gt.f32.partialorder %v295_v42, 0.0  ;;  %v421_v50 = vmul.f32 0.2, %v295_v42 }
  0xfb   :  { %vm405_vm6 = vcmp.gt.f32.partialorder %v359_v44, 0.0  ;;  %v437_v51 = vmul.f32 0.2, %v359_v44  ;;  %vm387_vm7 = vcmp.gt.f32.partialorder %v287_v45, 0.0  ;;  %v299_v52 = vpop.f32.mrf.mxu0  ;;  %v363_v53 = vpop.f32.mrf.mxu1  ;;  %v434_v54 = vmul.f32 0.2, %v348_v41 }
  0xfc   :  { %v419_v55 = vmul.f32 0.2, %v287_v45  ;;  %v308_v57 = vadd.f32 %v866_v46, %v1045_v17  ;;  %v453_v58 = vsel %vm389_vm5, %v295_v42, %v421_v50  ;;  %v372_v60 = vadd.f32 %v882_v47, %v1045_v17 }
  0xfd   :  { %v469_v59 = vsel %vm405_vm6, %v359_v44, %v437_v51  ;;  %v300_v61 = vadd.f32 %v1045_v17, %v299_v52  ;;  %v867_v62 = vpop.f32.mrf.mxu0  ;;  %v883_v63 = vpop.f32.mrf.mxu1  ;;  %v766_v0 = vpack.c.bf16 %v453_v58, %v452_v43  ;;  %vm403_vm8 = vcmp.gt.f32.partialorder %v351_v56, 0.0 }
  0xfe   :  { %v806_v1 = vpack.c.bf16 %v469_v59, %v468_v48  ;;  %v451_v2 = vsel %vm387_vm7, %v287_v45, %v419_v55  ;;  %v435_v4 = vmul.f32 0.2, %v351_v56  ;;  %v424_v5 = vmul.f32 0.2, %v308_v57 }
  0xff   :  { %v761_v3 = vpack.c.bf16 %v451_v2, %v450_v49  ;;  %v466_v6 = vsel %vm402_vm4, %v348_v41, %v434_v54  ;;  %822 = vst [vmem:[%s1134_s3 + $0x28] sm:$0xff] %v766_v0   ;;  %vm392_vm9 = vcmp.gt.f32.partialorder %v308_v57, 0.0  ;;  %v440_v8 = vmul.f32 0.2, %v372_v60  ;;  %v302_v11 = vpop.f32.mrf.mxu0  ;;  %v366_v12 = vpop.f32.mrf.mxu1 }
 0x100   :  { %830 = vst [vmem:[%s1134_s3 + $0x68] sm:$0xff] %v806_v1   ;;  %v467_v7 = vsel %vm403_vm8, %v351_v56, %v435_v4  ;;  %v364_v9 = vadd.f32 %v1045_v17, %v363_v53  ;;  %v311_v10 = vadd.f32 %v867_v62, %v1045_v17  ;;  %vm408_vm10 = vcmp.gt.f32.partialorder %v372_v60, 0.0 }
 0x101   :  { %821 = vst [vmem:[%s1134_s3 + $0x20] sm:$0xff] %v761_v3   ;;  %v801_v13 = vpack.c.bf16 %v467_v7, %v466_v6  ;;  %vm390_vm11 = vcmp.gt.f32.partialorder %v300_v61, 0.0  ;;  %v375_v14 = vadd.f32 %v883_v63, %v1045_v17  ;;  %v456_v15 = vsel %vm392_vm9, %v308_v57, %v424_v5 }
 0x102   :  { %v422_v16 = vmul.f32 0.2, %v300_v61  ;;  %vm393_vm12 = vcmp.gt.f32.partialorder %v311_v10, 0.0  ;;  %v425_v18 = vmul.f32 0.2, %v311_v10  ;;  %v303_v20 = vadd.f32 %v1045_v17, %v302_v11 }
 0x103   :  { %829 = vst [vmem:[%s1134_s3 + $0x60] sm:$0xff] %v801_v13   ;;  %vm409_vm13 = vcmp.gt.f32.partialorder %v375_v14, 0.0  ;;  %v441_v19 = vmul.f32 0.2, %v375_v14  ;;  %v367_v21 = vadd.f32 %v1045_v17, %v366_v12  ;;  %v472_v22 = vsel %vm408_vm10, %v372_v60, %v440_v8 }
 0x104   :  { %vm406_vm14 = vcmp.gt.f32.partialorder %v364_v9, 0.0  ;;  %v438_v23 = vmul.f32 0.2, %v364_v9  ;;  %v457_v24 = vsel %vm393_vm12, %v311_v10, %v425_v18  ;;  %vm391_vm15 = vcmp.gt.f32.partialorder %v303_v20, 0.0 }
 0x105   :  { %v776_v25 = vpack.c.bf16 %v457_v24, %v456_v15  ;;  %v473_v26 = vsel %vm409_vm13, %v375_v14, %v441_v19  ;;  %v423_v27 = vmul.f32 0.2, %v303_v20  ;;  %vm407_vm0 = vcmp.gt.f32.partialorder %v367_v21, 0.0 }
 0x106   :  { %v816_v28 = vpack.c.bf16 %v473_v26, %v472_v22  ;;  %v439_v29 = vmul.f32 0.2, %v367_v21  ;;  %v454_v30 = vsel %vm390_vm11, %v300_v61, %v422_v16  ;;  %v470_v32 = vsel %vm406_vm14, %v364_v9, %v438_v23 }
 0x107   :  { %824 = vst [vmem:[%s1134_s3 + $0x38] sm:$0xff] %v776_v25   ;;  %v455_v31 = vsel %vm391_vm15, %v303_v20, %v423_v27 }
 0x108   :  { %832 = vst [vmem:[%s1134_s3 + $0x78] sm:$0xff] %v816_v28   ;;  %v771_v17 = vpack.c.bf16 %v455_v31, %v454_v30  ;;  %v471_v33 = vsel %vm407_vm0, %v367_v21, %v439_v29 }
 0x109   :  { %v811_v34 = vpack.c.bf16 %v471_v33, %v470_v32 }
 0x10a   :  { %823 = vst [vmem:[%s1134_s3 + $0x30] sm:$0xff] %v771_v17  }
 0x10b   :  { %831 = vst [vmem:[%s1134_s3 + $0x70] sm:$0xff] %v811_v34  }
 0x10c   :  { %638 = vsyncpa [#allocation3], 1 }
 0x10d   :  { %639 = vsyncpa [#allocation5], 1 }

// kernel: discriminator_forward.5
= control target key start
LH: loop header
LB: loop body
LE: loop exit
PB: predicated region body
PF: predicated region fallthrough
CT: control target
= control target key end

     0   :  { %s1326_s18 = smov 0   ;;  %s1328_s19 = smov 0   ;;  %s1511_s0 = inlined_call_operand.vmem [shape: bf16[64,1024], index: 0, kind: input, shape index: {}]   ;;  %s1512_s1 = inlined_call_operand.vmem [shape: bf16[1024,128], index: 1, kind: input, shape index: {}]   ;;  %s1513_s2 = inlined_call_operand.vmem [shape: f32[1,128], index: 2, kind: input, shape index: {}]   ;;  %s1514_s3 = inlined_call_operand.vmem [shape: f32[64,128], index: 3, kind: output, shape index: {0}]   ;;  %s1515_s4 = inlined_call_operand.vmem [shape: f32[1,128], index: 4, kind: output, shape index: {1}]   ;;  %s1516_s5 = inlined_call_operand.vmem [shape: f32[1,128], index: 5, kind: output, shape index: {2}]  }
   0x1   :  { %s1330_s20 = smov 0   ;;  %s1332_s21 = smov 0  }
   0x2   :  { %s1334_s22 = smov 0  }
   0x3 LB: > { %s25_s23 = sadd.s32 1, %s1288_s21  ;;  %p44_p1 = scmp.ne.s32.totalorder %s1280_s19, %s1276_s18  ;;  %s1292_s22 = sphi %s1334_s22, %s16_s22   ;;  %s1288_s21 = sphi %s1332_s21, %s1520_s21   ;;  %s1284_s20 = sphi %s1330_s20, %s1519_s20   ;;  %s1280_s19 = sphi %s1328_s19, %s1518_s19   ;;  %s1276_s18 = sphi %s1326_s18, %s1517_s18  }
   0x4   : > { %p26_p0 = scmp.ge.s32.totalorder %s25_s23, 2  ;;  %p45_p2 = scmp.eq.s32.totalorder %s1292_s22, 0 }
   0x5   : > { %s37_s25 = sadd.s32 1, %s1280_s19  ;;  %p1010_p5 = scmp.ge.s32.totalorder %s1292_s22, 2 }
   0x6   : > { %s1522_s23 = smov (%p26_p0, %s25_s23), 0  ;;  %p46_p3 = por %p45_p2, %p44_p1 }
   0x7   : > { %s33_s24 = ssub.s32 %s1288_s21, %s1522_s23  ;;  %188 = sbr.rel (%p1010_p5) target bundleno = 24 (0x18), region = 20 }
   0x8   : > { %p35_p4 = scmp.eq.s32.totalorder %s33_s24, 0 }
   0xa   : > { %s1361_s26 = scalar_select %p35_p4, %s1280_s19, %s37_s25  }
   0xc   : > { %191 = sbr.rel (!%p46_p3) target bundleno = 24 (0x18), region = 24  ;;  %s193_s27 = sand.u32 (%p46_p3), 1, %s1280_s19  }
   0xd   : > { %s1074_s28 = sshll.u32 (%p46_p3), %s1288_s21, 4  ;;  %s1011_s29 = sshll.u32 (%p46_p3), %s193_s27, 7 }
   0xe   : > { %s1369_s7 = scalar_lea.vmem (%p46_p3), %s1511_s0, %s1074_s28  ;;  %s195_s8 = scalar_lea.vmem (%p46_p3), [#allocation3], %s1011_s29 }
   0xf   : > { %v214_v0 = vld [vmem:[%s1369_s7] sm:$0xff] (%p46_p3)  ;;  %v216_v1 = vld [vmem:[%s1369_s7 + $0x8] sm:$0xff] (%p46_p3) }
  0x10   : > { %v218_v2 = vld [vmem:[%s1369_s7 + $0x20] sm:$0xff] (%p46_p3)  ;;  %215 = vst [vmem:[%s195_s8] sm:$0xff] (%p46_p3), %v214_v0  ;;  %217 = vst [vmem:[%s195_s8 + $0x8] sm:$0xff] (%p46_p3), %v216_v1  ;;  %v220_v3 = vld [vmem:[%s1369_s7 + $0x28] sm:$0xff] (%p46_p3) }
  0x11   : > { %219 = vst [vmem:[%s195_s8 + $0x10] sm:$0xff] %v218_v2  ;;  %v222_v4 = vld [vmem:[%s1369_s7 + $0x40] sm:$0xff]  ;;  %v224_v5 = vld [vmem:[%s1369_s7 + $0x48] sm:$0xff]  ;;  %221 = vst [vmem:[%s195_s8 + $0x18] sm:$0xff] %v220_v3 }
  0x12   : > { %223 = vst [vmem:[%s195_s8 + $0x20] sm:$0xff] %v222_v4  ;;  %225 = vst [vmem:[%s195_s8 + $0x28] sm:$0xff] %v224_v5  ;;  %v226_v6 = vld [vmem:[%s1369_s7 + $0x60] sm:$0xff]  ;;  %v228_v7 = vld [vmem:[%s1369_s7 + $0x68] sm:$0xff] }
  0x13   : > { %v230_v8 = vld [vmem:[%s1369_s7 + $0x80] sm:$0xff]  ;;  %227 = vst [vmem:[%s195_s8 + $0x30] sm:$0xff] %v226_v6  ;;  %229 = vst [vmem:[%s195_s8 + $0x38] sm:$0xff] %v228_v7  ;;  %v232_v9 = vld [vmem:[%s1369_s7 + $0x88] sm:$0xff] }
  0x14   : > { %231 = vst [vmem:[%s195_s8 + $0x40] sm:$0xff] %v230_v8  ;;  %v234_v10 = vld [vmem:[%s1369_s7 + $0xa0] sm:$0xff]  ;;  %v236_v11 = vld [vmem:[%s1369_s7 + $0xa8] sm:$0xff]  ;;  %233 = vst [vmem:[%s195_s8 + $0x48] sm:$0xff] %v232_v9 }
  0x15   : > { %235 = vst [vmem:[%s195_s8 + $0x50] sm:$0xff] %v234_v10  ;;  %237 = vst [vmem:[%s195_s8 + $0x58] sm:$0xff] %v236_v11  ;;  %v238_v12 = vld [vmem:[%s1369_s7 + $0xc0] sm:$0xff]  ;;  %v240_v13 = vld [vmem:[%s1369_s7 + $0xc8] sm:$0xff] }
  0x16   : > { %v242_v14 = vld [vmem:[%s1369_s7 + $0xe0] sm:$0xff]  ;;  %239 = vst [vmem:[%s195_s8 + $0x60] sm:$0xff] %v238_v12  ;;  %241 = vst [vmem:[%s195_s8 + $0x68] sm:$0xff] %v240_v13  ;;  %v244_v15 = vld [vmem:[%s1369_s7 + $0xe8] sm:$0xff] }
  0x17   : > { %243 = vst [vmem:[%s195_s8 + $0x70] sm:$0xff] %v242_v14  ;;  %245 = vst [vmem:[%s195_s8 + $0x78] sm:$0xff] %v244_v15 }
  0x18 PF: > { %p1014_p6 = scmp.ge.s32.totalorder %s1292_s22, 1  ;;  %p259_p7 = scmp.lt.s32.totalorder %s1292_s22, 3 }
  0x1a   : > { %p260_p8 = pnand %p1014_p6, %p259_p7 }
  0x1b   : > { %s266_s9 = sand.u32 (!%p260_p8), 1, %s1276_s18   ;;  %s1016_s10 = sshll.u32 (!%p260_p8), %s1284_s20, 6 }
  0x1c   : > { %263 = sbr.rel (%p260_p8) target bundleno = 348 (0x15c), region = 51  ;;  %s1015_s11 = sshll.u32 (!%p260_p8), %s266_s9, 7 }
  0x1d   : > { %p301_p9 = scmp.lt.s32.totalorder (!%p260_p8), %s1016_s10, 127  ;;  %p313_p10 = scmp.eq.s32.totalorder (!%p260_p8), %s1284_s20, 0 }
  0x1e   : > { %s1397_s16 = scalar_lea.vmem (!%p260_p8), [#allocation3], %s1015_s11  ;;  %p1018_p11 = scmp.ne.s32.totalorder (!%p260_p8), %s1284_s20, 0 }
  0x21   : > { %s1524_s10 = smov (!%p301_p9, %s1016_s10), 127  ;;  %316 = sbr.rel (%p1018_p11) target bundleno = 43 (0x2b), region = 59 }
  0x22   : > { %s1017_s12 = sshll.u32 %s1524_s10, 2 }
  0x23   : > { %s1395_s15 = scalar_lea.vmem %s1512_s1, %s1017_s12 }
  0x26   : > { %v1294_v16 = vmov 0.0  }
  0x27   : > { %317 = vst [vmem:[#allocation2 + $0x30] sm:$0xff] %v1294_v16  ;;  %318 = vst [vmem:[#allocation2] sm:$0xff] %v1294_v16 }
  0x28   : > { %319 = vst [vmem:[#allocation2 + $0x18] sm:$0xff] %v1294_v16  ;;  %320 = vst [vmem:[#allocation2 + $0x10] sm:$0xff] %v1294_v16 }
  0x29   : > { %321 = vst [vmem:[#allocation2 + $0x8] sm:$0xff] %v1294_v16  ;;  %322 = vst [vmem:[#allocation2 + $0x20] sm:$0xff] %v1294_v16 }
  0x2a   : > { %323 = vst [vmem:[#allocation2 + $0x28] sm:$0xff] %v1294_v16  ;;  %324 = vst [vmem:[#allocation2 + $0x38] sm:$0xff] %v1294_v16 }
  0x2b PF: > { %329 = sbr.rel (!%p313_p10) target bundleno = 48 (0x30), region = 63  ;;  %v1295_v17 = vmov (%p313_p10), 0.0  }
  0x2c   : > { %330 = vst [vmem:[%s1515_s4] sm:$0x1] (%p313_p10), %v1295_v17  ;;  %331 = vst [vmem:[%s1516_s5] sm:$0x1] (%p313_p10), %v1295_v17 }
  0x30 PF: > { %v1198_v18 = vld [vmem:[%s1395_s15 + $0x78] sm:$0xff]   ;;  %v1202_v22 = vld [vmem:[%s1395_s15 + $0x70] sm:$0xff]   ;;  %v1206_v26 = vld [vmem:[%s1395_s15 + $0x68] sm:$0xff]   ;;  %p1068_p12 = scmp.ne.s32.totalorder %s1284_s20, 1 }
  0x31   : > { %v1199_v19 = vld [vmem:[%s1395_s15 + $0xf8] sm:$0xff]   ;;  %1076 = vmatprep.subr.bf16.mxu0 %v1198_v18  ;;  %v1203_v23 = vld [vmem:[%s1395_s15 + $0xf0] sm:$0xff]   ;;  %v1207_v27 = vld [vmem:[%s1395_s15 + $0xe8] sm:$0xff]  }
  0x32   : > { %v1200_v20 = vld [vmem:[%s1395_s15 + $0x38] sm:$0xff]   ;;  %1116 = vmatprep.subr.bf16.mxu1 %v1199_v19  ;;  %v1204_v24 = vld [vmem:[%s1395_s15 + $0x30] sm:$0xff]   ;;  %v1208_v28 = vld [vmem:[%s1395_s15 + $0x28] sm:$0xff]  }
  0x33   : > { %v1201_v21 = vld [vmem:[%s1395_s15 + $0xb8] sm:$0xff]   ;;  %1077 = vmatpush3.bf16.msra.mxu0 %v1200_v20  ;;  %v1205_v25 = vld [vmem:[%s1395_s15 + $0xb0] sm:$0xff]   ;;  %v1209_v29 = vld [vmem:[%s1395_s15 + $0xa8] sm:$0xff]  }
  0x34   : > { %1117 = vmatpush3.bf16.msra.mxu1 %v1201_v21  ;;  %1078 = vmatprep.subr.bf16.mxu0 %v1202_v22  ;;  %v1210_v30 = vld [vmem:[%s1395_s15 + $0x60] sm:$0xff]   ;;  %v1214_v34 = vld [vmem:[%s1395_s15 + $0x58] sm:$0xff]   ;;  %v1218_v38 = vld [vmem:[%s1395_s15 + $0x50] sm:$0xff]  }
  0x35   : > { %1118 = vmatprep.subr.bf16.mxu1 %v1203_v23  ;;  %v1211_v31 = vld [vmem:[%s1395_s15 + $0xe0] sm:$0xff]   ;;  %v1215_v35 = vld [vmem:[%s1395_s15 + $0xd8] sm:$0xff]   ;;  %v1219_v39 = vld [vmem:[%s1395_s15 + $0xd0] sm:$0xff]  }
  0x36   : > { %v1212_v32 = vld [vmem:[%s1395_s15 + $0x20] sm:$0xff]   ;;  %v1216_v36 = vld [vmem:[%s1395_s15 + $0x18] sm:$0xff]   ;;  %v1220_v40 = vld [vmem:[%s1395_s15 + $0x10] sm:$0xff]  }
  0x37   : > { %1079 = vmatpush3.bf16.msra.mxu0 %v1204_v24  ;;  %v1213_v33 = vld [vmem:[%s1395_s15 + $0xa0] sm:$0xff]   ;;  %v1217_v37 = vld [vmem:[%s1395_s15 + $0x98] sm:$0xff]   ;;  %v1221_v41 = vld [vmem:[%s1395_s15 + $0x90] sm:$0xff]  }
  0x38   : > { %1119 = vmatpush3.bf16.msra.mxu1 %v1205_v25  ;;  %1080 = vmatprep.subr.bf16.mxu0 %v1206_v26  ;;  %v1222_v42 = vld [vmem:[%s1395_s15 + $0x48] sm:$0xff]   ;;  %v1226_v46 = vld [vmem:[%s1395_s15 + $0x40] sm:$0xff]   ;;  %v332_v9 = vld [vmem:[#allocation2 + $0x30] sm:$0xff] }
  0x39   : > { %1120 = vmatprep.subr.bf16.mxu1 %v1207_v27  ;;  %v1223_v43 = vld [vmem:[%s1395_s15 + $0xc8] sm:$0xff]   ;;  %v1227_v47 = vld [vmem:[%s1395_s15 + $0xc0] sm:$0xff]   ;;  %v334_v27 = vld [vmem:[#allocation2 + $0x18] sm:$0xff] }
  0x3a   : > { %v1224_v44 = vld [vmem:[%s1395_s15 + $0x8] sm:$0xff]   ;;  %v1228_v48 = vld [vmem:[%s1395_s15] sm:$0xff]  }
  0x3b   : > { %1081 = vmatpush3.bf16.msra.mxu0 %v1208_v28  ;;  %v1225_v45 = vld [vmem:[%s1395_s15 + $0x88] sm:$0xff]   ;;  %v1229_v49 = vld [vmem:[%s1395_s15 + $0x80] sm:$0xff]  }
  0x3c   : > { %1121 = vmatpush3.bf16.msra.mxu1 %v1209_v29  ;;  %1082 = vmatprep.subr.bf16.mxu0 %v1210_v30  ;;  %v1230_v50 = vld [vmem:[%s1397_s16] ss:$16 sps:$4 sm:$0xff]   ;;  %v1232_v51 = vld [vmem:[%s1397_s16 + $0x4] ss:$16 sps:$4 sm:$0xff]   ;;  %v1233_v52 = vld [vmem:[%s1397_s16 + $0x8] ss:$16 sps:$4 sm:$0xff]  }
  0x3d   : > { %1122 = vmatprep.subr.bf16.mxu1 %v1211_v31  ;;  %v1235_v53 = vld [vmem:[%s1397_s16 + $0xc] ss:$16 sps:$4 sm:$0xff]   ;;  %724 = vmatprep.mubr.bf16.mxu0 %v1232_v51  ;;  %v1236_v54 = vld [vmem:[%s1397_s16 + $0x24] ss:$16 sps:$4 sm:$0xff]   ;;  %v1240_v56 = vld [vmem:[%s1397_s16 + $0x20] ss:$16 sps:$4 sm:$0xff]  }
  0x3e   : > { %789 = vmatprep.mubr.bf16.mxu1 %v1235_v53  ;;  %v1238_v55 = vld [vmem:[%s1397_s16 + $0x2c] ss:$16 sps:$4 sm:$0xff]   ;;  %v1241_v57 = vld [vmem:[%s1397_s16 + $0x28] ss:$16 sps:$4 sm:$0xff]   ;;  %v1242_v58 = vld [vmem:[%s1397_s16 + $0x44] ss:$16 sps:$4 sm:$0xff]  }
  0x3f   : > { %1083 = vmatpush3.bf16.msra.mxu0 %v1212_v32  ;;  %v1244_v59 = vld [vmem:[%s1397_s16 + $0x4c] ss:$16 sps:$4 sm:$0xff]   ;;  %v1246_v60 = vld [vmem:[%s1397_s16 + $0x40] ss:$16 sps:$4 sm:$0xff]   ;;  %v1247_v61 = vld [vmem:[%s1397_s16 + $0x48] ss:$16 sps:$4 sm:$0xff]  }
  0x40   : > { %1123 = vmatpush3.bf16.msra.mxu1 %v1213_v33  ;;  %1084 = vmatprep.subr.bf16.mxu0 %v1214_v34  ;;  %v1248_v62 = vld [vmem:[%s1397_s16 + $0x64] ss:$16 sps:$4 sm:$0xff]   ;;  %v1250_v63 = vld [vmem:[%s1397_s16 + $0x6c] ss:$16 sps:$4 sm:$0xff]   ;;  %v1252_v0 = vld [vmem:[%s1397_s16 + $0x60] ss:$16 sps:$4 sm:$0xff]  }
  0x41   : > { %1124 = vmatprep.subr.bf16.mxu1 %v1215_v35  ;;  %v1253_v1 = vld [vmem:[%s1397_s16 + $0x68] ss:$16 sps:$4 sm:$0xff]   ;;  %v333_v18 = vld [vmem:[#allocation2] sm:$0xff] }
  0x43   : > { %1085 = vmatpush3.bf16.msra.mxu0 %v1216_v36  ;;  %v335_v36 = vld [vmem:[#allocation2 + $0x10] sm:$0xff] }
  0x44   : > { %1125 = vmatpush3.bf16.msra.mxu1 %v1217_v37  ;;  %1086 = vmatprep.subr.bf16.mxu0 %v1218_v38 }
  0x45   : > { %1126 = vmatprep.subr.bf16.mxu1 %v1219_v39 }
  0x47   : > { %1087 = vmatpush3.bf16.msra.mxu0 %v1220_v40 }
  0x48   : > { %1127 = vmatpush3.bf16.msra.mxu1 %v1221_v41  ;;  %1088 = vmatprep.subr.bf16.mxu0 %v1222_v42 }
  0x49   : > { %1128 = vmatprep.subr.bf16.mxu1 %v1223_v43 }
  0x4b   : > { %1089 = vmatpush3.bf16.msra.mxu0 %v1224_v44 }
  0x4c   : > { %1129 = vmatpush3.bf16.msra.mxu1 %v1225_v45  ;;  %1090 = vmatprep.subr.bf16.mxu0 %v1226_v46  ;;  %v336_v45 = vld [vmem:[#allocation2 + $0x8] sm:$0xff] }
  0x4d   : > { %1130 = vmatprep.subr.bf16.mxu1 %v1227_v47 }
  0x4f   : > { %1091 = vmatpush3.bf16.msra.mxu0 %v1228_v48 }
  0x50   : > { %1131 = vmatpush3.bf16.msra.mxu1 %v1229_v49 }
  0x52   : > { %725 = vmatmul.mubr.bf16.vlgmr.msra.gmra.mxu0 %v1230_v50 }
  0x53   : > { %790 = vmatmul.mubr.bf16.vlgmr.msra.gmra.mxu1 %v1233_v52  ;;  %732 = vmatprep.mubr.bf16.mxu0 %v1236_v54  ;;  %v337_v54 = vld [vmem:[#allocation2 + $0x20] sm:$0xff] }
  0x54   : > { %797 = vmatprep.mubr.bf16.mxu1 %v1238_v55 }
  0x5a   : > { %733 = vmatmul.mubr.bf16.gmra.mxu0 %v1240_v56 }
  0x5b   : > { %798 = vmatmul.mubr.bf16.gmra.mxu1 %v1241_v57  ;;  %740 = vmatprep.mubr.bf16.mxu0 %v1242_v58 }
  0x5c   : > { %805 = vmatprep.mubr.bf16.mxu1 %v1244_v59 }
  0x62   : > { %741 = vmatmul.mubr.bf16.gmra.mxu0 %v1246_v60 }
  0x63   : > { %806 = vmatmul.mubr.bf16.gmra.mxu1 %v1247_v61  ;;  %748 = vmatprep.mubr.bf16.mxu0 %v1248_v62 }
  0x64   : > { %813 = vmatprep.mubr.bf16.mxu1 %v1250_v63  ;;  %v338_v63 = vld [vmem:[#allocation2 + $0x28] sm:$0xff] }
  0x6a   : > { %749 = vmatmul.mubr.bf16.gmra.mxu0 %v1252_v0 }
  0x6b   : > { %814 = vmatmul.mubr.bf16.gmra.mxu1 %v1253_v1 }
 0x112   : > { %v1092_v2 = vpop.f32.mrf.mxu0 }
 0x113   : > { %v1132_v3 = vpop.f32.mrf.mxu1 }
 0x114   : > { %v1093_v4 = vpop.f32.mrf.mxu0 }
 0x115   : > { %v1094_v5 = vadd.f32 %v1093_v4, %v1092_v2  ;;  %v1133_v6 = vpop.f32.mrf.mxu1 }
 0x116   : > { %v1134_v7 = vadd.f32 %v1133_v6, %v1132_v3  ;;  %v1095_v8 = vpop.f32.mrf.mxu0 }
 0x117   : > { %v1135_v10 = vpop.f32.mrf.mxu1 }
 0x118   : > { %v792_v11 = vadd.f32 %v1134_v7, %v1094_v5  ;;  %v1096_v12 = vpop.f32.mrf.mxu0  ;;  %v339_v7 = vld [vmem:[#allocation2 + $0x38] sm:$0xff] }
 0x119   : > { %v1097_v13 = vadd.f32 %v1096_v12, %v1095_v8  ;;  %v1136_v14 = vpop.f32.mrf.mxu1 }
 0x11a   : > { %v822_v15 = vadd.f32 %v792_v11, %v332_v9  ;;  %v1137_v16 = vadd.f32 %v1136_v14, %v1135_v10  ;;  %v1098_v17 = vpop.f32.mrf.mxu0 }
 0x11b   : > { %v1138_v19 = vpop.f32.mrf.mxu1 }
 0x11c   : > { %830 = vst [vmem:[#allocation2 + $0x30] sm:$0xff] %v822_v15  ;;  %v795_v20 = vadd.f32 %v1137_v16, %v1097_v13  ;;  %v1099_v21 = vpop.f32.mrf.mxu0 }
 0x11d   : > { %v1100_v22 = vadd.f32 %v1099_v21, %v1098_v17  ;;  %v1139_v23 = vpop.f32.mrf.mxu1 }
 0x11e   : > { %v823_v24 = vadd.f32 %v795_v20, %v333_v18  ;;  %v1140_v25 = vadd.f32 %v1139_v23, %v1138_v19  ;;  %v1101_v26 = vpop.f32.mrf.mxu0 }
 0x11f   : > { %v1141_v28 = vpop.f32.mrf.mxu1 }
 0x120   : > { %831 = vst [vmem:[#allocation2] sm:$0xff] %v823_v24  ;;  %v800_v29 = vadd.f32 %v1140_v25, %v1100_v22  ;;  %v1102_v30 = vpop.f32.mrf.mxu0 }
 0x121   : > { %v1103_v31 = vadd.f32 %v1102_v30, %v1101_v26  ;;  %v1142_v32 = vpop.f32.mrf.mxu1 }
 0x122   : > { %v824_v33 = vadd.f32 %v800_v29, %v334_v27  ;;  %v1143_v34 = vadd.f32 %v1142_v32, %v1141_v28  ;;  %v1104_v35 = vpop.f32.mrf.mxu0 }
 0x123   : > { %v1144_v37 = vpop.f32.mrf.mxu1 }
 0x124   : > { %832 = vst [vmem:[#allocation2 + $0x18] sm:$0xff] %v824_v33  ;;  %v803_v38 = vadd.f32 %v1143_v34, %v1103_v31  ;;  %v1105_v39 = vpop.f32.mrf.mxu0 }
 0x125   : > { %v1106_v40 = vadd.f32 %v1105_v39, %v1104_v35  ;;  %v1145_v41 = vpop.f32.mrf.mxu1 }
 0x126   : > { %v825_v42 = vadd.f32 %v803_v38, %v335_v36  ;;  %v1146_v43 = vadd.f32 %v1145_v41, %v1144_v37  ;;  %v1107_v44 = vpop.f32.mrf.mxu0 }
 0x127   : > { %v1147_v46 = vpop.f32.mrf.mxu1 }
 0x128   : > { %833 = vst [vmem:[#allocation2 + $0x10] sm:$0xff] %v825_v42  ;;  %v808_v47 = vadd.f32 %v1146_v43, %v1106_v40  ;;  %v1108_v48 = vpop.f32.mrf.mxu0 }
 0x129   : > { %v1109_v49 = vadd.f32 %v1108_v48, %v1107_v44  ;;  %v1148_v50 = vpop.f32.mrf.mxu1 }
 0x12a   : > { %v826_v51 = vadd.f32 %v808_v47, %v336_v45  ;;  %v1149_v52 = vadd.f32 %v1148_v50, %v1147_v46  ;;  %v1110_v53 = vpop.f32.mrf.mxu0 }
 0x12b   : > { %v1150_v55 = vpop.f32.mrf.mxu1 }
 0x12c   : > { %834 = vst [vmem:[#allocation2 + $0x8] sm:$0xff] %v826_v51  ;;  %v811_v56 = vadd.f32 %v1149_v52, %v1109_v49  ;;  %v1111_v57 = vpop.f32.mrf.mxu0 }
 0x12d   : > { %v1112_v58 = vadd.f32 %v1111_v57, %v1110_v53  ;;  %v1151_v59 = vpop.f32.mrf.mxu1 }
 0x12e   : > { %v827_v60 = vadd.f32 %v811_v56, %v337_v54  ;;  %v1152_v61 = vadd.f32 %v1151_v59, %v1150_v55  ;;  %v1113_v62 = vpop.f32.mrf.mxu0 }
 0x12f   : > { %v1153_v0 = vpop.f32.mrf.mxu1 }
 0x130   : > { %835 = vst [vmem:[#allocation2 + $0x20] sm:$0xff] %v827_v60  ;;  %v816_v1 = vadd.f32 %v1152_v61, %v1112_v58  ;;  %v1114_v2 = vpop.f32.mrf.mxu0 }
 0x131   : > { %v1115_v3 = vadd.f32 %v1114_v2, %v1113_v62  ;;  %v1154_v4 = vpop.f32.mrf.mxu1 }
 0x132   : > { %v828_v5 = vadd.f32 %v816_v1, %v338_v63  ;;  %v1155_v6 = vadd.f32 %v1154_v4, %v1153_v0 }
 0x134   : > { %836 = vst [vmem:[#allocation2 + $0x28] sm:$0xff] %v828_v5  ;;  %v819_v8 = vadd.f32 %v1155_v6, %v1115_v3  ;;  %841 = sbr.rel (%p1068_p12) target bundleno = 348 (0x15c), region = 67 }
 0x136   : > { %v829_v9 = vadd.f32 %v819_v8, %v339_v7 }
 0x138   : > { %837 = vst [vmem:[#allocation2 + $0x38] sm:$0xff] %v829_v9 }
 0x139   : > { %v842_v10 = vld [vmem:[#allocation2 + $0x30] sm:$0xff]  ;;  %v1069_v11 = vld [vmem:[%s1513_s2] ss:$0 sm:$0xff]  ;;  %v844_v15 = vld [vmem:[#allocation2 + $0x18] sm:$0xff] }
 0x13a   : > { %v843_v12 = vld [vmem:[#allocation2] sm:$0xff]  ;;  %v857_v13 = vadd.f32 %v1069_v11, %v842_v10  ;;  %v845_v16 = vld [vmem:[#allocation2 + $0x10] sm:$0xff]  ;;  %v846_v17 = vld [vmem:[#allocation2 + $0x8] sm:$0xff]  ;;  %v859_v18 = vadd.f32 %v1069_v11, %v844_v15 }
 0x13b   : > { %v858_v14 = vadd.f32 %v1069_v11, %v843_v12  ;;  %v860_v19 = vadd.f32 %v1069_v11, %v845_v16  ;;  %v861_v20 = vadd.f32 %v1069_v11, %v846_v17  ;;  %v847_v21 = vld [vmem:[#allocation2 + $0x20] sm:$0xff]  ;;  %v848_v22 = vld [vmem:[#allocation2 + $0x28] sm:$0xff] }
 0x13c   : > { %865 = vst [vmem:[%s1514_s3] sm:$0xff] %v857_v13  ;;  %v890_v24 = vmul.f32 %v857_v13, %v857_v13  ;;  %v862_v27 = vadd.f32 %v1069_v11, %v847_v21  ;;  %867 = vst [vmem:[%s1514_s3 + $0x10] sm:$0xff] %v859_v18  ;;  %v892_v28 = vmul.f32 %v859_v18, %v859_v18  ;;  %v873_v58 = vld [vmem:[%s1515_s4] sm:$0x1] }
 0x13d   : > { %866 = vst [vmem:[%s1514_s3 + $0x8] sm:$0xff] %v858_v14  ;;  %v874_v25 = vadd.f32 %v858_v14, %v857_v13  ;;  %v891_v26 = vmul.f32 %v858_v14, %v858_v14  ;;  %868 = vst [vmem:[%s1514_s3 + $0x18] sm:$0xff] %v860_v19  ;;  %v863_v29 = vadd.f32 %v1069_v11, %v848_v22  ;;  %v889_v61 = vld [vmem:[%s1516_s5] sm:$0x1] }
 0x13e   : > { %869 = vst [vmem:[%s1514_s3 + $0x20] sm:$0xff] %v861_v20  ;;  %v893_v32 = vmul.f32 %v860_v19, %v860_v19  ;;  %870 = vst [vmem:[%s1514_s3 + $0x28] sm:$0xff] %v862_v27  ;;  %v894_v36 = vmul.f32 %v861_v20, %v861_v20  ;;  %v895_v39 = vmul.f32 %v862_v27, %v862_v27 }
 0x13f   : > { %v849_v23 = vld [vmem:[#allocation2 + $0x38] sm:$0xff]  ;;  %v898_v30 = vadd.f32 %v891_v26, %v890_v24  ;;  %v875_v31 = vadd.f32 %v874_v25, %v859_v18  ;;  %871 = vst [vmem:[%s1514_s3 + $0x30] sm:$0xff] %v863_v29  ;;  %v896_v42 = vmul.f32 %v863_v29, %v863_v29 }
 0x140   : > { %v864_v33 = vadd.f32 %v1069_v11, %v849_v23 }
 0x141   : > { %v899_v34 = vadd.f32 %v898_v30, %v892_v28  ;;  %v876_v35 = vadd.f32 %v875_v31, %v860_v19 }
 0x142   : > { %872 = vst [vmem:[%s1514_s3 + $0x38] sm:$0xff] %v864_v33  ;;  %v897_v45 = vmul.f32 %v864_v33, %v864_v33 }
 0x143   : > { %v900_v37 = vadd.f32 %v899_v34, %v893_v32  ;;  %v877_v38 = vadd.f32 %v876_v35, %v861_v20 }
 0x145   : > { %v901_v40 = vadd.f32 %v900_v37, %v894_v36  ;;  %v878_v41 = vadd.f32 %v877_v38, %v862_v27 }
 0x147   : > { %v902_v43 = vadd.f32 %v901_v40, %v895_v39  ;;  %v879_v44 = vadd.f32 %v878_v41, %v863_v29 }
 0x149   : > { %v903_v46 = vadd.f32 %v902_v43, %v896_v42  ;;  %v880_v47 = vadd.f32 %v879_v44, %v864_v33 }
 0x14b   : > { %v881_v48 = vrot.slane %v880_v47, 4  ;;  %v904_v49 = vadd.f32 %v903_v46, %v897_v45 }
 0x14d   : > { %v882_v50 = vadd.f32 %v881_v48, %v880_v47  ;;  %v905_v51 = vrot.slane %v904_v49, 4 }
 0x14f   : > { %v883_v52 = vrot.slane %v882_v50, 2  ;;  %v906_v53 = vadd.f32 %v905_v51, %v904_v49 }
 0x151   : > { %v884_v54 = vadd.f32 %v883_v52, %v882_v50  ;;  %v907_v55 = vrot.slane %v906_v53, 2 }
 0x153   : > { %v885_v56 = vrot.slane %v884_v54, 1  ;;  %v908_v57 = vadd.f32 %v907_v55, %v906_v53 }
 0x155   : > { %v886_v59 = vadd.f32 %v885_v56, %v884_v54  ;;  %v909_v60 = vrot.slane %v908_v57, 1 }
 0x157   : > { %v887_v62 = vadd.f32 %v886_v59, %v873_v58  ;;  %v910_v63 = vadd.f32 %v909_v60, %v908_v57 }
 0x159   : > { %888 = vst [vmem:[%s1515_s4] sm:$0x1] %v887_v62  ;;  %v911_v0 = vadd.f32 %v910_v63, %v889_v61 }
 0x15b   : > { %912 = vst [vmem:[%s1516_s5] sm:$0x1] %v911_v0 }
 0x15c PF: > { %s16_s22 = sadd.s32 1, %s1292_s22   ;;  %s1517_s18 = smov %s1280_s19 }
 0x15d   : > { %p13_p13 = scmp.ge.s32.totalorder %s16_s22, 4   ;;  %s1518_s19 = smov %s1361_s26 }
 0x15e   : > { %s1519_s20 = smov %s1288_s21  ;;  %s1520_s21 = smov %s1522_s23 }
 0x15f   :  { %15 = sbr.rel (!%p13_p13) target bundleno = 3 (0x3), region = 121 }

// kernel: discriminator_forward.6
= control target key start
LH: loop header
LB: loop body
LE: loop exit
PB: predicated region body
PF: predicated region fallthrough
CT: control target
= control target key end

     0   :  { %s223_s0 = inlined_call_operand.vmem [shape: f32[64,128], index: 0, kind: input, shape index: {}]   ;;  %s224_s1 = inlined_call_operand.vmem [shape: f32[1,128], index: 1, kind: input, shape index: {}]   ;;  %s225_s2 = inlined_call_operand.vmem [shape: f32[1,128], index: 2, kind: input, shape index: {}]   ;;  %s226_s3 = inlined_call_operand.vmem [shape: bf16[64,128], index: 3, kind: output, shape index: {}]  }
   0x1   :  { %v14_v0 = vld [vmem:[%s223_s0] sm:$0xff]  ;;  %v15_v1 = vld [vmem:[%s223_s0 + $0x8] sm:$0xff]  ;;  %v16_v6 = vld [vmem:[%s223_s0 + $0x10] sm:$0xff] }
   0x2   :  { %v120_v2 = vld [vmem:[%s224_s1] ss:$0 sm:$0xff]  ;;  %v17_v7 = vld [vmem:[%s223_s0 + $0x18] sm:$0xff]  ;;  %v19_v11 = vld [vmem:[%s223_s0 + $0x28] sm:$0xff] }
   0x3   :  { %v29_v3 = vmul.f32 %v120_v2, %v14_v0  ;;  %v30_v4 = vmul.f32 %v120_v2, %v15_v1  ;;  %v121_v5 = vld [vmem:[%s225_s2] ss:$0 sm:$0xff]  ;;  %v31_v8 = vmul.f32 %v120_v2, %v16_v6  ;;  %v32_v9 = vmul.f32 %v120_v2, %v17_v7  ;;  %v20_v12 = vld [vmem:[%s223_s0 + $0x30] sm:$0xff]  ;;  %v21_v17 = vld [vmem:[%s223_s0 + $0x38] sm:$0xff] }
   0x4   :  { %v18_v10 = vld [vmem:[%s223_s0 + $0x20] sm:$0xff]  ;;  %v34_v16 = vmul.f32 %v120_v2, %v19_v11  ;;  %v35_v20 = vmul.f32 %v120_v2, %v20_v12  ;;  %v36_v21 = vmul.f32 %v120_v2, %v21_v17 }
   0x5   :  { %v44_v13 = vadd.f32 %v121_v5, %v29_v3  ;;  %v45_v14 = vadd.f32 %v121_v5, %v30_v4  ;;  %v33_v15 = vmul.f32 %v120_v2, %v18_v10  ;;  %v46_v18 = vadd.f32 %v121_v5, %v31_v8 }
   0x6   :  { %v47_v19 = vadd.f32 %v121_v5, %v32_v9  ;;  %v49_v29 = vadd.f32 %v121_v5, %v34_v16  ;;  %v50_v33 = vadd.f32 %v121_v5, %v35_v20  ;;  %v51_v37 = vadd.f32 %v121_v5, %v36_v21 }
   0x7   :  { %vm52_vm0 = vcmp.gt.f32.partialorder %v44_v13, 0.0  ;;  %vm53_vm1 = vcmp.gt.f32.partialorder %v45_v14, 0.0  ;;  %v60_v22 = vmul.f32 0.2, %v44_v13  ;;  %v61_v23 = vmul.f32 0.2, %v45_v14 }
   0x8   :  { %vm54_vm2 = vcmp.gt.f32.partialorder %v46_v18, 0.0  ;;  %vm55_vm3 = vcmp.gt.f32.partialorder %v47_v19, 0.0  ;;  %v62_v24 = vmul.f32 0.2, %v46_v18  ;;  %v63_v25 = vmul.f32 0.2, %v47_v19 }
   0x9   :  { %v68_v26 = vsel %vm52_vm0, %v44_v13, %v60_v22  ;;  %v69_v27 = vsel %vm53_vm1, %v45_v14, %v61_v23  ;;  %v48_v28 = vadd.f32 %v121_v5, %v33_v15  ;;  %vm57_vm5 = vcmp.gt.f32.partialorder %v49_v29, 0.0 }
   0xa   :  { %v141_v30 = vpack.c.bf16 %v69_v27, %v68_v26  ;;  %v70_v31 = vsel %vm54_vm2, %v46_v18, %v62_v24  ;;  %v71_v32 = vsel %vm55_vm3, %v47_v19, %v63_v25  ;;  %v65_v36 = vmul.f32 0.2, %v49_v29 }
   0xb   :  { %v146_v34 = vpack.c.bf16 %v71_v32, %v70_v31  ;;  %vm56_vm4 = vcmp.gt.f32.partialorder %v48_v28, 0.0  ;;  %v64_v35 = vmul.f32 0.2, %v48_v28  ;;  %vm58_vm6 = vcmp.gt.f32.partialorder %v50_v33, 0.0 }
   0xc   :  { %142 = vst [vmem:[%s226_s3] sm:$0xff] %v141_v30   ;;  %v66_v38 = vmul.f32 0.2, %v50_v33  ;;  %v73_v40 = vsel %vm57_vm5, %v49_v29, %v65_v36  ;;  %vm59_vm7 = vcmp.gt.f32.partialorder %v51_v37, 0.0  ;;  %v67_v41 = vmul.f32 0.2, %v51_v37 }
   0xd   :  { %158 = vst [vmem:[%s226_s3 + $0x8] sm:$0xff] %v146_v34   ;;  %v72_v39 = vsel %vm56_vm4, %v48_v28, %v64_v35 }
   0xe   :  { %v74_v42 = vsel %vm58_vm6, %v50_v33, %v66_v38  ;;  %v151_v43 = vpack.c.bf16 %v73_v40, %v72_v39  ;;  %v75_v44 = vsel %vm59_vm7, %v51_v37, %v67_v41 }
   0xf   :  { %v156_v45 = vpack.c.bf16 %v75_v44, %v74_v42 }
  0x10   :  { %159 = vst [vmem:[%s226_s3 + $0x10] sm:$0xff] %v151_v43  }
  0x11   :  { %160 = vst [vmem:[%s226_s3 + $0x18] sm:$0xff] %v156_v45  }

// kernel: discriminator_forward.7
= control target key start
LH: loop header
LB: loop body
LE: loop exit
PB: predicated region body
PF: predicated region fallthrough
CT: control target
= control target key end

     0   :  { %s3675_s29 = smov 0   ;;  %s4589_s0 = inlined_call_operand.vmem [shape: bf16[4,2048], index: 0, kind: input, shape index: {}]   ;;  %s4590_s1 = inlined_call_operand.vmem [shape: bf16[2048,1024], index: 1, kind: input, shape index: {}]   ;;  %s4591_s2 = inlined_call_operand.vmem [shape: f32[1,1024], index: 2, kind: input, shape index: {}]   ;;  %s4592_s3 = inlined_call_operand.vmem [shape: f32[1,1024], index: 3, kind: input, shape index: {}]   ;;  %s4593_s4 = inlined_call_operand.vmem [shape: f32[1,1024], index: 4, kind: input, shape index: {}]   ;;  %s4594_s5 = inlined_call_operand.vmem [shape: f32[1024,1], index: 5, kind: input, shape index: {}]   ;;  %s4595_s6 = inlined_call_operand.<no memory space> [shape: f32[1,1], index: 6, kind: input, shape index: {}]   ;;  %s4596_s7 = inlined_call_operand.vmem [shape: f32[4,1024], index: 7, kind: input, shape index: {}]   ;;  %s4597_s8 = inlined_call_operand.vmem [shape: f32[4,1], index: 8, kind: output, shape index: {}]  }
   0x1   :  { %v13_v0 = vstv %s4595_s6 }
   0x2   :  { %14 = vst [vmem:[#allocation3] sm:$0x1] %v13_v0 }
   0x3 LB: > { %s3681_s30 = sadd.s32 4294967295, %s3622_s29   ;;  %p3174_p0 = scmp.ge.s32.totalorder %s3622_s29, 1  ;;  %s3622_s29 = sphi %s3675_s29, %s20_s29  }
   0x4   : > { %p272_p1 = scmp.lt.s32.totalorder %s3622_s29, 5 }
   0x6   : > { %p273_p2 = pnand %p3174_p0, %p272_p1 }
   0x7   : > { %s3175_s6 = sshll.u32 (!%p273_p2), %s3681_s30, 2  ;;  %s3177_s9 = sshll.u32 (!%p273_p2), %s3681_s30, 6 }
   0x8   : > { %276 = sbr.rel (%p273_p2) target bundleno = 826 (0x33a), region = 52  ;;  %p308_p3 = scmp.lt.s32.totalorder (!%p273_p2), %s3175_s6, 15 }
   0x9   : > { %p314_p4 = scmp.lt.s32.totalorder (!%p273_p2), %s3177_s9, 255  ;;  %p3180_p5 = scmp.ne.s32.totalorder (!%p273_p2), %s3681_s30, 0 }
   0xd   : > { %s4599_s6 = smov (!%p308_p3, %s3175_s6), 15  ;;  %s4601_s9 = smov (!%p314_p4, %s3177_s9), 255 }
   0xe   : > { %s3176_s10 = sshll.u32 %s4599_s6, 1  ;;  %s3441_s14 = sshll.u32 %s4601_s9, 5 }
   0xf   : > { %s3690_s13 = scalar_lea.vmem %s4589_s0, %s3176_s10  ;;  %s3695_s17 = scalar_lea.vmem %s4590_s1, %s3441_s14 }
  0x10   : > { %323 = sbr.rel (%p3180_p5) target bundleno = 24 (0x18), region = 56 }
  0x15   : > { %v3624_v1 = vmov 0.0  }
  0x16   : > { %324 = vst [vmem:[#allocation2 + $0x10] sm:$0xff] %v3624_v1  ;;  %325 = vst [vmem:[#allocation2] sm:$0xff] %v3624_v1 }
  0x17   : > { %326 = vst [vmem:[#allocation2 + $0x18] sm:$0xff] %v3624_v1  ;;  %327 = vst [vmem:[#allocation2 + $0x8] sm:$0xff] %v3624_v1 }
  0x18 PF: > { %v389_v2 = vld [vmem:[%s3695_s17 + $0x1c0] sm:$0xff]  ;;  %v3625_v34 = vmov 1983009808   ;;  %v594_v36 = vlaneseq  ;;  %p3437_p6 = scmp.ne.s32.totalorder %s3681_s30, 3 }
  0x19   : > { %v393_v3 = vld [vmem:[%s3695_s17 + $0x1e0] sm:$0xff]  ;;  %v592_v35 = vunpack.c.l.s4 %v3625_v34 }
  0x1a   : > { %v517_v4 = vld [vmem:[%s3695_s17 + $0x5c0] sm:$0xff]  ;;  %v3238_v5 = vcombine.high %v389_v2, %v393_v3  ;;  %v3237_v7 = vcombine.low %v389_v2, %v393_v3  ;;  %v3720_v46 = vshrl.u32 %v594_v36, 7 }
  0x1b   : > { %v521_v6 = vld [vmem:[%s3695_s17 + $0x5e0] sm:$0xff]  ;;  %v593_v45 = vunpack.c.0.s8 %v592_v35 }
  0x1c   : > { %v381_v8 = vld [vmem:[%s3695_s17 + $0x180] sm:$0xff]  ;;  %v3366_v10 = vcombine.high %v517_v4, %v521_v6  ;;  %v3365_v11 = vcombine.low %v517_v4, %v521_v6  ;;  %1891 = vmatprep.subr.bf16.mxu0 %v3238_v5 }
  0x1d   : > { %v385_v9 = vld [vmem:[%s3695_s17 + $0x1a0] sm:$0xff]  ;;  %1892 = vmatpush1.bf16.msra.mxu0 %v3237_v7  ;;  %v596_v55 = vsub.s32 %v593_v45, %v3720_v46 }
  0x1e   : > { %v3230_v12 = vcombine.high %v381_v8, %v385_v9  ;;  %v509_v13 = vld [vmem:[%s3695_s17 + $0x580] sm:$0xff]  ;;  %1932 = vmatprep.subr.bf16.mxu1 %v3366_v10  ;;  %v3229_v20 = vcombine.low %v381_v8, %v385_v9 }
  0x1f   : > { %v513_v14 = vld [vmem:[%s3695_s17 + $0x5a0] sm:$0xff]  ;;  %1933 = vmatpush1.bf16.msra.mxu1 %v3365_v11 }
  0x20   : > { %v373_v15 = vld [vmem:[%s3695_s17 + $0x140] sm:$0xff]  ;;  %v3358_v16 = vcombine.high %v509_v13, %v513_v14  ;;  %1893 = vmatprep.subr.bf16.mxu0 %v3230_v12  ;;  %v3357_v21 = vcombine.low %v509_v13, %v513_v14 }
  0x21   : > { %v377_v17 = vld [vmem:[%s3695_s17 + $0x160] sm:$0xff]  ;;  %1894 = vmatpush1.bf16.msra.mxu0 %v3229_v20 }
  0x22   : > { %v501_v18 = vld [vmem:[%s3695_s17 + $0x540] sm:$0xff]  ;;  %v3222_v22 = vcombine.high %v373_v15, %v377_v17  ;;  %1934 = vmatprep.subr.bf16.mxu1 %v3358_v16  ;;  %v3221_v28 = vcombine.low %v373_v15, %v377_v17 }
  0x23   : > { %v505_v19 = vld [vmem:[%s3695_s17 + $0x560] sm:$0xff]  ;;  %1935 = vmatpush1.bf16.msra.mxu1 %v3357_v21 }
  0x24   : > { %v3350_v23 = vcombine.high %v501_v18, %v505_v19  ;;  %v365_v24 = vld [vmem:[%s3695_s17 + $0x100] sm:$0xff]  ;;  %1895 = vmatprep.subr.bf16.mxu0 %v3222_v22  ;;  %v3349_v29 = vcombine.low %v501_v18, %v505_v19 }
  0x25   : > { %v369_v25 = vld [vmem:[%s3695_s17 + $0x120] sm:$0xff]  ;;  %1896 = vmatpush1.bf16.msra.mxu0 %v3221_v28 }
  0x26   : > { %v493_v26 = vld [vmem:[%s3695_s17 + $0x500] sm:$0xff]  ;;  %v3214_v30 = vcombine.high %v365_v24, %v369_v25  ;;  %1936 = vmatprep.subr.bf16.mxu1 %v3350_v23  ;;  %v3213_v39 = vcombine.low %v365_v24, %v369_v25 }
  0x27   : > { %v497_v27 = vld [vmem:[%s3695_s17 + $0x520] sm:$0xff]  ;;  %1937 = vmatpush1.bf16.msra.mxu1 %v3349_v29 }
  0x28   : > { %v3342_v31 = vcombine.high %v493_v26, %v497_v27  ;;  %v357_v32 = vld [vmem:[%s3695_s17 + $0xc0] sm:$0xff]  ;;  %1897 = vmatprep.subr.bf16.mxu0 %v3214_v30  ;;  %v3341_v40 = vcombine.low %v493_v26, %v497_v27 }
  0x29   : > { %v361_v33 = vld [vmem:[%s3695_s17 + $0xe0] sm:$0xff]  ;;  %1898 = vmatpush1.bf16.msra.mxu0 %v3213_v39 }
  0x2a   : > { %v485_v37 = vld [vmem:[%s3695_s17 + $0x4c0] sm:$0xff]  ;;  %v3206_v41 = vcombine.high %v357_v32, %v361_v33  ;;  %1938 = vmatprep.subr.bf16.mxu1 %v3342_v31  ;;  %v3205_v49 = vcombine.low %v357_v32, %v361_v33 }
  0x2b   : > { %v489_v38 = vld [vmem:[%s3695_s17 + $0x4e0] sm:$0xff]  ;;  %1939 = vmatpush1.bf16.msra.mxu1 %v3341_v40 }
  0x2c   : > { %v3334_v42 = vcombine.high %v485_v37, %v489_v38  ;;  %v349_v43 = vld [vmem:[%s3695_s17 + $0x80] sm:$0xff]  ;;  %1899 = vmatprep.subr.bf16.mxu0 %v3206_v41  ;;  %v3333_v50 = vcombine.low %v485_v37, %v489_v38 }
  0x2d   : > { %v353_v44 = vld [vmem:[%s3695_s17 + $0xa0] sm:$0xff]  ;;  %1900 = vmatpush1.bf16.msra.mxu0 %v3205_v49 }
  0x2e   : > { %v477_v47 = vld [vmem:[%s3695_s17 + $0x480] sm:$0xff]  ;;  %v3198_v51 = vcombine.high %v349_v43, %v353_v44  ;;  %1940 = vmatprep.subr.bf16.mxu1 %v3334_v42  ;;  %v3197_v58 = vcombine.low %v349_v43, %v353_v44 }
  0x2f   : > { %v481_v48 = vld [vmem:[%s3695_s17 + $0x4a0] sm:$0xff]  ;;  %1941 = vmatpush1.bf16.msra.mxu1 %v3333_v50 }
  0x30   : > { %v3326_v52 = vcombine.high %v477_v47, %v481_v48  ;;  %v341_v53 = vld [vmem:[%s3695_s17 + $0x40] sm:$0xff]  ;;  %1901 = vmatprep.subr.bf16.mxu0 %v3198_v51  ;;  %v3325_v59 = vcombine.low %v477_v47, %v481_v48 }
  0x31   : > { %v345_v54 = vld [vmem:[%s3695_s17 + $0x60] sm:$0xff]  ;;  %1902 = vmatpush1.bf16.msra.mxu0 %v3197_v58 }
  0x32   : > { %v469_v56 = vld [vmem:[%s3695_s17 + $0x440] sm:$0xff]  ;;  %v3190_v60 = vcombine.high %v341_v53, %v345_v54  ;;  %1942 = vmatprep.subr.bf16.mxu1 %v3326_v52  ;;  %v3189_v5 = vcombine.low %v341_v53, %v345_v54 }
  0x33   : > { %v473_v57 = vld [vmem:[%s3695_s17 + $0x460] sm:$0xff]  ;;  %1943 = vmatpush1.bf16.msra.mxu1 %v3325_v59 }
  0x34   : > { %v332_v61 = vld [vmem:[%s3690_s13] sm:$0xff]  ;;  %v3318_v62 = vcombine.high %v469_v56, %v473_v57  ;;  %1903 = vmatprep.subr.bf16.mxu0 %v3190_v60  ;;  %v3317_v8 = vcombine.low %v469_v56, %v473_v57 }
  0x35   : > { %v333_v63 = vld [vmem:[%s3695_s17] sm:$0xff]  ;;  %v3732_v1 = vrot.slane %v332_v61, %v596_v55  ;;  %v590_v2 = vcombine.high %v332_v61, %v332_v61  ;;  %1904 = vmatpush1.bf16.msra.mxu0 %v3189_v5 }
  0x36   : > { %v337_v0 = vld [vmem:[%s3695_s17 + $0x20] sm:$0xff]  ;;  %1944 = vmatprep.subr.bf16.mxu1 %v3318_v62 }
  0x37   : > { %v461_v3 = vld [vmem:[%s3695_s17 + $0x400] sm:$0xff]  ;;  %v3738_v6 = vcombine.high %v3732_v1, %v3732_v1  ;;  %v3740_v7 = vrot.slane %v590_v2, %v596_v55  ;;  %v3182_v9 = vcombine.high %v333_v63, %v337_v0  ;;  %v3181_v16 = vcombine.low %v333_v63, %v337_v0  ;;  %1945 = vmatpush1.bf16.msra.mxu1 %v3317_v8 }
  0x38   : > { %v465_v4 = vld [vmem:[%s3695_s17 + $0x420] sm:$0xff] }
  0x39   : > { %v3310_v10 = vcombine.high %v461_v3, %v465_v4  ;;  %v453_v11 = vld [vmem:[%s3695_s17 + $0x3c0] sm:$0xff]  ;;  %1923 = vmatprep.mubr.bf16.mxu0 %v3738_v6  ;;  %v3747_v13 = vcombine.high %v3740_v7, %v3740_v7  ;;  %1905 = vmatprep.subr.bf16.mxu0 %v3182_v9  ;;  %v3309_v17 = vcombine.low %v461_v3, %v465_v4 }
  0x3a   : > { %v457_v12 = vld [vmem:[%s3695_s17 + $0x3e0] sm:$0xff]  ;;  %1906 = vmatpush1.bf16.msra.mxu0 %v3181_v16 }
  0x3b   : > { %v581_v14 = vld [vmem:[%s3695_s17 + $0x7c0] sm:$0xff]  ;;  %1964 = vmatprep.mubr.bf16.mxu1 %v3747_v13  ;;  %v3302_v18 = vcombine.high %v453_v11, %v457_v12  ;;  %1946 = vmatprep.subr.bf16.mxu1 %v3310_v10  ;;  %v3301_v24 = vcombine.low %v453_v11, %v457_v12 }
  0x3c   : > { %v585_v15 = vld [vmem:[%s3695_s17 + $0x7e0] sm:$0xff]  ;;  %1947 = vmatpush1.bf16.msra.mxu1 %v3309_v17  ;;  %v390_v17 = vld [vmem:[%s3695_s17 + $0x1c8] sm:$0xff] }
  0x3d   : > { %v3430_v19 = vcombine.high %v581_v14, %v585_v15  ;;  %v445_v20 = vld [vmem:[%s3695_s17 + $0x380] sm:$0xff]  ;;  %1907 = vmatprep.subr.bf16.mxu0 %v3302_v18  ;;  %v3429_v25 = vcombine.low %v581_v14, %v585_v15  ;;  %v394_v18 = vld [vmem:[%s3695_s17 + $0x1e8] sm:$0xff] }
  0x3e   : > { %v449_v21 = vld [vmem:[%s3695_s17 + $0x3a0] sm:$0xff]  ;;  %1908 = vmatpush2.bf16.msra.mxu0 %v3301_v24 }
  0x3f   : > { %v573_v22 = vld [vmem:[%s3695_s17 + $0x780] sm:$0xff]  ;;  %v3294_v26 = vcombine.high %v445_v20, %v449_v21  ;;  %1948 = vmatprep.subr.bf16.mxu1 %v3430_v19  ;;  %v3293_v32 = vcombine.low %v445_v20, %v449_v21  ;;  %v518_v19 = vld [vmem:[%s3695_s17 + $0x5c8] sm:$0xff] }
  0x40   : > { %v577_v23 = vld [vmem:[%s3695_s17 + $0x7a0] sm:$0xff]  ;;  %1949 = vmatpush2.bf16.msra.mxu1 %v3429_v25  ;;  %v522_v20 = vld [vmem:[%s3695_s17 + $0x5e8] sm:$0xff] }
  0x41   : > { %v3422_v27 = vcombine.high %v573_v22, %v577_v23  ;;  %v437_v28 = vld [vmem:[%s3695_s17 + $0x340] sm:$0xff]  ;;  %1909 = vmatprep.subr.bf16.mxu0 %v3294_v26  ;;  %v3421_v33 = vcombine.low %v573_v22, %v577_v23  ;;  %v3240_v23 = vcombine.high %v390_v17, %v394_v18  ;;  %v3368_v24 = vcombine.high %v518_v19, %v522_v20  ;;  %v382_v25 = vld [vmem:[%s3695_s17 + $0x188] sm:$0xff] }
  0x42   : > { %v441_v29 = vld [vmem:[%s3695_s17 + $0x360] sm:$0xff]  ;;  %1910 = vmatpush2.bf16.msra.mxu0 %v3293_v32  ;;  %v386_v26 = vld [vmem:[%s3695_s17 + $0x1a8] sm:$0xff] }
  0x43   : > { %v565_v30 = vld [vmem:[%s3695_s17 + $0x740] sm:$0xff]  ;;  %v3286_v34 = vcombine.high %v437_v28, %v441_v29  ;;  %1950 = vmatprep.subr.bf16.mxu1 %v3422_v27  ;;  %v3285_v40 = vcombine.low %v437_v28, %v441_v29  ;;  %v510_v27 = vld [vmem:[%s3695_s17 + $0x588] sm:$0xff]  ;;  %v3239_v29 = vcombine.low %v390_v17, %v394_v18 }
  0x44   : > { %v569_v31 = vld [vmem:[%s3695_s17 + $0x760] sm:$0xff]  ;;  %1951 = vmatpush2.bf16.msra.mxu1 %v3421_v33  ;;  %v514_v28 = vld [vmem:[%s3695_s17 + $0x5a8] sm:$0xff] }
  0x45   : > { %v3414_v35 = vcombine.high %v565_v30, %v569_v31  ;;  %v429_v36 = vld [vmem:[%s3695_s17 + $0x300] sm:$0xff]  ;;  %1911 = vmatprep.subr.bf16.mxu0 %v3286_v34  ;;  %v3413_v41 = vcombine.low %v565_v30, %v569_v31  ;;  %v3367_v30 = vcombine.low %v518_v19, %v522_v20  ;;  %v3232_v31 = vcombine.high %v382_v25, %v386_v26  ;;  %v374_v33 = vld [vmem:[%s3695_s17 + $0x148] sm:$0xff] }
  0x46   : > { %v433_v37 = vld [vmem:[%s3695_s17 + $0x320] sm:$0xff]  ;;  %1912 = vmatpush2.bf16.msra.mxu0 %v3285_v40  ;;  %v3360_v32 = vcombine.high %v510_v27, %v514_v28  ;;  %v378_v34 = vld [vmem:[%s3695_s17 + $0x168] sm:$0xff] }
  0x47   : > { %v557_v38 = vld [vmem:[%s3695_s17 + $0x700] sm:$0xff]  ;;  %v3278_v42 = vcombine.high %v429_v36, %v433_v37  ;;  %1952 = vmatprep.subr.bf16.mxu1 %v3414_v35  ;;  %v3277_v49 = vcombine.low %v429_v36, %v433_v37  ;;  %v502_v35 = vld [vmem:[%s3695_s17 + $0x548] sm:$0xff]  ;;  %v3231_v37 = vcombine.low %v382_v25, %v386_v26 }
  0x48   : > { %v561_v39 = vld [vmem:[%s3695_s17 + $0x720] sm:$0xff]  ;;  %1953 = vmatpush2.bf16.msra.mxu1 %v3413_v41  ;;  %v506_v36 = vld [vmem:[%s3695_s17 + $0x568] sm:$0xff] }
  0x49   : > { %v3406_v43 = vcombine.high %v557_v38, %v561_v39  ;;  %v421_v44 = vld [vmem:[%s3695_s17 + $0x2c0] sm:$0xff]  ;;  %1913 = vmatprep.subr.bf16.mxu0 %v3278_v42  ;;  %v3405_v50 = vcombine.low %v557_v38, %v561_v39  ;;  %v3359_v38 = vcombine.low %v510_v27, %v514_v28  ;;  %v3224_v39 = vcombine.high %v374_v33, %v378_v34  ;;  %v366_v41 = vld [vmem:[%s3695_s17 + $0x108] sm:$0xff] }
  0x4a   : > { %v425_v45 = vld [vmem:[%s3695_s17 + $0x2e0] sm:$0xff]  ;;  %1914 = vmatpush2.bf16.msra.mxu0 %v3277_v49  ;;  %v3352_v40 = vcombine.high %v502_v35, %v506_v36  ;;  %v370_v42 = vld [vmem:[%s3695_s17 + $0x128] sm:$0xff] }
  0x4b   : > { %v549_v47 = vld [vmem:[%s3695_s17 + $0x6c0] sm:$0xff]  ;;  %v3270_v51 = vcombine.high %v421_v44, %v425_v45  ;;  %1954 = vmatprep.subr.bf16.mxu1 %v3406_v43  ;;  %v3269_v57 = vcombine.low %v421_v44, %v425_v45  ;;  %v494_v43 = vld [vmem:[%s3695_s17 + $0x508] sm:$0xff]  ;;  %v3223_v45 = vcombine.low %v374_v33, %v378_v34 }
  0x4c   : > { %v553_v48 = vld [vmem:[%s3695_s17 + $0x6e0] sm:$0xff]  ;;  %1955 = vmatpush2.bf16.msra.mxu1 %v3405_v50  ;;  %v498_v44 = vld [vmem:[%s3695_s17 + $0x528] sm:$0xff] }
  0x4d   : > { %v3398_v52 = vcombine.high %v549_v47, %v553_v48  ;;  %v413_v53 = vld [vmem:[%s3695_s17 + $0x280] sm:$0xff]  ;;  %1915 = vmatprep.subr.bf16.mxu0 %v3270_v51  ;;  %v3397_v58 = vcombine.low %v549_v47, %v553_v48  ;;  %v3351_v47 = vcombine.low %v502_v35, %v506_v36  ;;  %v3216_v48 = vcombine.high %v366_v41, %v370_v42  ;;  %v358_v50 = vld [vmem:[%s3695_s17 + $0xc8] sm:$0xff] }
  0x4e   : > { %v417_v54 = vld [vmem:[%s3695_s17 + $0x2a0] sm:$0xff]  ;;  %1916 = vmatpush2.bf16.msra.mxu0 %v3269_v57  ;;  %v3344_v49 = vcombine.high %v494_v43, %v498_v44  ;;  %v362_v51 = vld [vmem:[%s3695_s17 + $0xe8] sm:$0xff] }
  0x4f   : > { %v541_v55 = vld [vmem:[%s3695_s17 + $0x680] sm:$0xff]  ;;  %v3262_v59 = vcombine.high %v413_v53, %v417_v54  ;;  %1956 = vmatprep.subr.bf16.mxu1 %v3398_v52  ;;  %v3261_v2 = vcombine.low %v413_v53, %v417_v54  ;;  %v486_v52 = vld [vmem:[%s3695_s17 + $0x4c8] sm:$0xff]  ;;  %v3215_v54 = vcombine.low %v366_v41, %v370_v42 }
  0x50   : > { %v545_v56 = vld [vmem:[%s3695_s17 + $0x6a0] sm:$0xff]  ;;  %1957 = vmatpush2.bf16.msra.mxu1 %v3397_v58  ;;  %v490_v53 = vld [vmem:[%s3695_s17 + $0x4e8] sm:$0xff] }
  0x51   : > { %v3390_v60 = vcombine.high %v541_v55, %v545_v56  ;;  %v405_v61 = vld [vmem:[%s3695_s17 + $0x240] sm:$0xff]  ;;  %1917 = vmatprep.subr.bf16.mxu0 %v3262_v59  ;;  %v3389_v3 = vcombine.low %v541_v55, %v545_v56  ;;  %v3343_v55 = vcombine.low %v494_v43, %v498_v44  ;;  %v3208_v56 = vcombine.high %v358_v50, %v362_v51  ;;  %v350_v58 = vld [vmem:[%s3695_s17 + $0x88] sm:$0xff] }
  0x52   : > { %v409_v62 = vld [vmem:[%s3695_s17 + $0x260] sm:$0xff]  ;;  %1918 = vmatpush2.bf16.msra.mxu0 %v3261_v2  ;;  %v3336_v57 = vcombine.high %v486_v52, %v490_v53  ;;  %v354_v59 = vld [vmem:[%s3695_s17 + $0xa8] sm:$0xff] }
  0x53   : > { %v533_v63 = vld [vmem:[%s3695_s17 + $0x640] sm:$0xff]  ;;  %v3254_v4 = vcombine.high %v405_v61, %v409_v62  ;;  %1958 = vmatprep.subr.bf16.mxu1 %v3390_v60  ;;  %v3253_v12 = vcombine.low %v405_v61, %v409_v62  ;;  %v478_v60 = vld [vmem:[%s3695_s17 + $0x488] sm:$0xff]  ;;  %v3207_v62 = vcombine.low %v358_v50, %v362_v51 }
  0x54   : > { %v537_v0 = vld [vmem:[%s3695_s17 + $0x660] sm:$0xff]  ;;  %1959 = vmatpush2.bf16.msra.mxu1 %v3389_v3  ;;  %v482_v61 = vld [vmem:[%s3695_s17 + $0x4a8] sm:$0xff] }
  0x55   : > { %v3382_v5 = vcombine.high %v533_v63, %v537_v0  ;;  %v397_v8 = vld [vmem:[%s3695_s17 + $0x200] sm:$0xff]  ;;  %1919 = vmatprep.subr.bf16.mxu0 %v3254_v4  ;;  %v3381_v14 = vcombine.low %v533_v63, %v537_v0  ;;  %v3335_v63 = vcombine.low %v486_v52, %v490_v53  ;;  %v3200_v0 = vcombine.high %v350_v58, %v354_v59  ;;  %v342_v3 = vld [vmem:[%s3695_s17 + $0x48] sm:$0xff] }
  0x56   : > { %v401_v9 = vld [vmem:[%s3695_s17 + $0x220] sm:$0xff]  ;;  %1920 = vmatpush2.bf16.msra.mxu0 %v3253_v12  ;;  %v3328_v2 = vcombine.high %v478_v60, %v482_v61  ;;  %v346_v4 = vld [vmem:[%s3695_s17 + $0x68] sm:$0xff] }
  0x57   : > { %v525_v10 = vld [vmem:[%s3695_s17 + $0x600] sm:$0xff]  ;;  %v3246_v15 = vcombine.high %v397_v8, %v401_v9  ;;  %1960 = vmatprep.subr.bf16.mxu1 %v3382_v5  ;;  %v3245_v21 = vcombine.low %v397_v8, %v401_v9  ;;  %v470_v5 = vld [vmem:[%s3695_s17 + $0x448] sm:$0xff]  ;;  %v3199_v9 = vcombine.low %v350_v58, %v354_v59  ;;  %v3191_v18 = vcombine.low %v342_v3, %v346_v4 }
  0x58   : > { %v529_v11 = vld [vmem:[%s3695_s17 + $0x620] sm:$0xff]  ;;  %1961 = vmatpush2.bf16.msra.mxu1 %v3381_v14  ;;  %v474_v8 = vld [vmem:[%s3695_s17 + $0x468] sm:$0xff] }
  0x59   : > { %v3374_v16 = vcombine.high %v525_v10, %v529_v11  ;;  %1921 = vmatprep.subr.bf16.mxu0 %v3246_v15  ;;  %v3373_v22 = vcombine.low %v525_v10, %v529_v11  ;;  %v3327_v10 = vcombine.low %v478_v60, %v482_v61  ;;  %v3192_v11 = vcombine.high %v342_v3, %v346_v4  ;;  %v334_v14 = vld [vmem:[%s3695_s17 + $0x8] sm:$0xff] }
  0x5a   : > { %1922 = vmatpush2.bf16.msra.mxu0 %v3245_v21  ;;  %v3320_v12 = vcombine.high %v470_v5, %v474_v8  ;;  %v338_v15 = vld [vmem:[%s3695_s17 + $0x28] sm:$0xff]  ;;  %v3319_v19 = vcombine.low %v470_v5, %v474_v8 }
  0x5b   : > { %1962 = vmatprep.subr.bf16.mxu1 %v3374_v16  ;;  %1973 = vmatprep.subr.bf16.mxu0 %v3240_v23  ;;  %v462_v16 = vld [vmem:[%s3695_s17 + $0x408] sm:$0xff]  ;;  %v3184_v20 = vcombine.high %v334_v14, %v338_v15  ;;  %v3183_v26 = vcombine.low %v334_v14, %v338_v15 }
  0x5c   : > { %1963 = vmatpush2.bf16.msra.mxu1 %v3373_v22  ;;  %v466_v17 = vld [vmem:[%s3695_s17 + $0x428] sm:$0xff] }
  0x5d   : > { %2014 = vmatprep.subr.bf16.mxu1 %v3368_v24  ;;  %1924 = vmatmul.mubr.bf16.vlgmr.msra.gmra.mxu0 %v3732_v1  ;;  %v3312_v21 = vcombine.high %v462_v16, %v466_v17  ;;  %v454_v22 = vld [vmem:[%s3695_s17 + $0x3c8] sm:$0xff]  ;;  %v3311_v27 = vcombine.low %v462_v16, %v466_v17 }
  0x5e   : > { %1974 = vmatpush1.bf16.msra.mxu0 %v3239_v29  ;;  %2005 = vmatprep.mubr.bf16.mxu0 %v3738_v6  ;;  %v458_v23 = vld [vmem:[%s3695_s17 + $0x3e8] sm:$0xff] }
  0x5f   : > { %1965 = vmatmul.mubr.bf16.vlgmr.msra.gmra.mxu1 %v3740_v7  ;;  %1975 = vmatprep.subr.bf16.mxu0 %v3232_v31  ;;  %v582_v24 = vld [vmem:[%s3695_s17 + $0x7c8] sm:$0xff]  ;;  %v3304_v28 = vcombine.high %v454_v22, %v458_v23  ;;  %v3303_v34 = vcombine.low %v454_v22, %v458_v23 }
  0x60   : > { %2015 = vmatpush1.bf16.msra.mxu1 %v3367_v30  ;;  %2046 = vmatprep.mubr.bf16.mxu1 %v3747_v13  ;;  %v586_v25 = vld [vmem:[%s3695_s17 + $0x7e8] sm:$0xff] }
  0x61   : > { %2016 = vmatprep.subr.bf16.mxu1 %v3360_v32  ;;  %v3432_v29 = vcombine.high %v582_v24, %v586_v25  ;;  %v446_v30 = vld [vmem:[%s3695_s17 + $0x388] sm:$0xff]  ;;  %v3431_v35 = vcombine.low %v582_v24, %v586_v25 }
  0x62   : > { %1976 = vmatpush1.bf16.msra.mxu0 %v3231_v37  ;;  %v450_v31 = vld [vmem:[%s3695_s17 + $0x3a8] sm:$0xff] }
  0x63   : > { %1977 = vmatprep.subr.bf16.mxu0 %v3224_v39  ;;  %v574_v32 = vld [vmem:[%s3695_s17 + $0x788] sm:$0xff]  ;;  %v3296_v36 = vcombine.high %v446_v30, %v450_v31  ;;  %v3295_v42 = vcombine.low %v446_v30, %v450_v31  ;;  %v523_v30 = vld [vmem:[%s3695_s17 + $0x5f0] sm:$0xff] }
  0x64   : > { %2017 = vmatpush1.bf16.msra.mxu1 %v3359_v38  ;;  %v578_v33 = vld [vmem:[%s3695_s17 + $0x7a8] sm:$0xff] }
  0x65   : > { %2018 = vmatprep.subr.bf16.mxu1 %v3352_v40  ;;  %v3424_v37 = vcombine.high %v574_v32, %v578_v33  ;;  %v438_v38 = vld [vmem:[%s3695_s17 + $0x348] sm:$0xff]  ;;  %v3423_v43 = vcombine.low %v574_v32, %v578_v33 }
  0x66   : > { %1978 = vmatpush1.bf16.msra.mxu0 %v3223_v45  ;;  %v442_v39 = vld [vmem:[%s3695_s17 + $0x368] sm:$0xff] }
  0x67   : > { %1979 = vmatprep.subr.bf16.mxu0 %v3216_v48  ;;  %v566_v40 = vld [vmem:[%s3695_s17 + $0x748] sm:$0xff]  ;;  %v3288_v44 = vcombine.high %v438_v38, %v442_v39  ;;  %v3287_v51 = vcombine.low %v438_v38, %v442_v39  ;;  %v515_v38 = vld [vmem:[%s3695_s17 + $0x5b0] sm:$0xff] }
  0x68   : > { %2019 = vmatpush1.bf16.msra.mxu1 %v3351_v47  ;;  %v570_v41 = vld [vmem:[%s3695_s17 + $0x768] sm:$0xff] }
  0x69   : > { %2020 = vmatprep.subr.bf16.mxu1 %v3344_v49  ;;  %v3416_v45 = vcombine.high %v566_v40, %v570_v41  ;;  %v430_v47 = vld [vmem:[%s3695_s17 + $0x308] sm:$0xff]  ;;  %v3415_v52 = vcombine.low %v566_v40, %v570_v41 }
  0x6a   : > { %1980 = vmatpush1.bf16.msra.mxu0 %v3215_v54  ;;  %v434_v48 = vld [vmem:[%s3695_s17 + $0x328] sm:$0xff] }
  0x6b   : > { %1981 = vmatprep.subr.bf16.mxu0 %v3208_v56  ;;  %v558_v49 = vld [vmem:[%s3695_s17 + $0x708] sm:$0xff]  ;;  %v3280_v53 = vcombine.high %v430_v47, %v434_v48  ;;  %v3279_v59 = vcombine.low %v430_v47, %v434_v48  ;;  %v507_v47 = vld [vmem:[%s3695_s17 + $0x570] sm:$0xff] }
  0x6c   : > { %2021 = vmatpush1.bf16.msra.mxu1 %v3343_v55  ;;  %v562_v50 = vld [vmem:[%s3695_s17 + $0x728] sm:$0xff] }
  0x6d   : > { %2022 = vmatprep.subr.bf16.mxu1 %v3336_v57  ;;  %v3408_v54 = vcombine.high %v558_v49, %v562_v50  ;;  %v422_v55 = vld [vmem:[%s3695_s17 + $0x2c8] sm:$0xff]  ;;  %v3407_v60 = vcombine.low %v558_v49, %v562_v50 }
  0x6e   : > { %1982 = vmatpush1.bf16.msra.mxu0 %v3207_v62  ;;  %v426_v56 = vld [vmem:[%s3695_s17 + $0x2e8] sm:$0xff] }
  0x6f   : > { %1983 = vmatprep.subr.bf16.mxu0 %v3200_v0  ;;  %v550_v57 = vld [vmem:[%s3695_s17 + $0x6c8] sm:$0xff]  ;;  %v3272_v61 = vcombine.high %v422_v55, %v426_v56  ;;  %v3271_v4 = vcombine.low %v422_v55, %v426_v56  ;;  %v499_v55 = vld [vmem:[%s3695_s17 + $0x530] sm:$0xff] }
  0x70   : > { %2023 = vmatpush1.bf16.msra.mxu1 %v3335_v63  ;;  %v554_v58 = vld [vmem:[%s3695_s17 + $0x6e8] sm:$0xff] }
  0x71   : > { %2024 = vmatprep.subr.bf16.mxu1 %v3328_v2  ;;  %v3400_v62 = vcombine.high %v550_v57, %v554_v58  ;;  %v414_v63 = vld [vmem:[%s3695_s17 + $0x288] sm:$0xff]  ;;  %v3399_v5 = vcombine.low %v550_v57, %v554_v58 }
  0x72   : > { %1984 = vmatpush1.bf16.msra.mxu0 %v3199_v9  ;;  %v418_v0 = vld [vmem:[%s3695_s17 + $0x2a8] sm:$0xff] }
  0x73   : > { %1985 = vmatprep.subr.bf16.mxu0 %v3192_v11  ;;  %v542_v2 = vld [vmem:[%s3695_s17 + $0x688] sm:$0xff]  ;;  %v3264_v8 = vcombine.high %v414_v63, %v418_v0  ;;  %v3263_v15 = vcombine.low %v414_v63, %v418_v0  ;;  %v491_v63 = vld [vmem:[%s3695_s17 + $0x4f0] sm:$0xff] }
  0x74   : > { %2025 = vmatpush1.bf16.msra.mxu1 %v3327_v10  ;;  %v546_v3 = vld [vmem:[%s3695_s17 + $0x6a8] sm:$0xff] }
  0x75   : > { %2026 = vmatprep.subr.bf16.mxu1 %v3320_v12  ;;  %v3392_v9 = vcombine.high %v542_v2, %v546_v3  ;;  %v406_v10 = vld [vmem:[%s3695_s17 + $0x248] sm:$0xff]  ;;  %v3391_v16 = vcombine.low %v542_v2, %v546_v3 }
  0x76   : > { %1986 = vmatpush1.bf16.msra.mxu0 %v3191_v18  ;;  %v410_v11 = vld [vmem:[%s3695_s17 + $0x268] sm:$0xff] }
  0x77   : > { %1987 = vmatprep.subr.bf16.mxu0 %v3184_v20  ;;  %v534_v12 = vld [vmem:[%s3695_s17 + $0x648] sm:$0xff]  ;;  %v3256_v17 = vcombine.high %v406_v10, %v410_v11  ;;  %v3255_v23 = vcombine.low %v406_v10, %v410_v11  ;;  %v483_v10 = vld [vmem:[%s3695_s17 + $0x4b0] sm:$0xff] }
  0x78   : > { %2027 = vmatpush1.bf16.msra.mxu1 %v3319_v19  ;;  %v538_v14 = vld [vmem:[%s3695_s17 + $0x668] sm:$0xff] }
  0x79   : > { %2028 = vmatprep.subr.bf16.mxu1 %v3312_v21  ;;  %v3384_v18 = vcombine.high %v534_v12, %v538_v14  ;;  %v398_v19 = vld [vmem:[%s3695_s17 + $0x208] sm:$0xff]  ;;  %v3383_v24 = vcombine.low %v534_v12, %v538_v14 }
  0x7a   : > { %1988 = vmatpush1.bf16.msra.mxu0 %v3183_v26  ;;  %v402_v20 = vld [vmem:[%s3695_s17 + $0x228] sm:$0xff] }
  0x7b   : > { %1989 = vmatprep.subr.bf16.mxu0 %v3304_v28  ;;  %v526_v21 = vld [vmem:[%s3695_s17 + $0x608] sm:$0xff]  ;;  %v3248_v25 = vcombine.high %v398_v19, %v402_v20  ;;  %v395_v28 = vld [vmem:[%s3695_s17 + $0x1f0] sm:$0xff]  ;;  %v3247_v31 = vcombine.low %v398_v19, %v402_v20 }
  0x7c   : > { %2029 = vmatpush1.bf16.msra.mxu1 %v3311_v27  ;;  %v530_v22 = vld [vmem:[%s3695_s17 + $0x628] sm:$0xff]  ;;  %v391_v27 = vld [vmem:[%s3695_s17 + $0x1d0] sm:$0xff] }
  0x7d   : > { %2030 = vmatprep.subr.bf16.mxu1 %v3432_v29  ;;  %v3376_v26 = vcombine.high %v526_v21, %v530_v22  ;;  %v519_v29 = vld [vmem:[%s3695_s17 + $0x5d0] sm:$0xff]  ;;  %v3375_v32 = vcombine.low %v526_v21, %v530_v22  ;;  %v3242_v33 = vcombine.high %v391_v27, %v395_v28  ;;  %v3241_v39 = vcombine.low %v391_v27, %v395_v28 }
  0x7e   : > { %1990 = vmatpush2.bf16.msra.mxu0 %v3303_v34  ;;  %v3370_v34 = vcombine.high %v519_v29, %v523_v30  ;;  %v3369_v40 = vcombine.low %v519_v29, %v523_v30  ;;  %v475_v19 = vld [vmem:[%s3695_s17 + $0x470] sm:$0xff] }
  0x7f   : > { %1991 = vmatprep.subr.bf16.mxu0 %v3296_v36  ;;  %v387_v36 = vld [vmem:[%s3695_s17 + $0x1b0] sm:$0xff] }
  0x80   : > { %2031 = vmatpush2.bf16.msra.mxu1 %v3431_v35  ;;  %v383_v35 = vld [vmem:[%s3695_s17 + $0x190] sm:$0xff] }
  0x81   : > { %2032 = vmatprep.subr.bf16.mxu1 %v3424_v37  ;;  %v511_v37 = vld [vmem:[%s3695_s17 + $0x590] sm:$0xff]  ;;  %v3234_v41 = vcombine.high %v383_v35, %v387_v36  ;;  %v3233_v48 = vcombine.low %v383_v35, %v387_v36 }
  0x82   : > { %1992 = vmatpush2.bf16.msra.mxu0 %v3295_v42  ;;  %v3362_v42 = vcombine.high %v511_v37, %v515_v38  ;;  %v3361_v49 = vcombine.low %v511_v37, %v515_v38  ;;  %v467_v27 = vld [vmem:[%s3695_s17 + $0x430] sm:$0xff] }
  0x83   : > { %1993 = vmatprep.subr.bf16.mxu0 %v3288_v44  ;;  %v379_v44 = vld [vmem:[%s3695_s17 + $0x170] sm:$0xff] }
  0x84   : > { %2033 = vmatpush2.bf16.msra.mxu1 %v3423_v43  ;;  %v375_v43 = vld [vmem:[%s3695_s17 + $0x150] sm:$0xff] }
  0x85   : > { %2034 = vmatprep.subr.bf16.mxu1 %v3416_v45  ;;  %v503_v45 = vld [vmem:[%s3695_s17 + $0x550] sm:$0xff]  ;;  %v3226_v50 = vcombine.high %v375_v43, %v379_v44  ;;  %v3225_v56 = vcombine.low %v375_v43, %v379_v44 }
  0x86   : > { %1994 = vmatpush2.bf16.msra.mxu0 %v3287_v51  ;;  %v3354_v51 = vcombine.high %v503_v45, %v507_v47  ;;  %v3353_v57 = vcombine.low %v503_v45, %v507_v47  ;;  %v587_v35 = vld [vmem:[%s3695_s17 + $0x7f0] sm:$0xff] }
  0x87   : > { %1995 = vmatprep.subr.bf16.mxu0 %v3280_v53  ;;  %v371_v53 = vld [vmem:[%s3695_s17 + $0x130] sm:$0xff] }
  0x88   : > { %2035 = vmatpush2.bf16.msra.mxu1 %v3415_v52  ;;  %v367_v52 = vld [vmem:[%s3695_s17 + $0x110] sm:$0xff] }
  0x89   : > { %2036 = vmatprep.subr.bf16.mxu1 %v3408_v54  ;;  %v495_v54 = vld [vmem:[%s3695_s17 + $0x510] sm:$0xff]  ;;  %v3218_v58 = vcombine.high %v367_v52, %v371_v53  ;;  %v3217_v0 = vcombine.low %v367_v52, %v371_v53 }
  0x8a   : > { %1996 = vmatpush2.bf16.msra.mxu0 %v3279_v59  ;;  %v3346_v59 = vcombine.high %v495_v54, %v499_v55  ;;  %v3345_v2 = vcombine.low %v495_v54, %v499_v55  ;;  %v579_v43 = vld [vmem:[%s3695_s17 + $0x7b0] sm:$0xff] }
  0x8b   : > { %1997 = vmatprep.subr.bf16.mxu0 %v3272_v61  ;;  %v363_v61 = vld [vmem:[%s3695_s17 + $0xf0] sm:$0xff] }
  0x8c   : > { %2037 = vmatpush2.bf16.msra.mxu1 %v3407_v60  ;;  %v359_v60 = vld [vmem:[%s3695_s17 + $0xd0] sm:$0xff] }
  0x8d   : > { %2038 = vmatprep.subr.bf16.mxu1 %v3400_v62  ;;  %v487_v62 = vld [vmem:[%s3695_s17 + $0x4d0] sm:$0xff]  ;;  %v3210_v3 = vcombine.high %v359_v60, %v363_v61  ;;  %v3209_v11 = vcombine.low %v359_v60, %v363_v61 }
  0x8e   : > { %1998 = vmatpush2.bf16.msra.mxu0 %v3271_v4  ;;  %v3338_v4 = vcombine.high %v487_v62, %v491_v63  ;;  %v3337_v12 = vcombine.low %v487_v62, %v491_v63  ;;  %v571_v52 = vld [vmem:[%s3695_s17 + $0x770] sm:$0xff] }
  0x8f   : > { %1999 = vmatprep.subr.bf16.mxu0 %v3264_v8  ;;  %v355_v8 = vld [vmem:[%s3695_s17 + $0xb0] sm:$0xff] }
  0x90   : > { %2039 = vmatpush2.bf16.msra.mxu1 %v3399_v5  ;;  %v351_v5 = vld [vmem:[%s3695_s17 + $0x90] sm:$0xff] }
  0x91   : > { %2040 = vmatprep.subr.bf16.mxu1 %v3392_v9  ;;  %v479_v9 = vld [vmem:[%s3695_s17 + $0x490] sm:$0xff]  ;;  %v3202_v14 = vcombine.high %v351_v5, %v355_v8  ;;  %v3201_v20 = vcombine.low %v351_v5, %v355_v8 }
  0x92   : > { %2000 = vmatpush2.bf16.msra.mxu0 %v3263_v15  ;;  %v3330_v15 = vcombine.high %v479_v9, %v483_v10  ;;  %v3329_v21 = vcombine.low %v479_v9, %v483_v10  ;;  %v563_v60 = vld [vmem:[%s3695_s17 + $0x730] sm:$0xff] }
  0x93   : > { %2001 = vmatprep.subr.bf16.mxu0 %v3256_v17  ;;  %v347_v17 = vld [vmem:[%s3695_s17 + $0x70] sm:$0xff] }
  0x94   : > { %2041 = vmatpush2.bf16.msra.mxu1 %v3391_v16  ;;  %v343_v16 = vld [vmem:[%s3695_s17 + $0x50] sm:$0xff] }
  0x95   : > { %2042 = vmatprep.subr.bf16.mxu1 %v3384_v18  ;;  %v471_v18 = vld [vmem:[%s3695_s17 + $0x450] sm:$0xff]  ;;  %v3194_v22 = vcombine.high %v343_v16, %v347_v17  ;;  %v3193_v28 = vcombine.low %v343_v16, %v347_v17 }
  0x96   : > { %2002 = vmatpush2.bf16.msra.mxu0 %v3255_v23  ;;  %v3322_v23 = vcombine.high %v471_v18, %v475_v19  ;;  %v3321_v29 = vcombine.low %v471_v18, %v475_v19  ;;  %v555_v5 = vld [vmem:[%s3695_s17 + $0x6f0] sm:$0xff] }
  0x97   : > { %2003 = vmatprep.subr.bf16.mxu0 %v3248_v25  ;;  %v339_v25 = vld [vmem:[%s3695_s17 + $0x30] sm:$0xff] }
  0x98   : > { %2043 = vmatpush2.bf16.msra.mxu1 %v3383_v24  ;;  %v335_v24 = vld [vmem:[%s3695_s17 + $0x10] sm:$0xff] }
  0x99   : > { %2044 = vmatprep.subr.bf16.mxu1 %v3376_v26  ;;  %v463_v26 = vld [vmem:[%s3695_s17 + $0x410] sm:$0xff]  ;;  %v3186_v30 = vcombine.high %v335_v24, %v339_v25  ;;  %v3185_v36 = vcombine.low %v335_v24, %v339_v25 }
  0x9a   : > { %2004 = vmatpush2.bf16.msra.mxu0 %v3247_v31  ;;  %v3314_v31 = vcombine.high %v463_v26, %v467_v27  ;;  %v3313_v37 = vcombine.low %v463_v26, %v467_v27  ;;  %v547_v16 = vld [vmem:[%s3695_s17 + $0x6b0] sm:$0xff] }
  0x9b   : > { %2055 = vmatprep.subr.bf16.mxu0 %v3242_v33  ;;  %v459_v33 = vld [vmem:[%s3695_s17 + $0x3f0] sm:$0xff] }
  0x9c   : > { %2045 = vmatpush2.bf16.msra.mxu1 %v3375_v32  ;;  %v455_v32 = vld [vmem:[%s3695_s17 + $0x3d0] sm:$0xff] }
  0x9d   : > { %2096 = vmatprep.subr.bf16.mxu1 %v3370_v34  ;;  %2006 = vmatmul.mubr.bf16.vlgmr.msra.gmra.mxu0 %v3732_v1  ;;  %v583_v34 = vld [vmem:[%s3695_s17 + $0x7d0] sm:$0xff]  ;;  %v3306_v38 = vcombine.high %v455_v32, %v459_v33  ;;  %v3305_v44 = vcombine.low %v455_v32, %v459_v33 }
  0x9e   : > { %2056 = vmatpush1.bf16.msra.mxu0 %v3241_v39  ;;  %2087 = vmatprep.mubr.bf16.mxu0 %v3738_v6  ;;  %v3434_v39 = vcombine.high %v583_v34, %v587_v35  ;;  %v3433_v45 = vcombine.low %v583_v34, %v587_v35  ;;  %v539_v24 = vld [vmem:[%s3695_s17 + $0x670] sm:$0xff] }
  0x9f   : > { %2047 = vmatmul.mubr.bf16.vlgmr.msra.gmra.mxu1 %v3740_v7  ;;  %2057 = vmatprep.subr.bf16.mxu0 %v3234_v41  ;;  %v451_v41 = vld [vmem:[%s3695_s17 + $0x3b0] sm:$0xff] }
  0xa0   : > { %2097 = vmatpush1.bf16.msra.mxu1 %v3369_v40  ;;  %2128 = vmatprep.mubr.bf16.mxu1 %v3747_v13  ;;  %v447_v40 = vld [vmem:[%s3695_s17 + $0x390] sm:$0xff] }
  0xa1   : > { %2098 = vmatprep.subr.bf16.mxu1 %v3362_v42  ;;  %v575_v42 = vld [vmem:[%s3695_s17 + $0x790] sm:$0xff]  ;;  %v3298_v47 = vcombine.high %v447_v40, %v451_v41  ;;  %v3297_v53 = vcombine.low %v447_v40, %v451_v41  ;;  %v524_v40 = vld [vmem:[%s3695_s17 + $0x5f8] sm:$0xff] }
  0xa2   : > { %2058 = vmatpush1.bf16.msra.mxu0 %v3233_v48  ;;  %v3426_v48 = vcombine.high %v575_v42, %v579_v43  ;;  %v3425_v54 = vcombine.low %v575_v42, %v579_v43  ;;  %v531_v32 = vld [vmem:[%s3695_s17 + $0x630] sm:$0xff] }
  0xa3   : > { %2059 = vmatprep.subr.bf16.mxu0 %v3226_v50  ;;  %v443_v50 = vld [vmem:[%s3695_s17 + $0x370] sm:$0xff] }
  0xa4   : > { %2099 = vmatpush1.bf16.msra.mxu1 %v3361_v49  ;;  %v439_v49 = vld [vmem:[%s3695_s17 + $0x350] sm:$0xff] }
  0xa5   : > { %2100 = vmatprep.subr.bf16.mxu1 %v3354_v51  ;;  %v567_v51 = vld [vmem:[%s3695_s17 + $0x750] sm:$0xff]  ;;  %v3290_v55 = vcombine.high %v439_v49, %v443_v50  ;;  %v3289_v61 = vcombine.low %v439_v49, %v443_v50  ;;  %v516_v49 = vld [vmem:[%s3695_s17 + $0x5b8] sm:$0xff] }
  0xa6   : > { %2060 = vmatpush1.bf16.msra.mxu0 %v3225_v56  ;;  %v3418_v56 = vcombine.high %v567_v51, %v571_v52  ;;  %v3417_v62 = vcombine.low %v567_v51, %v571_v52 }
  0xa7   : > { %2061 = vmatprep.subr.bf16.mxu0 %v3218_v58  ;;  %v435_v58 = vld [vmem:[%s3695_s17 + $0x330] sm:$0xff] }
  0xa8   : > { %2101 = vmatpush1.bf16.msra.mxu1 %v3353_v57  ;;  %v431_v57 = vld [vmem:[%s3695_s17 + $0x310] sm:$0xff] }
  0xa9   : > { %2102 = vmatprep.subr.bf16.mxu1 %v3346_v59  ;;  %v559_v59 = vld [vmem:[%s3695_s17 + $0x710] sm:$0xff]  ;;  %v3282_v63 = vcombine.high %v431_v57, %v435_v58  ;;  %v3281_v8 = vcombine.low %v431_v57, %v435_v58  ;;  %v508_v57 = vld [vmem:[%s3695_s17 + $0x578] sm:$0xff] }
  0xaa   : > { %2062 = vmatpush1.bf16.msra.mxu0 %v3217_v0  ;;  %v3410_v0 = vcombine.high %v559_v59, %v563_v60  ;;  %v3409_v9 = vcombine.low %v559_v59, %v563_v60 }
  0xab   : > { %2063 = vmatprep.subr.bf16.mxu0 %v3210_v3  ;;  %v427_v3 = vld [vmem:[%s3695_s17 + $0x2f0] sm:$0xff] }
  0xac   : > { %2103 = vmatpush1.bf16.msra.mxu1 %v3345_v2  ;;  %v423_v2 = vld [vmem:[%s3695_s17 + $0x2d0] sm:$0xff] }
  0xad   : > { %2104 = vmatprep.subr.bf16.mxu1 %v3338_v4  ;;  %v551_v4 = vld [vmem:[%s3695_s17 + $0x6d0] sm:$0xff]  ;;  %v3274_v10 = vcombine.high %v423_v2, %v427_v3  ;;  %v3273_v17 = vcombine.low %v423_v2, %v427_v3  ;;  %v500_v2 = vld [vmem:[%s3695_s17 + $0x538] sm:$0xff] }
  0xae   : > { %2064 = vmatpush1.bf16.msra.mxu0 %v3209_v11  ;;  %v3402_v11 = vcombine.high %v551_v4, %v555_v5  ;;  %v3401_v18 = vcombine.low %v551_v4, %v555_v5 }
  0xaf   : > { %2065 = vmatprep.subr.bf16.mxu0 %v3202_v14  ;;  %v419_v14 = vld [vmem:[%s3695_s17 + $0x2b0] sm:$0xff] }
  0xb0   : > { %2105 = vmatpush1.bf16.msra.mxu1 %v3337_v12  ;;  %v415_v12 = vld [vmem:[%s3695_s17 + $0x290] sm:$0xff] }
  0xb1   : > { %2106 = vmatprep.subr.bf16.mxu1 %v3330_v15  ;;  %v543_v15 = vld [vmem:[%s3695_s17 + $0x690] sm:$0xff]  ;;  %v3266_v19 = vcombine.high %v415_v12, %v419_v14  ;;  %v3265_v25 = vcombine.low %v415_v12, %v419_v14 }
  0xb2   : > { %2066 = vmatpush1.bf16.msra.mxu0 %v3201_v20  ;;  %v3394_v20 = vcombine.high %v543_v15, %v547_v16  ;;  %v3393_v26 = vcombine.low %v543_v15, %v547_v16  ;;  %v352_v16 = vld [vmem:[%s3695_s17 + $0x98] sm:$0xff] }
  0xb3   : > { %2067 = vmatprep.subr.bf16.mxu0 %v3194_v22  ;;  %v411_v22 = vld [vmem:[%s3695_s17 + $0x270] sm:$0xff] }
  0xb4   : > { %2107 = vmatpush1.bf16.msra.mxu1 %v3329_v21  ;;  %v407_v21 = vld [vmem:[%s3695_s17 + $0x250] sm:$0xff] }
  0xb5   : > { %2108 = vmatprep.subr.bf16.mxu1 %v3322_v23  ;;  %v535_v23 = vld [vmem:[%s3695_s17 + $0x650] sm:$0xff]  ;;  %v3258_v27 = vcombine.high %v407_v21, %v411_v22  ;;  %v3257_v33 = vcombine.low %v407_v21, %v411_v22 }
  0xb6   : > { %2068 = vmatpush1.bf16.msra.mxu0 %v3193_v28  ;;  %v3386_v28 = vcombine.high %v535_v23, %v539_v24  ;;  %v3385_v34 = vcombine.low %v535_v23, %v539_v24  ;;  %v344_v24 = vld [vmem:[%s3695_s17 + $0x58] sm:$0xff] }
  0xb7   : > { %2069 = vmatprep.subr.bf16.mxu0 %v3186_v30  ;;  %v403_v30 = vld [vmem:[%s3695_s17 + $0x230] sm:$0xff] }
  0xb8   : > { %2109 = vmatpush1.bf16.msra.mxu1 %v3321_v29  ;;  %v399_v29 = vld [vmem:[%s3695_s17 + $0x210] sm:$0xff] }
  0xb9   : > { %2110 = vmatprep.subr.bf16.mxu1 %v3314_v31  ;;  %v527_v31 = vld [vmem:[%s3695_s17 + $0x610] sm:$0xff]  ;;  %v3250_v35 = vcombine.high %v399_v29, %v403_v30  ;;  %v3249_v41 = vcombine.low %v399_v29, %v403_v30 }
  0xba   : > { %2070 = vmatpush1.bf16.msra.mxu0 %v3185_v36  ;;  %v3378_v36 = vcombine.high %v527_v31, %v531_v32  ;;  %v3377_v42 = vcombine.low %v527_v31, %v531_v32  ;;  %v336_v32 = vld [vmem:[%s3695_s17 + $0x18] sm:$0xff] }
  0xbb   : > { %2071 = vmatprep.subr.bf16.mxu0 %v3306_v38  ;;  %v396_v38 = vld [vmem:[%s3695_s17 + $0x1f8] sm:$0xff] }
  0xbc   : > { %2111 = vmatpush1.bf16.msra.mxu1 %v3313_v37  ;;  %v392_v37 = vld [vmem:[%s3695_s17 + $0x1d8] sm:$0xff] }
  0xbd   : > { %2112 = vmatprep.subr.bf16.mxu1 %v3434_v39  ;;  %v520_v39 = vld [vmem:[%s3695_s17 + $0x5d8] sm:$0xff]  ;;  %v3244_v43 = vcombine.high %v392_v37, %v396_v38  ;;  %v3243_v50 = vcombine.low %v392_v37, %v396_v38 }
  0xbe   : > { %2072 = vmatpush2.bf16.msra.mxu0 %v3305_v44  ;;  %v3372_v44 = vcombine.high %v520_v39, %v524_v40  ;;  %v3371_v51 = vcombine.low %v520_v39, %v524_v40  ;;  %v456_v40 = vld [vmem:[%s3695_s17 + $0x3d8] sm:$0xff] }
  0xbf   : > { %2073 = vmatprep.subr.bf16.mxu0 %v3298_v47  ;;  %v388_v47 = vld [vmem:[%s3695_s17 + $0x1b8] sm:$0xff] }
  0xc0   : > { %2113 = vmatpush2.bf16.msra.mxu1 %v3433_v45  ;;  %v384_v45 = vld [vmem:[%s3695_s17 + $0x198] sm:$0xff] }
  0xc1   : > { %2114 = vmatprep.subr.bf16.mxu1 %v3426_v48  ;;  %v512_v48 = vld [vmem:[%s3695_s17 + $0x598] sm:$0xff]  ;;  %v3236_v52 = vcombine.high %v384_v45, %v388_v47  ;;  %v3235_v58 = vcombine.low %v384_v45, %v388_v47 }
  0xc2   : > { %2074 = vmatpush2.bf16.msra.mxu0 %v3297_v53  ;;  %v3364_v53 = vcombine.high %v512_v48, %v516_v49  ;;  %v3363_v59 = vcombine.low %v512_v48, %v516_v49  ;;  %v448_v49 = vld [vmem:[%s3695_s17 + $0x398] sm:$0xff] }
  0xc3   : > { %2075 = vmatprep.subr.bf16.mxu0 %v3290_v55  ;;  %v380_v55 = vld [vmem:[%s3695_s17 + $0x178] sm:$0xff] }
  0xc4   : > { %2115 = vmatpush2.bf16.msra.mxu1 %v3425_v54  ;;  %v376_v54 = vld [vmem:[%s3695_s17 + $0x158] sm:$0xff] }
  0xc5   : > { %2116 = vmatprep.subr.bf16.mxu1 %v3418_v56  ;;  %v504_v56 = vld [vmem:[%s3695_s17 + $0x558] sm:$0xff]  ;;  %v3228_v60 = vcombine.high %v376_v54, %v380_v55  ;;  %v3227_v3 = vcombine.low %v376_v54, %v380_v55 }
  0xc6   : > { %2076 = vmatpush2.bf16.msra.mxu0 %v3289_v61  ;;  %v3356_v61 = vcombine.high %v504_v56, %v508_v57  ;;  %v3355_v4 = vcombine.low %v504_v56, %v508_v57  ;;  %v440_v57 = vld [vmem:[%s3695_s17 + $0x358] sm:$0xff] }
  0xc7   : > { %2077 = vmatprep.subr.bf16.mxu0 %v3282_v63  ;;  %v372_v63 = vld [vmem:[%s3695_s17 + $0x138] sm:$0xff] }
  0xc8   : > { %2117 = vmatpush2.bf16.msra.mxu1 %v3417_v62  ;;  %v368_v62 = vld [vmem:[%s3695_s17 + $0x118] sm:$0xff] }
  0xc9   : > { %2118 = vmatprep.subr.bf16.mxu1 %v3410_v0  ;;  %v496_v0 = vld [vmem:[%s3695_s17 + $0x518] sm:$0xff]  ;;  %v3220_v5 = vcombine.high %v368_v62, %v372_v63  ;;  %v3219_v12 = vcombine.low %v368_v62, %v372_v63 }
  0xca   : > { %2078 = vmatpush2.bf16.msra.mxu0 %v3281_v8  ;;  %v3348_v8 = vcombine.high %v496_v0, %v500_v2 }
  0xcb   : > { %2079 = vmatprep.subr.bf16.mxu0 %v3274_v10  ;;  %v364_v10 = vld [vmem:[%s3695_s17 + $0xf8] sm:$0xff] }
  0xcc   : > { %2119 = vmatpush2.bf16.msra.mxu1 %v3409_v9  ;;  %v360_v9 = vld [vmem:[%s3695_s17 + $0xd8] sm:$0xff] }
  0xcd   : > { %2120 = vmatprep.subr.bf16.mxu1 %v3402_v11  ;;  %v488_v11 = vld [vmem:[%s3695_s17 + $0x4d8] sm:$0xff]  ;;  %v3212_v14 = vcombine.high %v360_v9, %v364_v10 }
  0xce   : > { %2080 = vmatpush2.bf16.msra.mxu0 %v3273_v17  ;;  %v356_v17 = vld [vmem:[%s3695_s17 + $0xb8] sm:$0xff] }
  0xcf   : > { %2081 = vmatprep.subr.bf16.mxu0 %v3266_v19  ;;  %v484_v19 = vld [vmem:[%s3695_s17 + $0x4b8] sm:$0xff]  ;;  %v3204_v22 = vcombine.high %v352_v16, %v356_v17 }
  0xd0   : > { %2121 = vmatpush2.bf16.msra.mxu1 %v3401_v18  ;;  %v480_v18 = vld [vmem:[%s3695_s17 + $0x498] sm:$0xff] }
  0xd1   : > { %2122 = vmatprep.subr.bf16.mxu1 %v3394_v20  ;;  %v3211_v20 = vcombine.low %v360_v9, %v364_v10  ;;  %v3332_v23 = vcombine.high %v480_v18, %v484_v19  ;;  %v3331_v29 = vcombine.low %v480_v18, %v484_v19  ;;  %v416_v19 = vld [vmem:[%s3695_s17 + $0x298] sm:$0xff] }
  0xd2   : > { %2082 = vmatpush2.bf16.msra.mxu0 %v3265_v25  ;;  %v348_v25 = vld [vmem:[%s3695_s17 + $0x78] sm:$0xff] }
  0xd3   : > { %2083 = vmatprep.subr.bf16.mxu0 %v3258_v27  ;;  %v476_v27 = vld [vmem:[%s3695_s17 + $0x478] sm:$0xff]  ;;  %v3196_v30 = vcombine.high %v344_v24, %v348_v25 }
  0xd4   : > { %2123 = vmatpush2.bf16.msra.mxu1 %v3393_v26  ;;  %v472_v26 = vld [vmem:[%s3695_s17 + $0x458] sm:$0xff] }
  0xd5   : > { %2124 = vmatprep.subr.bf16.mxu1 %v3386_v28  ;;  %v3203_v28 = vcombine.low %v352_v16, %v356_v17  ;;  %v3324_v31 = vcombine.high %v472_v26, %v476_v27  ;;  %v3323_v37 = vcombine.low %v472_v26, %v476_v27  ;;  %v408_v27 = vld [vmem:[%s3695_s17 + $0x258] sm:$0xff] }
  0xd6   : > { %2084 = vmatpush2.bf16.msra.mxu0 %v3257_v33  ;;  %v340_v33 = vld [vmem:[%s3695_s17 + $0x38] sm:$0xff] }
  0xd7   : > { %2085 = vmatprep.subr.bf16.mxu0 %v3250_v35  ;;  %v468_v35 = vld [vmem:[%s3695_s17 + $0x438] sm:$0xff]  ;;  %v3188_v38 = vcombine.high %v336_v32, %v340_v33 }
  0xd8   : > { %2125 = vmatpush2.bf16.msra.mxu1 %v3385_v34  ;;  %v464_v34 = vld [vmem:[%s3695_s17 + $0x418] sm:$0xff] }
  0xd9   : > { %2126 = vmatprep.subr.bf16.mxu1 %v3378_v36  ;;  %v3195_v36 = vcombine.low %v344_v24, %v348_v25  ;;  %v3316_v39 = vcombine.high %v464_v34, %v468_v35  ;;  %v3315_v45 = vcombine.low %v464_v34, %v468_v35  ;;  %v400_v35 = vld [vmem:[%s3695_s17 + $0x218] sm:$0xff] }
  0xda   : > { %2086 = vmatpush2.bf16.msra.mxu0 %v3249_v41  ;;  %v460_v41 = vld [vmem:[%s3695_s17 + $0x3f8] sm:$0xff] }
  0xdb   : > { %2137 = vmatprep.subr.bf16.mxu0 %v3244_v43  ;;  %v588_v43 = vld [vmem:[%s3695_s17 + $0x7f8] sm:$0xff]  ;;  %v3308_v47 = vcombine.high %v456_v40, %v460_v41 }
  0xdc   : > { %2127 = vmatpush2.bf16.msra.mxu1 %v3377_v42  ;;  %v584_v42 = vld [vmem:[%s3695_s17 + $0x7d8] sm:$0xff] }
  0xdd   : > { %2178 = vmatprep.subr.bf16.mxu1 %v3372_v44  ;;  %2088 = vmatmul.mubr.bf16.vlgmr.msra.gmra.mxu0 %v3732_v1  ;;  %v3187_v44 = vcombine.low %v336_v32, %v340_v33  ;;  %v3436_v48 = vcombine.high %v584_v42, %v588_v43  ;;  %v3435_v54 = vcombine.low %v584_v42, %v588_v43 }
  0xde   : > { %2138 = vmatpush1.bf16.msra.mxu0 %v3243_v50  ;;  %2169 = vmatprep.mubr.bf16.mxu0 %v3738_v6  ;;  %v492_v6 = vld [vmem:[%s3695_s17 + $0x4f8] sm:$0xff] }
  0xdf   : > { %2129 = vmatmul.mubr.bf16.vlgmr.msra.gmra.mxu1 %v3740_v7  ;;  %2139 = vmatprep.subr.bf16.mxu0 %v3236_v52  ;;  %v3340_v15 = vcombine.high %v488_v11, %v492_v6  ;;  %v3339_v21 = vcombine.low %v488_v11, %v492_v6  ;;  %v452_v50 = vld [vmem:[%s3695_s17 + $0x3b8] sm:$0xff] }
  0xe0   : > { %2179 = vmatpush1.bf16.msra.mxu1 %v3371_v51  ;;  %2210 = vmatprep.mubr.bf16.mxu1 %v3747_v13  ;;  %v3347_v13 = vcombine.low %v496_v0, %v500_v2  ;;  %v576_v51 = vld [vmem:[%s3695_s17 + $0x798] sm:$0xff]  ;;  %v3300_v55 = vcombine.high %v448_v49, %v452_v50 }
  0xe1   : > { %2180 = vmatprep.subr.bf16.mxu1 %v3364_v53  ;;  %v580_v52 = vld [vmem:[%s3695_s17 + $0x7b8] sm:$0xff]  ;;  %v3307_v53 = vcombine.low %v456_v40, %v460_v41 }
  0xe2   : > { %2140 = vmatpush1.bf16.msra.mxu0 %v3235_v58  ;;  %v3428_v56 = vcombine.high %v576_v51, %v580_v52  ;;  %v444_v58 = vld [vmem:[%s3695_s17 + $0x378] sm:$0xff]  ;;  %v3427_v62 = vcombine.low %v576_v51, %v580_v52 }
  0xe3   : > { %2141 = vmatprep.subr.bf16.mxu0 %v3228_v60  ;;  %v572_v60 = vld [vmem:[%s3695_s17 + $0x778] sm:$0xff]  ;;  %v3292_v63 = vcombine.high %v440_v57, %v444_v58 }
  0xe4   : > { %2181 = vmatpush1.bf16.msra.mxu1 %v3363_v59  ;;  %v568_v59 = vld [vmem:[%s3695_s17 + $0x758] sm:$0xff] }
  0xe5   : > { %2182 = vmatprep.subr.bf16.mxu1 %v3356_v61  ;;  %v3299_v61 = vcombine.low %v448_v49, %v452_v50  ;;  %v3420_v0 = vcombine.high %v568_v59, %v572_v60  ;;  %v432_v2 = vld [vmem:[%s3695_s17 + $0x318] sm:$0xff]  ;;  %v3419_v9 = vcombine.low %v568_v59, %v572_v60 }
  0xe6   : > { %2142 = vmatpush1.bf16.msra.mxu0 %v3227_v3  ;;  %v436_v3 = vld [vmem:[%s3695_s17 + $0x338] sm:$0xff] }
  0xe7   : > { %2143 = vmatprep.subr.bf16.mxu0 %v3220_v5  ;;  %v564_v5 = vld [vmem:[%s3695_s17 + $0x738] sm:$0xff]  ;;  %v3284_v10 = vcombine.high %v432_v2, %v436_v3 }
  0xe8   : > { %2183 = vmatpush1.bf16.msra.mxu1 %v3355_v4  ;;  %v560_v4 = vld [vmem:[%s3695_s17 + $0x718] sm:$0xff] }
  0xe9   : > { %2184 = vmatprep.subr.bf16.mxu1 %v3348_v8  ;;  %v3291_v8 = vcombine.low %v440_v57, %v444_v58  ;;  %v3412_v11 = vcombine.high %v560_v4, %v564_v5  ;;  %v424_v6 = vld [vmem:[%s3695_s17 + $0x2d8] sm:$0xff]  ;;  %v3411_v16 = vcombine.low %v560_v4, %v564_v5 }
  0xea   : > { %2144 = vmatpush1.bf16.msra.mxu0 %v3219_v12  ;;  %v428_v12 = vld [vmem:[%s3695_s17 + $0x2f8] sm:$0xff] }
  0xeb   : > { %2145 = vmatprep.subr.bf16.mxu0 %v3212_v14  ;;  %v556_v14 = vld [vmem:[%s3695_s17 + $0x6f8] sm:$0xff]  ;;  %v3276_v17 = vcombine.high %v424_v6, %v428_v12 }
  0xec   : > { %2185 = vmatpush1.bf16.msra.mxu1 %v3347_v13  ;;  %v552_v13 = vld [vmem:[%s3695_s17 + $0x6d8] sm:$0xff] }
  0xed   : > { %2186 = vmatprep.subr.bf16.mxu1 %v3340_v15  ;;  %v3283_v15 = vcombine.low %v432_v2, %v436_v3  ;;  %v3404_v18 = vcombine.high %v552_v13, %v556_v14  ;;  %v3403_v24 = vcombine.low %v552_v13, %v556_v14 }
  0xee   : > { %2146 = vmatpush1.bf16.msra.mxu0 %v3211_v20  ;;  %v420_v20 = vld [vmem:[%s3695_s17 + $0x2b8] sm:$0xff] }
  0xef   : > { %2147 = vmatprep.subr.bf16.mxu0 %v3204_v22  ;;  %v548_v22 = vld [vmem:[%s3695_s17 + $0x6b8] sm:$0xff]  ;;  %v3268_v25 = vcombine.high %v416_v19, %v420_v20 }
  0xf0   : > { %2187 = vmatpush1.bf16.msra.mxu1 %v3339_v21  ;;  %v544_v21 = vld [vmem:[%s3695_s17 + $0x698] sm:$0xff] }
  0xf1   : > { %2188 = vmatprep.subr.bf16.mxu1 %v3332_v23  ;;  %v3275_v23 = vcombine.low %v424_v6, %v428_v12  ;;  %v3396_v26 = vcombine.high %v544_v21, %v548_v22  ;;  %v3395_v32 = vcombine.low %v544_v21, %v548_v22 }
  0xf2   : > { %2148 = vmatpush1.bf16.msra.mxu0 %v3203_v28  ;;  %v412_v28 = vld [vmem:[%s3695_s17 + $0x278] sm:$0xff] }
  0xf3   : > { %2149 = vmatprep.subr.bf16.mxu0 %v3196_v30  ;;  %v540_v30 = vld [vmem:[%s3695_s17 + $0x678] sm:$0xff]  ;;  %v3260_v33 = vcombine.high %v408_v27, %v412_v28 }
  0xf4   : > { %2189 = vmatpush1.bf16.msra.mxu1 %v3331_v29  ;;  %v536_v29 = vld [vmem:[%s3695_s17 + $0x658] sm:$0xff] }
  0xf5   : > { %2190 = vmatprep.subr.bf16.mxu1 %v3324_v31  ;;  %v3267_v31 = vcombine.low %v416_v19, %v420_v20  ;;  %v3388_v34 = vcombine.high %v536_v29, %v540_v30  ;;  %v3387_v40 = vcombine.low %v536_v29, %v540_v30 }
  0xf6   : > { %2150 = vmatpush1.bf16.msra.mxu0 %v3195_v36  ;;  %v404_v36 = vld [vmem:[%s3695_s17 + $0x238] sm:$0xff] }
  0xf7   : > { %2151 = vmatprep.subr.bf16.mxu0 %v3188_v38  ;;  %v532_v38 = vld [vmem:[%s3695_s17 + $0x638] sm:$0xff]  ;;  %v3252_v41 = vcombine.high %v400_v35, %v404_v36  ;;  %v3251_v43 = vcombine.low %v400_v35, %v404_v36 }
  0xf8   : > { %2191 = vmatpush1.bf16.msra.mxu1 %v3323_v37  ;;  %v528_v37 = vld [vmem:[%s3695_s17 + $0x618] sm:$0xff] }
  0xf9   : > { %2192 = vmatprep.subr.bf16.mxu1 %v3316_v39  ;;  %v3259_v39 = vcombine.low %v408_v27, %v412_v28  ;;  %v3380_v42 = vcombine.high %v528_v37, %v532_v38  ;;  %v331_v28 = vld [vmem:[#allocation2 + $0x8] sm:$0xff] }
  0xfa   : > { %2152 = vmatpush1.bf16.msra.mxu0 %v3187_v44  ;;  %v3379_v44 = vcombine.low %v528_v37, %v532_v38 }
  0xfb   : > { %2153 = vmatprep.subr.bf16.mxu0 %v3308_v47 }
  0xfc   : > { %2193 = vmatpush1.bf16.msra.mxu1 %v3315_v45 }
  0xfd   : > { %2194 = vmatprep.subr.bf16.mxu1 %v3436_v48 }
  0xfe   : > { %2154 = vmatpush2.bf16.msra.mxu0 %v3307_v53  ;;  %v328_v53 = vld [vmem:[#allocation2 + $0x10] sm:$0xff] }
  0xff   : > { %2155 = vmatprep.subr.bf16.mxu0 %v3300_v55 }
 0x100   : > { %2195 = vmatpush2.bf16.msra.mxu1 %v3435_v54 }
 0x101   : > { %2196 = vmatprep.subr.bf16.mxu1 %v3428_v56 }
 0x102   : > { %2156 = vmatpush2.bf16.msra.mxu0 %v3299_v61 }
 0x103   : > { %2157 = vmatprep.subr.bf16.mxu0 %v3292_v63 }
 0x104   : > { %2197 = vmatpush2.bf16.msra.mxu1 %v3427_v62 }
 0x105   : > { %2198 = vmatprep.subr.bf16.mxu1 %v3420_v0 }
 0x106   : > { %2158 = vmatpush2.bf16.msra.mxu0 %v3291_v8 }
 0x107   : > { %2159 = vmatprep.subr.bf16.mxu0 %v3284_v10 }
 0x108   : > { %2199 = vmatpush2.bf16.msra.mxu1 %v3419_v9 }
 0x109   : > { %2200 = vmatprep.subr.bf16.mxu1 %v3412_v11 }
 0x10a   : > { %2160 = vmatpush2.bf16.msra.mxu0 %v3283_v15  ;;  %v330_v15 = vld [vmem:[#allocation2 + $0x18] sm:$0xff] }
 0x10b   : > { %2161 = vmatprep.subr.bf16.mxu0 %v3276_v17 }
 0x10c   : > { %2201 = vmatpush2.bf16.msra.mxu1 %v3411_v16 }
 0x10d   : > { %2202 = vmatprep.subr.bf16.mxu1 %v3404_v18 }
 0x10e   : > { %2162 = vmatpush2.bf16.msra.mxu0 %v3275_v23 }
 0x10f   : > { %2163 = vmatprep.subr.bf16.mxu0 %v3268_v25 }
 0x110   : > { %2203 = vmatpush2.bf16.msra.mxu1 %v3403_v24 }
 0x111   : > { %2204 = vmatprep.subr.bf16.mxu1 %v3396_v26 }
 0x112   : > { %2164 = vmatpush2.bf16.msra.mxu0 %v3267_v31 }
 0x113   : > { %2165 = vmatprep.subr.bf16.mxu0 %v3260_v33 }
 0x114   : > { %2205 = vmatpush2.bf16.msra.mxu1 %v3395_v32 }
 0x115   : > { %2206 = vmatprep.subr.bf16.mxu1 %v3388_v34 }
 0x116   : > { %2166 = vmatpush2.bf16.msra.mxu0 %v3259_v39 }
 0x117   : > { %2167 = vmatprep.subr.bf16.mxu0 %v3252_v41 }
 0x118   : > { %2207 = vmatpush2.bf16.msra.mxu1 %v3387_v40 }
 0x119   : > { %2208 = vmatprep.subr.bf16.mxu1 %v3380_v42 }
 0x11a   : > { %2168 = vmatpush2.bf16.msra.mxu0 %v3251_v43 }
 0x11c   : > { %2209 = vmatpush2.bf16.msra.mxu1 %v3379_v44 }
 0x11d   : > { %v1925_v45 = vpop.f32.mrf.mxu0  ;;  %2170 = vmatmul.mubr.bf16.vlgmr.msra.gmra.mxu0 %v3732_v1 }
 0x11f   : > { %v1966_v47 = vpop.f32.mrf.mxu1  ;;  %2211 = vmatmul.mubr.bf16.vlgmr.msra.gmra.mxu1 %v3740_v7  ;;  %v1927_v49 = vpop.f32.mrf.mxu0  ;;  %v329_v7 = vld [vmem:[#allocation2] sm:$0xff] }
 0x120   : > { %v1967_v48 = vadd.f32 %v1966_v47, %v1925_v45 }
 0x121   : > { %v1968_v50 = vpop.f32.mrf.mxu1  ;;  %v1929_v52 = vpop.f32.mrf.mxu0 }
 0x122   : > { %v1969_v51 = vadd.f32 %v1968_v50, %v1927_v49 }
 0x123   : > { %v1970_v54 = vpop.f32.mrf.mxu1  ;;  %v1930_v56 = vpop.f32.mrf.mxu0 }
 0x124   : > { %v2227_v55 = vcombine.low %v1967_v48, %v1969_v51 }
 0x125   : > { %v1971_v57 = vpop.f32.mrf.mxu1 }
 0x126   : > { %v2235_v58 = vadd.f32 %v2227_v55, %v328_v53 }
 0x128   : > { %2239 = vst [vmem:[#allocation2 + $0x10] sm:$0xff] %v2235_v58 }
 0x15d   : > { %v2007_v59 = vpop.f32.mrf.mxu0 }
 0x15f   : > { %v2048_v60 = vpop.f32.mrf.mxu1  ;;  %v2009_v62 = vpop.f32.mrf.mxu0 }
 0x160   : > { %v2049_v61 = vadd.f32 %v2048_v60, %v2007_v59 }
 0x161   : > { %v2050_v1 = vpop.f32.mrf.mxu1  ;;  %v2011_v0 = vpop.f32.mrf.mxu0 }
 0x162   : > { %v2051_v63 = vadd.f32 %v2050_v1, %v2009_v62 }
 0x163   : > { %v2052_v2 = vpop.f32.mrf.mxu1  ;;  %v2012_v4 = vpop.f32.mrf.mxu0 }
 0x164   : > { %v2228_v3 = vcombine.low %v2049_v61, %v2051_v63 }
 0x165   : > { %v2053_v5 = vpop.f32.mrf.mxu1 }
 0x166   : > { %v2236_v8 = vadd.f32 %v2228_v3, %v329_v7 }
 0x168   : > { %2240 = vst [vmem:[#allocation2] sm:$0xff] %v2236_v8 }
 0x19d   : > { %v2089_v9 = vpop.f32.mrf.mxu0 }
 0x19f   : > { %v2130_v10 = vpop.f32.mrf.mxu1  ;;  %v2091_v6 = vpop.f32.mrf.mxu0 }
 0x1a0   : > { %v2131_v11 = vadd.f32 %v2130_v10, %v2089_v9 }
 0x1a1   : > { %v2132_v12 = vpop.f32.mrf.mxu1  ;;  %v2093_v14 = vpop.f32.mrf.mxu0 }
 0x1a2   : > { %v2133_v13 = vadd.f32 %v2132_v12, %v2091_v6 }
 0x1a3   : > { %v2134_v16 = vpop.f32.mrf.mxu1  ;;  %v2094_v18 = vpop.f32.mrf.mxu0 }
 0x1a4   : > { %v2229_v17 = vcombine.low %v2131_v11, %v2133_v13 }
 0x1a5   : > { %v2135_v19 = vpop.f32.mrf.mxu1 }
 0x1a6   : > { %v2237_v20 = vadd.f32 %v2229_v17, %v330_v15 }
 0x1a8   : > { %2241 = vst [vmem:[#allocation2 + $0x18] sm:$0xff] %v2237_v20 }
 0x1dd   : > { %v2171_v21 = vpop.f32.mrf.mxu0 }
 0x1df   : > { %v2212_v22 = vpop.f32.mrf.mxu1  ;;  %v2173_v23 = vpop.f32.mrf.mxu0 }
 0x1e0   : > { %v2213_v25 = vadd.f32 %v2212_v22, %v2171_v21 }
 0x1e1   : > { %v2214_v24 = vpop.f32.mrf.mxu1  ;;  %v2175_v27 = vpop.f32.mrf.mxu0 }
 0x1e2   : > { %v2215_v26 = vadd.f32 %v2214_v24, %v2173_v23 }
 0x1e3   : > { %v2216_v29 = vpop.f32.mrf.mxu1  ;;  %v2176_v31 = vpop.f32.mrf.mxu0 }
 0x1e4   : > { %v2230_v30 = vcombine.low %v2213_v25, %v2215_v26  ;;  %2246 = sbr.rel (%p3437_p6) target bundleno = 826 (0x33a), region = 60 }
 0x1e5   : > { %v2217_v32 = vpop.f32.mrf.mxu1 }
 0x1e6   : > { %v2238_v33 = vadd.f32 %v2230_v30, %v331_v28 }
 0x1e8   : > { %2242 = vst [vmem:[#allocation2 + $0x8] sm:$0xff] %v2238_v33 }
 0x1e9   : > { %vm2309_vm0 = vcmask 1043456   ;;  %v2615_v34 = vld [vmem:[%s4596_s7] sm:$0xff]  ;;  %v2616_v35 = vld [vmem:[%s4596_s7 + $0x8] sm:$0xff]  ;;  %v2617_v36 = vld [vmem:[%s4596_s7 + $0x10] sm:$0xff]  ;;  %vm3129_vm6 = vcmask 3072  }
 0x1ea   : > { %v2619_v37 = vmul.f32 %v2615_v34, %v2615_v34  ;;  %v2620_v38 = vmul.f32 %v2616_v35, %v2616_v35  ;;  %v2699_v39 = vld [vmem:[%s4594_s5 + $0xf8] sm:$0xff]  ;;  %v2698_v41 = vld [vmem:[%s4594_s5 + $0xf0] sm:$0xff]  ;;  %v2621_v44 = vmul.f32 %v2617_v36, %v2617_v36  ;;  %v2697_v50 = vld [vmem:[%s4594_s5 + $0xe8] sm:$0xff] }
 0x1eb   : > { %v2683_v40 = vld [vmem:[%s4594_s5 + $0x78] sm:$0xff]  ;;  %3442 = vmatprep.subr.mxu0 %v2699_v39  ;;  %v2682_v43 = vld [vmem:[%s4594_s5 + $0x70] sm:$0xff]  ;;  %v2681_v53 = vld [vmem:[%s4594_s5 + $0x68] sm:$0xff]  ;;  %v4131_v39 = vsub.s32 1, %v3720_v46 }
 0x1ec   : > { %v2731_v42 = vld [vmem:[%s4594_s5 + $0x1f8] sm:$0xff]  ;;  %v2627_v45 = vcombine.high %v2619_v37, %v2619_v37  ;;  %v2628_v47 = vcombine.high %v2620_v38, %v2620_v38  ;;  %v2635_v48 = vsel %vm2309_vm0, %v2619_v37, 0.0  ;;  %3443 = vmatpush3.msra.mxu0 %v2683_v40  ;;  %v2730_v51 = vld [vmem:[%s4594_s5 + $0x1f0] sm:$0xff]  ;;  %v2638_v56 = vsel %vm2309_vm0, %v2620_v38, 0.0  ;;  %v2696_v57 = vld [vmem:[%s4594_s5 + $0xe0] sm:$0xff] }
 0x1ed   : > { %3477 = vmatprep.subr.mxu1 %v2731_v42  ;;  %v2715_v49 = vld [vmem:[%s4594_s5 + $0x178] sm:$0xff]  ;;  %3444 = vmatprep.subr.mxu0 %v2698_v41  ;;  %v2714_v54 = vld [vmem:[%s4594_s5 + $0x170] sm:$0xff]  ;;  %v2729_v58 = vld [vmem:[%s4594_s5 + $0x1e8] sm:$0xff]  ;;  %v2629_v63 = vcombine.high %v2621_v44, %v2621_v44  ;;  %v2642_v8 = vsel %vm2309_vm0, %v2621_v44, 0.0  ;;  %v4128_v38 = vsub.s32 0, %v3720_v46  ;;  %v4146_v44 = vsub.s32 2, %v3720_v46 }
 0x1ee   : > { %v2618_v52 = vld [vmem:[%s4596_s7 + $0x18] sm:$0xff]  ;;  %3478 = vmatpush3.msra.mxu1 %v2715_v49  ;;  %v2636_v55 = vsel %vm2309_vm0, %v2627_v45, 0.0  ;;  %3445 = vmatpush3.msra.mxu0 %v2682_v43  ;;  %v2713_v59 = vld [vmem:[%s4594_s5 + $0x168] sm:$0xff]  ;;  %v2680_v61 = vld [vmem:[%s4594_s5 + $0x60] sm:$0xff]  ;;  %v2640_v0 = vsel %vm2309_vm0, %v2628_v47, 0.0  ;;  %v4149_v45 = vsub.s32 3, %v3720_v46 }
 0x1ef   : > { %3479 = vmatprep.subr.mxu1 %v2730_v51  ;;  %v2637_v60 = vadd.f32 %v2636_v55, %v2635_v48  ;;  %3446 = vmatprep.subr.mxu0 %v2697_v50  ;;  %v2728_v62 = vld [vmem:[%s4594_s5 + $0x1e0] sm:$0xff]  ;;  %v2622_v1 = vmul.f32 %v2618_v52, %v2618_v52  ;;  %v2695_v7 = vld [vmem:[%s4594_s5 + $0xd8] sm:$0xff]  ;;  %v2694_v9 = vld [vmem:[%s4594_s5 + $0xd0] sm:$0xff]  ;;  %v2644_v14 = vsel %vm2309_vm0, %v2629_v63, 0.0 }
 0x1f0   : > { %3480 = vmatpush3.msra.mxu1 %v2714_v54  ;;  %3447 = vmatpush3.msra.mxu0 %v2681_v53  ;;  %v2712_v2 = vld [vmem:[%s4594_s5 + $0x160] sm:$0xff]  ;;  %v2679_v4 = vld [vmem:[%s4594_s5 + $0x58] sm:$0xff]  ;;  %v2678_v6 = vld [vmem:[%s4594_s5 + $0x50] sm:$0xff] }
 0x1f1   : > { %3481 = vmatprep.subr.mxu1 %v2729_v58  ;;  %v2639_v3 = vadd.f32 %v2638_v56, %v2637_v60  ;;  %3448 = vmatprep.subr.mxu0 %v2696_v57  ;;  %v2727_v5 = vld [vmem:[%s4594_s5 + $0x1d8] sm:$0xff]  ;;  %v2726_v12 = vld [vmem:[%s4594_s5 + $0x1d0] sm:$0xff]  ;;  %v2630_v13 = vcombine.high %v2622_v1, %v2622_v1  ;;  %v2693_v15 = vld [vmem:[%s4594_s5 + $0xc8] sm:$0xff]  ;;  %v2646_v20 = vsel %vm2309_vm0, %v2622_v1, 0.0 }
 0x1f2   : > { %3482 = vmatpush3.msra.mxu1 %v2713_v59  ;;  %3449 = vmatpush3.msra.mxu0 %v2680_v61  ;;  %v2711_v10 = vld [vmem:[%s4594_s5 + $0x158] sm:$0xff]  ;;  %v2710_v16 = vld [vmem:[%s4594_s5 + $0x150] sm:$0xff]  ;;  %v2677_v18 = vld [vmem:[%s4594_s5 + $0x48] sm:$0xff] }
 0x1f3   : > { %3483 = vmatprep.subr.mxu1 %v2728_v62  ;;  %v2641_v11 = vadd.f32 %v2640_v0, %v2639_v3  ;;  %3450 = vmatprep.subr.mxu0 %v2695_v7  ;;  %v2725_v19 = vld [vmem:[%s4594_s5 + $0x1c8] sm:$0xff]  ;;  %v2692_v21 = vld [vmem:[%s4594_s5 + $0xc0] sm:$0xff]  ;;  %v2648_v26 = vsel %vm2309_vm0, %v2630_v13, 0.0  ;;  %v2691_v27 = vld [vmem:[%s4594_s5 + $0xb8] sm:$0xff] }
 0x1f4   : > { %3484 = vmatpush3.msra.mxu1 %v2712_v2  ;;  %3451 = vmatpush3.msra.mxu0 %v2679_v4  ;;  %v2709_v22 = vld [vmem:[%s4594_s5 + $0x148] sm:$0xff]  ;;  %v2676_v24 = vld [vmem:[%s4594_s5 + $0x40] sm:$0xff]  ;;  %v2675_v30 = vld [vmem:[%s4594_s5 + $0x38] sm:$0xff] }
 0x1f5   : > { %3485 = vmatprep.subr.mxu1 %v2727_v5  ;;  %v2643_v17 = vadd.f32 %v2642_v8, %v2641_v11  ;;  %3452 = vmatprep.subr.mxu0 %v2694_v9  ;;  %v2724_v25 = vld [vmem:[%s4594_s5 + $0x1c0] sm:$0xff]  ;;  %v2723_v31 = vld [vmem:[%s4594_s5 + $0x1b8] sm:$0xff]  ;;  %v2690_v32 = vld [vmem:[%s4594_s5 + $0xb0] sm:$0xff] }
 0x1f6   : > { %3486 = vmatpush3.msra.mxu1 %v2711_v10  ;;  %3453 = vmatpush3.msra.mxu0 %v2678_v6  ;;  %v2708_v28 = vld [vmem:[%s4594_s5 + $0x140] sm:$0xff]  ;;  %v2674_v34 = vld [vmem:[%s4594_s5 + $0x30] sm:$0xff]  ;;  %v2707_v35 = vld [vmem:[%s4594_s5 + $0x138] sm:$0xff] }
 0x1f7   : > { %3487 = vmatprep.subr.mxu1 %v2726_v12  ;;  %v2645_v23 = vadd.f32 %v2644_v14, %v2643_v17  ;;  %3454 = vmatprep.subr.mxu0 %v2693_v15  ;;  %v2689_v36 = vld [vmem:[%s4594_s5 + $0xa8] sm:$0xff]  ;;  %v2722_v37 = vld [vmem:[%s4594_s5 + $0x1b0] sm:$0xff]  ;;  %v2688_v42 = vld [vmem:[%s4594_s5 + $0xa0] sm:$0xff] }
 0x1f8   : > { %3488 = vmatpush3.msra.mxu1 %v2710_v16  ;;  %3455 = vmatpush3.msra.mxu0 %v2677_v18  ;;  %v2673_v40 = vld [vmem:[%s4594_s5 + $0x28] sm:$0xff]  ;;  %v2706_v41 = vld [vmem:[%s4594_s5 + $0x130] sm:$0xff]  ;;  %v2672_v47 = vld [vmem:[%s4594_s5 + $0x20] sm:$0xff] }
 0x1f9   : > { %3489 = vmatprep.subr.mxu1 %v2725_v19  ;;  %v2647_v29 = vadd.f32 %v2646_v20, %v2645_v23  ;;  %3456 = vmatprep.subr.mxu0 %v2692_v21  ;;  %v2721_v43 = vld [vmem:[%s4594_s5 + $0x1a8] sm:$0xff]  ;;  %v4160_v49 = vld [vmem:[%s4591_s2] sm:$0xff]  ;;  %v2687_v50 = vld [vmem:[%s4594_s5 + $0x98] sm:$0xff] }
 0x1fa   : > { %3490 = vmatpush3.msra.mxu1 %v2709_v22  ;;  %3457 = vmatpush3.msra.mxu0 %v2676_v24  ;;  %v2705_v48 = vld [vmem:[%s4594_s5 + $0x128] sm:$0xff]  ;;  %v2720_v51 = vld [vmem:[%s4594_s5 + $0x1a0] sm:$0xff]  ;;  %v2256_v52 = vrot.slane %v4160_v49, %v4128_v38  ;;  %v2260_v53 = vrot.slane %v4160_v49, %v4131_v39  ;;  %v2671_v55 = vld [vmem:[%s4594_s5 + $0x18] sm:$0xff]  ;;  %v2264_v1 = vrot.slane %v4160_v49, %v4146_v44  ;;  %v4244_v22 = vsub.s32 4, %v3720_v46 }
 0x1fb   : > { %3491 = vmatprep.subr.mxu1 %v2724_v25  ;;  %v2649_v33 = vadd.f32 %v2648_v26, %v2647_v29  ;;  %3458 = vmatprep.subr.mxu0 %v2691_v27  ;;  %v4175_v54 = vld [vmem:[%s4593_s4] sm:$0xff]  ;;  %v2247_v57 = vld [vmem:[#allocation2 + $0x10] sm:$0xff]  ;;  %v2719_v61 = vld [vmem:[%s4594_s5 + $0x198] sm:$0xff]  ;;  %v2268_v63 = vrot.slane %v4160_v49, %v4149_v45 }
 0x1fc   : > { %3492 = vmatpush3.msra.mxu1 %v2708_v28  ;;  %3459 = vmatpush3.msra.mxu0 %v2675_v30  ;;  %v2704_v56 = vld [vmem:[%s4594_s5 + $0x120] sm:$0xff]  ;;  %v2562_v58 = vrot.slane %v4175_v54, %v4128_v38  ;;  %v2566_v59 = vrot.slane %v4175_v54, %v4131_v39  ;;  %v2686_v60 = vld [vmem:[%s4594_s5 + $0x90] sm:$0xff]  ;;  %v2285_v62 = vcombine.low %v2256_v52, %v2260_v53  ;;  %v2703_v7 = vld [vmem:[%s4594_s5 + $0x118] sm:$0xff]  ;;  %v4258_v28 = vsub.s32 5, %v3720_v46 }
 0x1fd   : > { %3493 = vmatprep.subr.mxu1 %v2723_v31  ;;  %2650 = vadd.xlane.f32.xlu0 %v2649_v33  ;;  %v2670_v0 = vld [vmem:[%s4594_s5 + $0x10] sm:$0xff]  ;;  %v2248_v3 = vld [vmem:[#allocation2] sm:$0xff]  ;;  %v2685_v4 = vld [vmem:[%s4594_s5 + $0x88] sm:$0xff]  ;;  %v2286_v9 = vcombine.low %v2264_v1, %v2268_v63  ;;  %v2570_v6 = vrot.slane %v4175_v54, %v4146_v44  ;;  %v2574_v12 = vrot.slane %v4175_v54, %v4149_v45 }
 0x1fe   : > { %3460 = vmatprep.subr.mxu0 %v2690_v32  ;;  %3494 = vmatpush3.msra.mxu1 %v2707_v35  ;;  %v4203_v2 = vcombine.low %v2562_v58, %v2566_v59  ;;  %v2718_v5 = vld [vmem:[%s4594_s5 + $0x190] sm:$0xff]  ;;  %v4211_v8 = vadd.f32 %v2285_v62, %v2247_v57  ;;  %v2669_v10 = vld [vmem:[%s4594_s5 + $0x8] sm:$0xff]  ;;  %v2684_v13 = vld [vmem:[%s4594_s5 + $0x80] sm:$0xff]  ;;  %v2578_v35 = vrot.slane %v4175_v54, %v4244_v22 }
 0x1ff   : > { %3461 = vmatpush3.msra.mxu0 %v2674_v34  ;;  %3495 = vmatprep.subr.mxu1 %v2722_v37  ;;  %v2702_v11 = vld [vmem:[%s4594_s5 + $0x110] sm:$0xff]  ;;  %v2717_v14 = vld [vmem:[%s4594_s5 + $0x188] sm:$0xff]  ;;  %v4233_v17 = vadd.f32 %v2286_v9, %v2248_v3  ;;  %v2668_v18 = vld [vmem:[%s4594_s5] sm:$0xff]  ;;  %v4241_v21 = vcombine.low %v2570_v6, %v2574_v12 }
 0x200   : > { %3462 = vmatprep.subr.mxu0 %v2689_v36  ;;  %3496 = vmatpush3.msra.mxu1 %v2706_v41  ;;  %v2301_v15 = vcombine.high %v4211_v8, %v4211_v8  ;;  %v2310_v16 = vsel %vm2309_vm0, %v4211_v8, 0.0  ;;  %v2701_v19 = vld [vmem:[%s4594_s5 + $0x108] sm:$0xff]  ;;  %v2716_v24 = vld [vmem:[%s4594_s5 + $0x180] sm:$0xff]  ;;  %v2763_v25 = vld [vmem:[%s4594_s5 + $0x2f8] sm:$0xff]  ;;  %v2582_v36 = vrot.slane %v4175_v54, %v4258_v28 }
 0x201   : > { %3463 = vmatpush3.msra.mxu0 %v2673_v40  ;;  %3497 = vmatprep.subr.mxu1 %v2721_v43  ;;  %v2311_v20 = vrot.slane %v2310_v16, 4  ;;  %v2302_v26 = vcombine.high %v4233_v17, %v4233_v17  ;;  %v2324_v27 = vsel %vm2309_vm0, %v4233_v17, 0.0  ;;  %v2700_v31 = vld [vmem:[%s4594_s5 + $0x100] sm:$0xff]  ;;  %v2795_v34 = vld [vmem:[%s4594_s5 + $0x3f8] sm:$0xff] }
 0x202   : > { %3464 = vmatprep.subr.mxu0 %v2688_v42  ;;  %3498 = vmatpush3.msra.mxu1 %v2705_v48  ;;  %v2317_v23 = vsel %vm2309_vm0, %v2301_v15, 0.0  ;;  %v2325_v32 = vrot.slane %v2324_v27, 4  ;;  %v4271_v43 = vcombine.low %v2578_v35, %v2582_v36  ;;  %v4277_v48 = vsub.s32 7, %v3720_v46 }
 0x203   : > { %3465 = vmatpush3.msra.mxu0 %v2672_v47  ;;  %3499 = vmatprep.subr.mxu1 %v2720_v51  ;;  %v2312_v29 = vadd.f32 %v2311_v20, %v2310_v16  ;;  %v2318_v30 = vrot.slane %v2317_v23, 4  ;;  %v2331_v33 = vsel %vm2309_vm0, %v2302_v26, 0.0  ;;  %v4274_v47 = vsub.s32 6, %v3720_v46  ;;  %v2249_v16 = vld [vmem:[#allocation2 + $0x18] sm:$0xff]  ;;  %v2250_v20 = vld [vmem:[#allocation2 + $0x8] sm:$0xff] }
 0x204   : > { %3466 = vmatprep.subr.mxu0 %v2687_v50  ;;  %3500 = vmatpush3.msra.mxu1 %v2704_v56  ;;  %v2326_v41 = vadd.f32 %v2325_v32, %v2324_v27  ;;  %v2332_v42 = vrot.slane %v2331_v33, 4  ;;  %v2276_v56 = vrot.slane %v4160_v49, %v4258_v28  ;;  %v2590_v58 = vrot.slane %v4175_v54, %v4277_v48 }
 0x205   : > { %3467 = vmatpush3.msra.mxu0 %v2671_v55  ;;  %3501 = vmatprep.subr.mxu1 %v2719_v61  ;;  %v2313_v37 = vrot.slane %v2312_v29, 2  ;;  %v2319_v40 = vadd.f32 %v2318_v30, %v2317_v23  ;;  %v2272_v55 = vrot.slane %v4160_v49, %v4244_v22  ;;  %v2586_v57 = vrot.slane %v4175_v54, %v4274_v47 }
 0x206   : > { %3468 = vmatprep.subr.mxu0 %v2686_v60  ;;  %3502 = vmatpush3.msra.mxu1 %v2703_v7  ;;  %v2327_v52 = vrot.slane %v2326_v41, 2  ;;  %v2333_v53 = vadd.f32 %v2332_v42, %v2331_v33  ;;  %v2280_v1 = vrot.slane %v4160_v49, %v4274_v47  ;;  %v2284_v63 = vrot.slane %v4160_v49, %v4277_v48 }
 0x207   : > { %3469 = vmatpush3.msra.mxu0 %v2670_v0  ;;  %3503 = vmatprep.subr.mxu1 %v2718_v5  ;;  %v2314_v50 = vadd.f32 %v2313_v37, %v2312_v29  ;;  %v2320_v51 = vrot.slane %v2319_v40, 2  ;;  %v4291_v0 = vcombine.low %v2586_v57, %v2590_v58  ;;  %v2287_v9 = vcombine.low %v2272_v55, %v2276_v56 }
 0x208   : > { %3470 = vmatprep.subr.mxu0 %v2685_v4  ;;  %3504 = vmatpush3.msra.mxu1 %v2702_v11  ;;  %v2328_v61 = vadd.f32 %v2327_v52, %v2326_v41  ;;  %v2334_v62 = vrot.slane %v2333_v53, 2  ;;  %v2288_v12 = vcombine.low %v2280_v1, %v2284_v63 }
 0x209   : > { %3471 = vmatpush3.msra.mxu0 %v2669_v10  ;;  %3505 = vmatprep.subr.mxu1 %v2717_v14  ;;  %v2315_v59 = vrot.slane %v2314_v50, 1  ;;  %v2321_v60 = vadd.f32 %v2320_v51, %v2319_v40 }
 0x20a   : > { %3472 = vmatprep.subr.mxu0 %v2684_v13  ;;  %3506 = vmatpush3.msra.mxu1 %v2701_v19  ;;  %v2329_v4 = vrot.slane %v2328_v61, 1  ;;  %v2335_v5 = vadd.f32 %v2334_v62, %v2333_v53 }
 0x20b   : > { %3473 = vmatpush3.msra.mxu0 %v2668_v18  ;;  %3507 = vmatprep.subr.mxu1 %v2716_v24  ;;  %v2316_v7 = vadd.f32 %v2315_v59, %v2314_v50  ;;  %v2322_v3 = vrot.slane %v2321_v60, 1  ;;  %v4293_v18 = vadd.f32 %v2287_v9, %v2249_v16 }
 0x20c   : > { %3512 = vmatprep.subr.mxu0 %v2763_v25  ;;  %3508 = vmatpush3.msra.mxu1 %v2700_v31  ;;  %v2330_v54 = vadd.f32 %v2329_v4, %v2328_v61  ;;  %v2336_v6 = vrot.slane %v2335_v5, 1  ;;  %v4299_v25 = vadd.f32 %v2288_v12, %v2250_v20 }
 0x20d   : > { %3547 = vmatprep.subr.mxu1 %v2795_v34  ;;  %v2323_v10 = vadd.f32 %v2322_v3, %v2321_v60  ;;  %v2367_v11 = vmul.f32 0.25, %v2316_v7  ;;  %v2303_v23 = vcombine.high %v4293_v18, %v4293_v18  ;;  %v2338_v24 = vsel %vm2309_vm0, %v4293_v18, 0.0 }
 0x20e   : > { %v2337_v14 = vadd.f32 %v2336_v6, %v2335_v5  ;;  %v2369_v15 = vmul.f32 0.25, %v2330_v54  ;;  %v2339_v29 = vrot.slane %v2338_v24, 4  ;;  %v2304_v31 = vcombine.high %v4299_v25, %v4299_v25 }
 0x20f   : > { %v2368_v13 = vmul.f32 0.25, %v2323_v10  ;;  %v2345_v30 = vsel %vm2309_vm0, %v2303_v23, 0.0  ;;  %v2352_v32 = vsel %vm2309_vm0, %v4299_v25, 0.0 }
 0x210   : > { %v2370_v49 = vmul.f32 0.25, %v2337_v14  ;;  %v2340_v35 = vadd.f32 %v2339_v29, %v2338_v24  ;;  %v2346_v36 = vrot.slane %v2345_v30, 4  ;;  %v2359_v37 = vsel %vm2309_vm0, %v2304_v31, 0.0 }
 0x211   : > { %v2383_v19 = vcombine.low %v2367_v11, %v2368_v13  ;;  %v2360_v55 = vrot.slane %v2359_v37, 4 }
 0x212   : > { %v2384_v27 = vcombine.low %v2369_v15, %v2370_v49  ;;  %v2341_v50 = vrot.slane %v2340_v35, 2  ;;  %v2347_v52 = vadd.f32 %v2346_v36, %v2345_v30 }
 0x213   : > { %v4302_v26 = vsub.f32 %v4211_v8, %v2383_v19  ;;  %v2353_v8 = vrot.slane %v2352_v32, 4  ;;  %v2361_v3 = vadd.f32 %v2360_v55, %v2359_v37 }
 0x214   : > { %v4312_v34 = vsub.f32 %v4233_v17, %v2384_v27  ;;  %v2342_v58 = vadd.f32 %v2341_v50, %v2340_v35  ;;  %v2348_v62 = vrot.slane %v2347_v52, 2 }
 0x215   : > { %v2395_v33 = vmul.f32 %v4302_v26, %v4302_v26  ;;  %v2354_v53 = vadd.f32 %v2353_v8, %v2352_v32  ;;  %v2362_v12 = vrot.slane %v2361_v3, 2 }
 0x216   : > { %v2396_v42 = vmul.f32 %v4312_v34, %v4312_v34  ;;  %v2343_v63 = vrot.slane %v2342_v58, 1  ;;  %v2349_v54 = vadd.f32 %v2348_v62, %v2347_v52 }
 0x217   : > { %v2403_v40 = vcombine.high %v2395_v33, %v2395_v33  ;;  %v2411_v41 = vsel %vm2309_vm0, %v2395_v33, 0.0  ;;  %v2355_v7 = vrot.slane %v2354_v53, 2  ;;  %v2363_v20 = vadd.f32 %v2362_v12, %v2361_v3 }
 0x218   : > { %v2412_v51 = vrot.slane %v2411_v41, 4  ;;  %v2404_v17 = vcombine.high %v2396_v42, %v2396_v42  ;;  %v2425_v57 = vsel %vm2309_vm0, %v2396_v42, 0.0  ;;  %v2344_v11 = vadd.f32 %v2343_v63, %v2342_v58 }
 0x219   : > { %v2418_v56 = vsel %vm2309_vm0, %v2403_v40, 0.0  ;;  %v2426_v61 = vrot.slane %v2425_v57, 4  ;;  %v2356_v6 = vadd.f32 %v2355_v7, %v2354_v53  ;;  %v2350_v19 = vrot.slane %v2349_v54, 1 }
 0x21a   : > { %v2413_v59 = vadd.f32 %v2412_v51, %v2411_v41  ;;  %v2419_v60 = vrot.slane %v2418_v56, 4  ;;  %v2432_v1 = vsel %vm2309_vm0, %v2404_v17, 0.0  ;;  %v2371_v31 = vmul.f32 0.25, %v2344_v11 }
 0x21b   : > { %v2427_v9 = vadd.f32 %v2426_v61, %v2425_v57  ;;  %v2433_v10 = vrot.slane %v2432_v1, 4  ;;  %v2357_v49 = vrot.slane %v2356_v6, 1  ;;  %v2351_v30 = vadd.f32 %v2350_v19, %v2349_v54 }
 0x21c   : > { %v2414_v4 = vrot.slane %v2413_v59, 2  ;;  %v2420_v5 = vadd.f32 %v2419_v60, %v2418_v56  ;;  %v2364_v33 = vrot.slane %v2363_v20, 1 }
 0x21d   : > { %v2428_v15 = vrot.slane %v2427_v9, 2  ;;  %v2434_v16 = vadd.f32 %v2433_v10, %v2432_v1  ;;  %v2358_v32 = vadd.f32 %v2357_v49, %v2356_v6  ;;  %v2372_v40 = vmul.f32 0.25, %v2351_v30 }
 0x21e   : > { %v2415_v13 = vadd.f32 %v2414_v4, %v2413_v59  ;;  %v2421_v14 = vrot.slane %v2420_v5, 2  ;;  %v2365_v41 = vadd.f32 %v2364_v33, %v2363_v20 }
 0x21f   : > { %v2429_v27 = vadd.f32 %v2428_v15, %v2427_v9  ;;  %v2435_v29 = vrot.slane %v2434_v16, 2  ;;  %v2373_v42 = vmul.f32 0.25, %v2358_v32  ;;  %v2385_v55 = vcombine.low %v2371_v31, %v2372_v40  ;;  %v4338_v15 = vld [vmem:[%s4592_s3] sm:$0xff] }
 0x220   : > { %v2416_v23 = vrot.slane %v2415_v13, 1  ;;  %v2422_v24 = vadd.f32 %v2421_v14, %v2420_v5  ;;  %v2374_v56 = vmul.f32 0.25, %v2365_v41  ;;  %v2516_v30 = vrot.slane %v4338_v15, %v4128_v38 }
 0x221   : > { %v2430_v8 = vrot.slane %v2429_v27, 1  ;;  %v2436_v37 = vadd.f32 %v2435_v29, %v2434_v16  ;;  %v4322_v60 = vsub.f32 %v4293_v18, %v2385_v55  ;;  %v2520_v31 = vrot.slane %v4338_v15, %v4131_v39 }
 0x222   : > { %v2417_v35 = vadd.f32 %v2416_v23, %v2415_v13  ;;  %v2423_v36 = vrot.slane %v2422_v24, 1  ;;  %v2386_v61 = vcombine.low %v2373_v42, %v2374_v56  ;;  %v2528_v40 = vrot.slane %v4338_v15, %v4149_v45 }
 0x223   : > { %v2431_v52 = vadd.f32 %v2430_v8, %v2429_v27  ;;  %v2437_v53 = vrot.slane %v2436_v37, 1  ;;  %v2397_v7 = vmul.f32 %v4322_v60, %v4322_v60  ;;  %v2545_v38 = vcombine.low %v2516_v30, %v2520_v31  ;;  %v2793_v30 = vld [vmem:[%s4594_s5 + $0x3e8] sm:$0xff]  ;;  %v2744_v31 = vld [vmem:[%s4594_s5 + $0x260] sm:$0xff] }
 0x224   : > { %v2424_v50 = vadd.f32 %v2423_v36, %v2422_v24  ;;  %v2467_v51 = vmul.f32 0.25, %v2417_v35  ;;  %v4327_v3 = vsub.f32 %v4299_v25, %v2386_v61 }
 0x225   : > { %v2438_v58 = vadd.f32 %v2437_v53, %v2436_v37  ;;  %v2469_v59 = vmul.f32 0.25, %v2431_v52  ;;  %v2405_v5 = vcombine.high %v2397_v7, %v2397_v7  ;;  %v2439_v9 = vsel %vm2309_vm0, %v2397_v7, 0.0 }
 0x226   : > { %v2468_v17 = vmul.f32 0.25, %v2424_v50  ;;  %v2475_v57 = vadd.f32 1e-05, %v2467_v51  ;;  %v2398_v18 = vmul.f32 %v4327_v3, %v4327_v3  ;;  %v2440_v10 = vrot.slane %v2439_v9, 4 }
 0x227   : > { %v2470_v1 = vmul.f32 0.25, %v2438_v58  ;;  %v2477_v63 = vadd.f32 1e-05, %v2469_v59  ;;  %v2446_v11 = vsel %vm2309_vm0, %v2405_v5, 0.0  ;;  %v2524_v37 = vrot.slane %v4338_v15, %v4146_v44 }
 0x228   : > { %v2476_v62 = vadd.f32 1e-05, %v2468_v17  ;;  %3594 = vrsqrt.f32 %v2475_v57  ;;  %v2406_v54 = vcombine.high %v2398_v18, %v2398_v18  ;;  %v2453_v6 = vsel %vm2309_vm0, %v2398_v18, 0.0 }
 0x229   : > { %v2478_v4 = vadd.f32 1e-05, %v2470_v1  ;;  %v2441_v12 = vadd.f32 %v2440_v10, %v2439_v9  ;;  %v2447_v13 = vrot.slane %v2446_v11, 4  ;;  %v2454_v25 = vrot.slane %v2453_v6, 4 }
 0x22a   : > { %3596 = vrsqrt.f32 %v2476_v62  ;;  %v2460_v14 = vsel %vm2309_vm0, %v2406_v54, 0.0  ;;  %v2546_v58 = vcombine.low %v2524_v37, %v2528_v40  ;;  %v2792_v37 = vld [vmem:[%s4594_s5 + $0x3e0] sm:$0xff] }
 0x22b   : > { %3598 = vrsqrt.f32 %v2477_v63  ;;  %v2442_v16 = vrot.slane %v2441_v12, 2  ;;  %v2448_v19 = vadd.f32 %v2447_v13, %v2446_v11  ;;  %v2455_v49 = vadd.f32 %v2454_v25, %v2453_v6 }
 0x22c   : > { %3600 = vrsqrt.f32 %v2478_v4  ;;  %v2461_v20 = vrot.slane %v2460_v14, 4 }
 0x22d   : > { %v2443_v23 = vadd.f32 %v2442_v16, %v2441_v12  ;;  %v2449_v24 = vrot.slane %v2448_v19, 2  ;;  %v2456_v27 = vrot.slane %v2455_v49, 2  ;;  %v2746_v16 = vld [vmem:[%s4594_s5 + $0x270] sm:$0xff] }
 0x22e   : > { %v2462_v29 = vadd.f32 %v2461_v20, %v2460_v14  ;;  %v2794_v20 = vld [vmem:[%s4594_s5 + $0x3f0] sm:$0xff] }
 0x22f   : > { %v2444_v32 = vrot.slane %v2443_v23, 1  ;;  %v2450_v33 = vadd.f32 %v2449_v24, %v2448_v19  ;;  %v2457_v35 = vadd.f32 %v2456_v27, %v2455_v49  ;;  %v2779_v19 = vld [vmem:[%s4594_s5 + $0x378] sm:$0xff]  ;;  %v2761_v49 = vld [vmem:[%s4594_s5 + $0x2e8] sm:$0xff]  ;;  %v2778_v24 = vld [vmem:[%s4594_s5 + $0x370] sm:$0xff] }
 0x230   : > { %v2463_v36 = vrot.slane %v2462_v29, 2 }
 0x231   : > { %v2445_v41 = vadd.f32 %v2444_v32, %v2443_v23  ;;  %v2451_v42 = vrot.slane %v2450_v33, 1  ;;  %v2458_v50 = vrot.slane %v2457_v35, 1  ;;  %v2745_v23 = vld [vmem:[%s4594_s5 + $0x268] sm:$0xff] }
 0x232   : > { %v2464_v51 = vadd.f32 %v2463_v36, %v2462_v29  ;;  %v2760_v29 = vld [vmem:[%s4594_s5 + $0x2e0] sm:$0xff]  ;;  %v2777_v32 = vld [vmem:[%s4594_s5 + $0x368] sm:$0xff] }
 0x233   : > { %v2452_v39 = vadd.f32 %v2451_v42, %v2450_v33  ;;  %v2471_v56 = vmul.f32 0.25, %v2445_v41  ;;  %v2459_v17 = vadd.f32 %v2458_v50, %v2457_v35  ;;  %v2532_v33 = vrot.slane %v4338_v15, %v4244_v22  ;;  %v2743_v22 = vld [vmem:[%s4594_s5 + $0x258] sm:$0xff] }
 0x234   : > { %v2465_v59 = vrot.slane %v2464_v51, 1  ;;  %v2536_v35 = vrot.slane %v4338_v15, %v4258_v28  ;;  %v2776_v28 = vld [vmem:[%s4594_s5 + $0x360] sm:$0xff]  ;;  %v2540_v42 = vrot.slane %v4338_v15, %v4274_v47  ;;  %v2544_v50 = vrot.slane %v4338_v15, %v4277_v48  ;;  %v2742_v47 = vld [vmem:[%s4594_s5 + $0x250] sm:$0xff]  ;;  %v2775_v48 = vld [vmem:[%s4594_s5 + $0x358] sm:$0xff] }
 0x235   : > { %v3595_v8 = vpop.eup %3594  ;;  %v2472_v62 = vmul.f32 0.25, %v2452_v39  ;;  %v2479_v1 = vadd.f32 1e-05, %v2471_v56  ;;  %v2473_v63 = vmul.f32 0.25, %v2459_v17  ;;  %v2790_v39 = vld [vmem:[%s4594_s5 + $0x3d0] sm:$0xff]  ;;  %v2741_v17 = vld [vmem:[%s4594_s5 + $0x248] sm:$0xff] }
 0x236   : > { %v2466_v45 = vadd.f32 %v2465_v59, %v2464_v51  ;;  %v2758_v51 = vld [vmem:[%s4594_s5 + $0x2d0] sm:$0xff]  ;;  %v2789_v59 = vld [vmem:[%s4594_s5 + $0x3c8] sm:$0xff] }
 0x237   : > { %v3597_v52 = vpop.eup %3596  ;;  %v2480_v5 = vadd.f32 1e-05, %v2472_v62  ;;  %3602 = vrsqrt.f32 %v2479_v1  ;;  %v2481_v18 = vadd.f32 1e-05, %v2473_v63  ;;  %v2773_v62 = vld [vmem:[%s4594_s5 + $0x348] sm:$0xff]  ;;  %v2739_v63 = vld [vmem:[%s4594_s5 + $0x238] sm:$0xff] }
 0x238   : > { %v3599_v53 = vpop.eup %3598  ;;  %v2499_v55 = vcombine.low %v3595_v8, %v3597_v52  ;;  %v2474_v9 = vmul.f32 0.25, %v2466_v45  ;;  %v2759_v8 = vld [vmem:[%s4594_s5 + $0x2d8] sm:$0xff] }
 0x239   : > { %v3601_v57 = vpop.eup %3600  ;;  %3604 = vrsqrt.f32 %v2480_v5  ;;  %v2791_v52 = vld [vmem:[%s4594_s5 + $0x3d8] sm:$0xff]  ;;  %v2754_v5 = vld [vmem:[%s4594_s5 + $0x2b0] sm:$0xff] }
 0x23a   : > { %v2507_v61 = vmul.f32 %v2499_v55, %v4302_v26  ;;  %v2500_v44 = vcombine.low %v3599_v53, %v3601_v57  ;;  %v2482_v54 = vadd.f32 1e-05, %v2474_v9  ;;  %3606 = vrsqrt.f32 %v2481_v18  ;;  %v2757_v55 = vld [vmem:[%s4594_s5 + $0x2c8] sm:$0xff]  ;;  %v2755_v45 = vld [vmem:[%s4594_s5 + $0x2b8] sm:$0xff]  ;;  %v2738_v18 = vld [vmem:[%s4594_s5 + $0x230] sm:$0xff] }
 0x23b   : > { %v2547_v53 = vcombine.low %v2532_v33, %v2536_v35  ;;  %v2548_v57 = vcombine.low %v2540_v42, %v2544_v50  ;;  %v2787_v9 = vld [vmem:[%s4594_s5 + $0x3b8] sm:$0xff]  ;;  %v2782_v33 = vld [vmem:[%s4594_s5 + $0x390] sm:$0xff]  ;;  %v2733_v35 = vld [vmem:[%s4594_s5 + $0x208] sm:$0xff] }
 0x23c   : > { %v2553_v7 = vmul.f32 %v2545_v38, %v2507_v61  ;;  %v2508_v4 = vmul.f32 %v2500_v44, %v4312_v34  ;;  %3608 = vrsqrt.f32 %v2482_v54  ;;  %v2740_v44 = vld [vmem:[%s4594_s5 + $0x240] sm:$0xff]  ;;  %v2753_v54 = vld [vmem:[%s4594_s5 + $0x2a8] sm:$0xff] }
 0x23d   : > { %v2780_v50 = vld [vmem:[%s4594_s5 + $0x380] sm:$0xff] }
 0x23e   : > { %v2599_v10 = vadd.f32 %v4203_v2, %v2553_v7  ;;  %v2554_v11 = vmul.f32 %v2546_v58, %v2508_v4  ;;  %v2747_v2 = vld [vmem:[%s4594_s5 + $0x278] sm:$0xff]  ;;  %v2756_v58 = vld [vmem:[%s4594_s5 + $0x2c0] sm:$0xff] }
 0x23f   : > { %v2772_v7 = vld [vmem:[%s4594_s5 + $0x340] sm:$0xff] }
 0x240   : > { %vm2603_vm1 = vcmp.gt.f32.partialorder %v2599_v10, 0.0  ;;  %v2607_v26 = vmul.f32 0.2, %v2599_v10  ;;  %v2600_v6 = vadd.f32 %v4241_v21, %v2554_v11  ;;  %v2762_v21 = vld [vmem:[%s4594_s5 + $0x2f0] sm:$0xff] }
 0x242   : > { %v4352_v12 = vsel %vm2603_vm1, %v2599_v10, %v2607_v26  ;;  %vm2604_vm2 = vcmp.gt.f32.partialorder %v2600_v6, 0.0  ;;  %v2608_v13 = vmul.f32 0.2, %v2600_v6  ;;  %v2771_v10 = vld [vmem:[%s4594_s5 + $0x338] sm:$0xff]  ;;  %v2786_v26 = vld [vmem:[%s4594_s5 + $0x3b0] sm:$0xff] }
 0x243   : > { %v2807_v34 = vcombine.high %v4352_v12, %v4352_v12 }
 0x244   : > { %v4359_v25 = vsel %vm2604_vm2, %v2600_v6, %v2608_v13  ;;  %v3603_v27 = vpop.eup %3602  ;;  %v2737_v6 = vld [vmem:[%s4594_s5 + $0x228] sm:$0xff] }
 0x245   : > { %2879 = vmatprep.mubr.f32.mxu0 %v2807_v34  ;;  %v2808_v14 = vcombine.high %v4359_v25, %v4359_v25  ;;  %v2752_v34 = vld [vmem:[%s4594_s5 + $0x2a0] sm:$0xff] }
 0x246   : > { %2880 = vmatmul.mubr.f32.vlgmr.msra.gmra.mxu0 %v4352_v12  ;;  %v3605_v36 = vpop.eup %3604 }
 0x247   : > { %3513 = vmatpush3.msra.mxu0 %v2747_v2  ;;  %2949 = vmatprep.mubr.f32.mxu1 %v2808_v14  ;;  %v3607_v40 = vpop.eup %3606  ;;  %v2501_v41 = vcombine.low %v3603_v27, %v3605_v36  ;;  %v2785_v2 = vld [vmem:[%s4594_s5 + $0x3a8] sm:$0xff]  ;;  %v2736_v14 = vld [vmem:[%s4594_s5 + $0x220] sm:$0xff]  ;;  %v2783_v27 = vld [vmem:[%s4594_s5 + $0x398] sm:$0xff] }
 0x248   : > { %3514 = vmatprep.subr.mxu0 %v2762_v21  ;;  %2950 = vmatmul.mubr.f32.vlgmr.msra.gmra.mxu1 %v4359_v25  ;;  %v2766_v36 = vld [vmem:[%s4594_s5 + $0x310] sm:$0xff] }
 0x249   : > { %3515 = vmatpush3.msra.mxu0 %v2746_v16  ;;  %3548 = vmatpush3.msra.mxu1 %v2779_v19  ;;  %v3609_v38 = vpop.eup %3608  ;;  %v2509_v15 = vmul.f32 %v2501_v41, %v4322_v60  ;;  %v2774_v60 = vld [vmem:[%s4594_s5 + $0x350] sm:$0xff]  ;;  %v2751_v16 = vld [vmem:[%s4594_s5 + $0x298] sm:$0xff]  ;;  %v2784_v19 = vld [vmem:[%s4594_s5 + $0x3a0] sm:$0xff] }
 0x24a   : > { %3516 = vmatprep.subr.mxu0 %v2761_v49  ;;  %3549 = vmatprep.subr.mxu1 %v2794_v20  ;;  %v2502_v56 = vcombine.low %v3607_v40, %v3609_v38  ;;  %v2735_v49 = vld [vmem:[%s4594_s5 + $0x218] sm:$0xff]  ;;  %v2768_v20 = vld [vmem:[%s4594_s5 + $0x320] sm:$0xff]  ;;  %v2781_v40 = vld [vmem:[%s4594_s5 + $0x388] sm:$0xff]  ;;  %v3626_v38 = vmov 839922192  }
 0x24b   : > { %3517 = vmatpush3.msra.mxu0 %v2745_v23  ;;  %3550 = vmatpush3.msra.mxu1 %v2778_v24  ;;  %v2555_v1 = vmul.f32 %v2547_v53, %v2509_v15  ;;  %v2750_v24 = vld [vmem:[%s4594_s5 + $0x290] sm:$0xff]  ;;  %v2765_v41 = vld [vmem:[%s4594_s5 + $0x308] sm:$0xff] }
 0x24c   : > { %3518 = vmatprep.subr.mxu0 %v2760_v29  ;;  %3551 = vmatprep.subr.mxu1 %v2793_v30  ;;  %v2510_v61 = vmul.f32 %v2502_v56, %v4327_v3  ;;  %v2788_v3 = vld [vmem:[%s4594_s5 + $0x3c0] sm:$0xff]  ;;  %v2734_v29 = vld [vmem:[%s4594_s5 + $0x210] sm:$0xff]  ;;  %v2767_v30 = vld [vmem:[%s4594_s5 + $0x318] sm:$0xff] }
 0x24d   : > { %3519 = vmatpush3.msra.mxu0 %v2744_v31  ;;  %3552 = vmatpush3.msra.mxu1 %v2777_v32  ;;  %v2601_v11 = vadd.f32 %v4271_v43, %v2555_v1  ;;  %v2770_v43 = vld [vmem:[%s4594_s5 + $0x330] sm:$0xff]  ;;  %v2749_v32 = vld [vmem:[%s4594_s5 + $0x288] sm:$0xff]  ;;  %v3612_v56 = vld [vmem:[%s4596_s7] sm:$0xff] }
 0x24e   : > { %3520 = vmatprep.subr.mxu0 %v2759_v8  ;;  %3553 = vmatprep.subr.mxu1 %v2792_v37  ;;  %v2556_v4 = vmul.f32 %v2548_v57, %v2510_v61  ;;  %v2748_v37 = vld [vmem:[%s4594_s5 + $0x280] sm:$0xff] }
 0x24f   : > { %3521 = vmatpush3.msra.mxu0 %v2743_v22  ;;  %3554 = vmatpush3.msra.mxu1 %v2776_v28  ;;  %v2609_v21 = vmul.f32 0.2, %v2601_v11  ;;  %vm2605_vm3 = vcmp.gt.f32.partialorder %v2601_v11, 0.0  ;;  %v2732_v28 = vld [vmem:[%s4594_s5 + $0x200] sm:$0xff] }
 0x250   : > { %3522 = vmatprep.subr.mxu0 %v2758_v51  ;;  %3555 = vmatprep.subr.mxu1 %v2791_v52  ;;  %v2602_v13 = vadd.f32 %v4291_v0, %v2556_v4  ;;  %v2769_v0 = vld [vmem:[%s4594_s5 + $0x328] sm:$0xff]  ;;  %v2764_v51 = vld [vmem:[%s4594_s5 + $0x300] sm:$0xff] }
 0x251   : > { %3523 = vmatpush3.msra.mxu0 %v2742_v47  ;;  %3556 = vmatpush3.msra.mxu1 %v2775_v48  ;;  %v2613_v31 = vsel %vm2605_vm3, %v2601_v11, %v2609_v21  ;;  %v2657_v47 = vunpack.c.l.s4 %v3626_v38 }
 0x252   : > { %3524 = vmatprep.subr.mxu0 %v2757_v55  ;;  %3557 = vmatprep.subr.mxu1 %v2790_v39  ;;  %v2610_v23 = vmul.f32 0.2, %v2602_v13  ;;  %vm2606_vm4 = vcmp.gt.f32.partialorder %v2602_v13, 0.0  ;;  %v2809_v22 = vcombine.high %v2613_v31, %v2613_v31 }
 0x253   : > { %3525 = vmatpush3.msra.mxu0 %v2741_v17  ;;  %3558 = vmatpush3.msra.mxu1 %v2774_v60  ;;  %v2658_v48 = vunpack.c.0.s8 %v2657_v47  ;;  %v3613_v60 = vld [vmem:[%s4596_s7 + $0x8] sm:$0xff] }
 0x254   : > { %3526 = vmatprep.subr.mxu0 %v2756_v58  ;;  %3559 = vmatprep.subr.mxu1 %v2789_v59  ;;  %v2614_v8 = vsel %vm2606_vm4, %v2602_v13, %v2610_v23  ;;  %v3614_v58 = vld [vmem:[%s4596_s7 + $0x10] sm:$0xff] }
 0x255   : > { %3527 = vmatpush3.msra.mxu0 %v2740_v44  ;;  %3560 = vmatpush3.msra.mxu1 %v2773_v62  ;;  %v2810_v42 = vcombine.high %v2614_v8, %v2614_v8  ;;  %v2661_v15 = vsub.s32 %v2658_v48, %v3720_v46  ;;  %v3615_v62 = vld [vmem:[%s4596_s7 + $0x18] sm:$0xff] }
 0x256   : > { %3528 = vmatprep.subr.mxu0 %v2755_v45  ;;  %3561 = vmatprep.subr.mxu1 %v2788_v3 }
 0x257   : > { %3529 = vmatpush3.msra.mxu0 %v2739_v63  ;;  %3562 = vmatpush3.msra.mxu1 %v2772_v7 }
 0x258   : > { %3530 = vmatprep.subr.mxu0 %v2754_v5  ;;  %3563 = vmatprep.subr.mxu1 %v2787_v9 }
 0x259   : > { %3531 = vmatpush3.msra.mxu0 %v2738_v18  ;;  %3564 = vmatpush3.msra.mxu1 %v2771_v10 }
 0x25a   : > { %3532 = vmatprep.subr.mxu0 %v2753_v54  ;;  %3565 = vmatprep.subr.mxu1 %v2786_v26 }
 0x25b   : > { %3533 = vmatpush3.msra.mxu0 %v2737_v6  ;;  %3566 = vmatpush3.msra.mxu1 %v2770_v43 }
 0x25c   : > { %3534 = vmatprep.subr.mxu0 %v2752_v34  ;;  %3567 = vmatprep.subr.mxu1 %v2785_v2 }
 0x25d   : > { %3535 = vmatpush3.msra.mxu0 %v2736_v14  ;;  %3568 = vmatpush3.msra.mxu1 %v2769_v0 }
 0x25e   : > { %3536 = vmatprep.subr.mxu0 %v2751_v16  ;;  %3569 = vmatprep.subr.mxu1 %v2784_v19 }
 0x25f   : > { %3537 = vmatpush3.msra.mxu0 %v2735_v49  ;;  %3570 = vmatpush3.msra.mxu1 %v2768_v20  ;;  %v3438_v49 = vld [vmem:[#allocation3] ss:$0 sm:$0xff] }
 0x260   : > { %3538 = vmatprep.subr.mxu0 %v2750_v24  ;;  %3571 = vmatprep.subr.mxu1 %v2783_v27 }
 0x261   : > { %3539 = vmatpush3.msra.mxu0 %v2734_v29  ;;  %3572 = vmatpush3.msra.mxu1 %v2767_v30 }
 0x262   : > { %3540 = vmatprep.subr.mxu0 %v2749_v32  ;;  %3573 = vmatprep.subr.mxu1 %v2782_v33 }
 0x263   : > { %3541 = vmatpush3.msra.mxu0 %v2733_v35  ;;  %3574 = vmatpush3.msra.mxu1 %v2766_v36 }
 0x264   : > { %3542 = vmatprep.subr.mxu0 %v2748_v37  ;;  %3575 = vmatprep.subr.mxu1 %v2781_v40 }
 0x265   : > { %3543 = vmatpush3.msra.mxu0 %v2732_v28  ;;  %3019 = vmatprep.mubr.f32.mxu0 %v2809_v22 }
 0x266   : > { %3576 = vmatpush3.msra.mxu1 %v2765_v41  ;;  %3020 = vmatmul.mubr.f32.vlgmr.msra.gmra.mxu0 %v2613_v31 }
 0x267   : > { %3577 = vmatprep.subr.mxu1 %v2780_v50  ;;  %3089 = vmatprep.mubr.f32.mxu1 %v2810_v42 }
 0x268   : > { %3578 = vmatpush3.msra.mxu1 %v2764_v51 }
 0x269   : > { %3090 = vmatmul.mubr.f32.vlgmr.msra.gmra.mxu1 %v2614_v8 }
 0x286   : > { %v2651_v52 = vpop.xlane.xlu0 %2650 }
 0x287   : > { %3610 = vrsqrt.f32 %v2651_v52  ;;  %vm2652_vm5 = vcmp.gt.f32.partialorder %v2651_v52, 1.0 }
 0x294   : > { %v3611_v53 = vpop.eup %3610 }
 0x295   : > { %v2654_v55 = vsel %vm2652_vm5, %v3611_v53, 1.0 }
 0x296   : > { %v2662_v39 = vrot.slane %v2654_v55, %v2661_v15 }
 0x298   : > { %v2664_v17 = vmul.f32 %v3612_v56, %v2662_v39  ;;  %v2665_v57 = vmul.f32 %v3613_v60, %v2662_v39  ;;  %v2666_v59 = vmul.f32 %v3614_v58, %v2662_v39  ;;  %v2667_v1 = vmul.f32 %v3615_v62, %v2662_v39 }
 0x29a   : > { %v3095_v46 = vmul.f32 %v2664_v17, %v4352_v12  ;;  %v3096_v61 = vmul.f32 %v2665_v57, %v4359_v25  ;;  %v3097_v45 = vmul.f32 %v2666_v59, %v2613_v31  ;;  %v3098_v18 = vmul.f32 %v2667_v1, %v2614_v8 }
 0x29c   : > { %v3103_v44 = vcombine.high %v3095_v46, %v3095_v46  ;;  %v3104_v3 = vcombine.high %v3096_v61, %v3096_v61  ;;  %v3111_v63 = vsel %vm2309_vm0, %v3095_v46, 0.0  ;;  %v3114_v5 = vsel %vm2309_vm0, %v3096_v61, 0.0 }
 0x29d   : > { %v3105_v12 = vcombine.high %v3097_v45, %v3097_v45  ;;  %v3118_v11 = vsel %vm2309_vm0, %v3097_v45, 0.0  ;;  %v3106_v26 = vcombine.high %v3098_v18, %v3098_v18  ;;  %v3122_v13 = vsel %vm2309_vm0, %v3098_v18, 0.0 }
 0x29e   : > { %v3112_v7 = vsel %vm2309_vm0, %v3103_v44, 0.0  ;;  %v3116_v25 = vsel %vm2309_vm0, %v3104_v3, 0.0 }
 0x29f   : > { %v3113_v4 = vadd.f32 %v3112_v7, %v3111_v63  ;;  %v3120_v6 = vsel %vm2309_vm0, %v3105_v12, 0.0  ;;  %v3124_v2 = vsel %vm2309_vm0, %v3106_v26, 0.0 }
 0x2a1   : > { %v3115_v9 = vadd.f32 %v3114_v5, %v3113_v4 }
 0x2a3   : > { %v3117_v10 = vadd.f32 %v3116_v25, %v3115_v9 }
 0x2a5   : > { %v3119_v54 = vadd.f32 %v3118_v11, %v3117_v10 }
 0x2a7   : > { %v3121_v43 = vadd.f32 %v3120_v6, %v3119_v54 }
 0x2a9   : > { %v3123_v34 = vadd.f32 %v3122_v13, %v3121_v43 }
 0x2ab   : > { %v3125_v14 = vadd.f32 %v3124_v2, %v3123_v34 }
 0x2ad   : > { %3126 = vadd.xlane.f32.xlu0 %v3125_v14 }
 0x306   : > { %v3474_v0 = vpop.f32.mrf.mxu0 }
 0x308   : > { %v3475_v21 = vpop.f32.mrf.mxu0  ;;  %v3509_v16 = vpop.f32.mrf.mxu1 }
 0x309   : > { %v3476_v19 = vadd.f32 %v3475_v21, %v3474_v0 }
 0x30a   : > { %v3510_v20 = vpop.f32.mrf.mxu1 }
 0x30b   : > { %v2882_v23 = vadd.f32 %v3476_v19, %v3438_v49  ;;  %v3511_v24 = vadd.f32 %v3510_v20, %v3509_v16 }
 0x30d   : > { %v2952_v30 = vadd.f32 %v3511_v24, %v2882_v23 }
 0x326   : > { %v3544_v27 = vpop.f32.mrf.mxu0 }
 0x328   : > { %v3545_v29 = vpop.f32.mrf.mxu0 }
 0x329   : > { %v3546_v31 = vadd.f32 %v3545_v29, %v3544_v27  ;;  %v3579_v32 = vpop.f32.mrf.mxu1 }
 0x32b   : > { %v3022_v33 = vadd.f32 %v3546_v31, %v2952_v30  ;;  %v3580_v35 = vpop.f32.mrf.mxu1 }
 0x32c   : > { %v3581_v36 = vadd.f32 %v3580_v35, %v3579_v32 }
 0x32e   : > { %v3092_v8 = vadd.f32 %v3581_v36, %v3022_v33 }
 0x336   : > { %v3127_v37 = vpop.xlane.xlu0 %3126 }
 0x337   : > { %v3128_v40 = vadd.f32 %v3127_v37, %v3092_v8 }
 0x339   : > { %3130 = vst.msk [vmem:[%s4597_s8] sm:$0xf] %vm3129_vm6, %v3128_v40 }
 0x33a PF: > { %s20_s29 = sadd.s32 1, %s3622_s29  }
 0x33b   : > { %p17_p7 = scmp.ge.s32.totalorder %s20_s29, 6  }
 0x33d   :  { %19 = sbr.rel (!%p17_p7) target bundleno = 3 (0x3), region = 89 }

</bundles_post_ra>
